<compile_context>
chip_gen: v7x
topology: tpu7x:2x2x1
jax: 0.10.0
libtpu: 0.0.40
codegen_flags: <defaults>
</compile_context>

<pallas_src>
import numpy as np
import jax
import jax.numpy as jnp
from jax.experimental import pallas as pl
from jax.experimental.pallas import tpu as pltpu

_EPS = 1e-5
# 22x22 input so the final feature map is 1x1x64, matching fc_1 = nn.Linear(64, 16).
_H_IN, _W_IN, _C_IN = 22, 22, 2

_VMEM = pl.BlockSpec(memory_space=pltpu.MemorySpace.VMEM)


# ----------------------------- fused Pallas kernel -----------------------------

def _conv_pool_block(n, src_ref, r_ref, b_ref, cbuf_ref, store_fn,
                     conv_k, pool_k, n_conv_rows, n_pool_rows):
    """One (conv -> maxpool(stride 2) -> +bias -> relu) block for image `n`.

    src_ref : (N, rows, in_lanes) VMEM ref, lane layout = col*Cin + c; rows already
              include any zero padding rows required by the conv.
    r_ref   : (conv_k, pool_k, in_lanes, out_lanes) banded weights; r_ref[i, dj]
              maps the flattened input lanes (conv row-tap i) to the pooled,
              column-decimated output lanes for pooling column-offset dj.
    b_ref   : (1, out_lanes) bias, tiled per pooled column.
    cbuf_ref: (n_conv_rows, out_lanes) VMEM scratch (column-pooled conv rows).
    store_fn(p, row): stores finished pooled row p, row shape (1, out_lanes).
    """
    lhs = [src_ref[n, i:i + n_conv_rows, :] for i in range(conv_k)]

    # conv + column-direction pooling: stride-2 decimation / padding / channel
    # contraction are already baked into r_ref, so the column max over the pool
    # window is a plain elementwise max of pool_k matmul results.
    colmax = None
    for dj in range(pool_k):
        acc = jnp.dot(lhs[0], r_ref[0, dj], preferred_element_type=jnp.float32)
        for i in range(1, conv_k):
            acc = acc + jnp.dot(lhs[i], r_ref[i, dj],
                                preferred_element_type=jnp.float32)
        colmax = acc if colmax is None else jnp.maximum(colmax, acc)
    cbuf_ref[...] = colmax

    # row-direction pooling + bias + relu per pooled output row.
    bias = b_ref[...]
    for p in range(n_pool_rows):
        row = cbuf_ref[2 * p:2 * p + 1, :]
        for dr in range(1, pool_k):
            row = jnp.maximum(row, cbuf_ref[2 * p + dr:2 * p + dr + 1, :])
        store_fn(p, jnp.maximum(row + bias, 0.0))


def _custom_cnn_kernel(
        x_ref,                      # (N, 22, 44)  input, lanes = w*Cin + c
        r1_ref, b1_ref,             # (3,3,44,144), (1,144)   conv_1 (bn_1 folded)
        bn2s_ref, bn2t_ref,         # (1,144), (1,144)        bn_2 eval affine
        r2_ref, b2_ref,             # (3,3,144,128), (1,128)  conv_2
        r3_ref, b3_ref,             # (3,2,128,64), (1,64)    conv_3 (bn_3 folded)
        w1_ref, fb1_ref,            # (64,16), (1,16)         fc_1 (bn_4 folded)
        w2_ref, fb2_ref,            # (16,C), (1,C)           fc_2 (bn_5 folded)
        out_ref,                    # (N, C)
        s1_ref,                     # (N, 11, 144) scratch: block-1 out + zero pad rows
        s2_ref,                     # (N, 4, 128)  scratch: block-2 out
        feat_ref,                   # (N, 64)      scratch: flattened block-3 out
        c1_ref, c2_ref, c3_ref):    # per-block column-pooled conv-row buffers
    n_img = x_ref.shape[0]
    bn2_s = bn2s_ref[...]
    bn2_t = bn2t_ref[...]

    for n in range(n_img):
        # -------- block 1: (bn_1 folded) conv_1 -> mp 3x3/2 -> relu -> bn_2 --------
        # zero rows 0 and 10 of s1 realise conv_2's H-direction zero padding of the
        # bn_2 output (the W-direction padding is folded into r2).
        s1_ref[n, 0:1, :] = jnp.zeros((1, s1_ref.shape[2]), jnp.float32)
        s1_ref[n, 10:11, :] = jnp.zeros((1, s1_ref.shape[2]), jnp.float32)

        def store1(p, row):
            s1_ref[n, 1 + p:2 + p, :] = row * bn2_s + bn2_t

        _conv_pool_block(n, x_ref, r1_ref, b1_ref, c1_ref, store1,
                         conv_k=3, pool_k=3, n_conv_rows=19, n_pool_rows=9)

        # -------- block 2: conv_2 (pad 1) -> mp 3x3/2 -> relu --------
        def store2(p, row):
            s2_ref[n, p:p + 1, :] = row

        _conv_pool_block(n, s1_ref, r2_ref, b2_ref, c2_ref, store2,
                         conv_k=3, pool_k=3, n_conv_rows=9, n_pool_rows=4)

        # -------- block 3: (bn_3 folded) conv_3 -> mp 2x2/2 -> relu --------
        def store3(p, row):
            feat_ref[n:n + 1, :] = row   # 1x1 spatial -> this is the flattened feature

        _conv_pool_block(n, s2_ref, r3_ref, b3_ref, c3_ref, store3,
                         conv_k=3, pool_k=2, n_conv_rows=2, n_pool_rows=1)

    # -------- head: (bn_4 folded) fc_1 -> relu -> (bn_5 folded) fc_2 --------
    # TODO(synk): dropout(p=0.3) is identity in eval mode and is not implemented.
    h = feat_ref[...]
    z = jnp.maximum(
        jnp.dot(h, w1_ref[...], preferred_element_type=jnp.float32) + fb1_ref[...],
        0.0)
    out_ref[...] = (
        jnp.dot(z, w2_ref[...], preferred_element_type=jnp.float32) + fb2_ref[...])


# ----------------------------- parameter preparation (host, once) -----------------------------

def _fold_bn(gamma, beta, mean, var, eps=_EPS):
    s = gamma / np.sqrt(var + eps)
    return s, beta - mean * s


def _banded_conv_pool_weights(w_hwio, n_in_cols, n_pool_cols, pool_k, stride, pad):
    """Build R[i, dj]: (in_cols*Cin, pool_cols*Cout) banded matrices that fuse
    conv-over-columns, channel contraction, zero padding (absent entries) and the
    stride-`stride` column decimation of the following maxpool."""
    kh, kw, cin, cout = w_hwio.shape
    r = np.zeros((kh, pool_k, n_in_cols * cin, n_pool_cols * cout), np.float32)
    for dj in range(pool_k):
        for j in range(kw):
            for q in range(n_pool_cols):
                w_in = stride * q + dj + j - pad
                if 0 <= w_in < n_in_cols:
                    r[:, dj,
                      w_in * cin:(w_in + 1) * cin,
                      q * cout:(q + 1) * cout] = w_hwio[:, j]
    return r


def prepare_fused_params(p, eps=_EPS):
    """Fold eval-mode BatchNorms into adjacent conv/fc weights and build the banded
    conv+pool MXU matrices consumed by the fused kernel."""
    pn = {k: np.asarray(v, np.float32) for k, v in p.items()}
    s1, t1 = _fold_bn(pn['bn1_g'], pn['bn1_b'], pn['bn1_m'], pn['bn1_v'], eps)
    s2, t2 = _fold_bn(pn['bn2_g'], pn['bn2_b'], pn['bn2_m'], pn['bn2_v'], eps)
    s3, t3 = _fold_bn(pn['bn3_g'], pn['bn3_b'], pn['bn3_m'], pn['bn3_v'], eps)
    s4, t4 = _fold_bn(pn['bn4_g'], pn['bn4_b'], pn['bn4_m'], pn['bn4_v'], eps)
    s5, t5 = _fold_bn(pn['bn5_g'], pn['bn5_b'], pn['bn5_m'], pn['bn5_v'], eps)

    # bn_1 / bn_3 fold exactly into the following *valid* (unpadded) convolutions.
    w1 = pn['conv1_w'] * s1[None, None, :, None]
    b1 = pn['conv1_b'] + np.einsum('ijco,c->o', pn['conv1_w'], t1)
    w3 = pn['conv3_w'] * s3[None, None, :, None]
    b3 = pn['conv3_b'] + np.einsum('ijco,c->o', pn['conv3_w'], t3)
    # bn_2 is applied in-kernel (conv_2 zero-pads bn_2's output; folding its shift
    # into the conv bias would be wrong on the border pixels).
    w2, b2 = pn['conv2_w'], pn['conv2_b']
    # bn_4 (64 ch, 1x1 spatial) folds into fc_1; bn_5 folds into fc_2.
    fw1 = s4[:, None] * pn['fc1_w']
    fb1 = pn['fc1_b'] + t4 @ pn['fc1_w']
    fw2 = s5[:, None] * pn['fc2_w']
    fb2 = pn['fc2_b'] + t5 @ pn['fc2_w']

    fused = {
        'r1': _banded_conv_pool_weights(w1, n_in_cols=_W_IN, n_pool_cols=9,
                                        pool_k=3, stride=2, pad=0),
        'b1': np.tile(b1, 9)[None, :],
        'bn2s': np.tile(s2, 9)[None, :],
        'bn2t': np.tile(t2, 9)[None, :],
        'r2': _banded_conv_pool_weights(w2, n_in_cols=9, n_pool_cols=4,
                                        pool_k=3, stride=2, pad=1),
        'b2': np.tile(b2, 4)[None, :],
        'r3': _banded_conv_pool_weights(w3, n_in_cols=4, n_pool_cols=1,
                                        pool_k=2, stride=2, pad=0),
        'b3': b3[None, :],
        'fw1': fw1, 'fb1': fb1[None, :],
        'fw2': fw2, 'fb2': fb2[None, :],
    }
    return {k: jnp.asarray(v) for k, v in fused.items()}


# ----------------------------- forward wrapper -----------------------------

def custom_cnn_forward(x_nchw, fused):
    """Eval-mode CustomCNN.forward. `fused` comes from prepare_fused_params()."""
    n = x_nchw.shape[0]
    num_classes = fused['fw2'].shape[1]
    # NCHW -> NHWC, then flatten (W, Cin) onto lanes: (N, H, W*Cin).
    x = jnp.transpose(x_nchw.astype(jnp.float32), (0, 2, 3, 1))
    x = x.reshape(n, _H_IN, _W_IN * _C_IN)

    return pl.pallas_call(
        _custom_cnn_kernel,
        out_shape=jax.ShapeDtypeStruct((n, num_classes), jnp.float32),
        in_specs=[_VMEM] * 13,
        out_specs=_VMEM,
        scratch_shapes=[
            pltpu.VMEM((n, 11, 144), jnp.float32),   # s1: block-1 out (+ H-pad rows)
            pltpu.VMEM((n, 4, 128), jnp.float32),    # s2: block-2 out
            pltpu.VMEM((n, 64), jnp.float32),        # flattened features
            pltpu.VMEM((19, 144), jnp.float32),      # block-1 column-pooled conv rows
            pltpu.VMEM((9, 128), jnp.float32),       # block-2
            pltpu.VMEM((2, 64), jnp.float32),        # block-3
        ],
    )(x, fused['r1'], fused['b1'], fused['bn2s'], fused['bn2t'],
      fused['r2'], fused['b2'], fused['r3'], fused['b3'],
      fused['fw1'], fused['fb1'], fused['fw2'], fused['fb2'])


# ----------------------------- reference (pure JAX) & params -----------------------------

def reference_forward(x_nchw, p, eps=_EPS):
    hp = jax.lax.Precision.HIGHEST

    def bn(x, pre):
        s = p[pre + '_g'] / jnp.sqrt(p[pre + '_v'] + eps)
        t = p[pre + '_b'] - p[pre + '_m'] * s
        return x * s[None, :, None, None] + t[None, :, None, None]

    def conv(x, w, b, pad):
        y = jax.lax.conv_general_dilated(
            x, w, (1, 1), ((pad, pad), (pad, pad)),
            dimension_numbers=('NCHW', 'HWIO', 'NCHW'), precision=hp)
        return y + b[None, :, None, None]

    def mp(x, k, s):
        return jax.lax.reduce_window(x, -jnp.inf, jax.lax.max,
                                     (1, 1, k, k), (1, 1, s, s), 'VALID')

    relu = lambda v: jnp.maximum(v, 0.0)
    x = x_nchw.astype(jnp.float32)
    x = relu(mp(conv(bn(x, 'bn1'), p['conv1_w'], p['conv1_b'], 0), 3, 2))
    x = relu(mp(conv(bn(x, 'bn2'), p['conv2_w'], p['conv2_b'], 1), 3, 2))
    x = relu(mp(conv(bn(x, 'bn3'), p['conv3_w'], p['conv3_b'], 0), 2, 2))
    x = bn(x, 'bn4').reshape(x.shape[0], -1)
    x = relu(jnp.dot(x, p['fc1_w'], precision=hp) + p['fc1_b'])
    s5 = p['bn5_g'] / jnp.sqrt(p['bn5_v'] + eps)
    x = x * s5 + (p['bn5_b'] - p['bn5_m'] * s5)
    return jnp.dot(x, p['fc2_w'], precision=hp) + p['fc2_b']


def init_params(key, num_classes):
    def u(k, shape, fan_in):
        bound = 1.0 / np.sqrt(fan_in)
        return jax.random.uniform(k, shape, jnp.float32, -bound, bound)

    ks = jax.random.split(key, 30)
    p = {
        'conv1_w': u(ks[0], (3, 3, 2, 16), 3 * 3 * 2),
        'conv1_b': u(ks[1], (16,), 3 * 3 * 2),
        'conv2_w': u(ks[2], (3, 3, 16, 32), 3 * 3 * 16),
        'conv2_b': u(ks[3], (32,), 3 * 3 * 16),
        'conv3_w': u(ks[4], (3, 3, 32, 64), 3 * 3 * 32),
        'conv3_b': u(ks[5], (64,), 3 * 3 * 32),
        'fc1_w': u(ks[6], (64, 16), 64),
        'fc1_b': u(ks[7], (16,), 64),
        'fc2_w': u(ks[8], (16, num_classes), 16),
        'fc2_b': u(ks[9], (num_classes,), 16),
    }
    # Eval-mode BatchNorm parameters / running statistics.  Non-trivial values so
    # the BN-folding paths are genuinely exercised by the self-check.
    i = 10
    for name, c in (('bn1', 2), ('bn2', 16), ('bn3', 32), ('bn4', 64), ('bn5', 16)):
        p[f'{name}_g'] = 1.0 + 0.1 * jax.random.normal(ks[i], (c,), jnp.float32)
        p[f'{name}_b'] = 0.1 * jax.random.normal(ks[i + 1], (c,), jnp.float32)
        p[f'{name}_m'] = 0.1 * jax.random.normal(ks[i + 2], (c,), jnp.float32)
        p[f'{name}_v'] = jax.random.uniform(ks[i + 3], (c,), jnp.float32, 0.5, 1.5)
        i += 4
    return p


if __name__ == "__main__":
    num_classes = 4
    key = jax.random.PRNGKey(0)
    k_x, k_p = jax.random.split(key)
    # NCHW input as in PyTorch: 22x22 spatial so the flatten yields (N, 64).
    x = jax.random.normal(k_x, (2, _C_IN, _H_IN, _W_IN), jnp.float32)
    params = init_params(k_p, num_classes)

    fused = prepare_fused_params(params)           # host-side, once per model
    fwd = jax.jit(custom_cnn_forward)
    logits = fwd(x, fused)
    jax.block_until_ready(logits)
    assert logits.shape == (2, num_classes), logits.shape

    ref = reference_forward(x, params)
    np.testing.assert_allclose(np.asarray(logits), np.asarray(ref),
                               rtol=2e-2, atol=2e-2)
    print("KERNEL_OK")
</pallas_src>

<mosaic_0001>
module attributes {stable_mosaic.version = 11 : i64} {
  func.func @_custom_cnn_kernel(%arg0: memref<2x22x44xf32, #tpu.memory_space<vmem>>, %arg1: memref<3x3x44x144xf32, #tpu.memory_space<vmem>>, %arg2: memref<1x144xf32, #tpu.memory_space<vmem>>, %arg3: memref<1x144xf32, #tpu.memory_space<vmem>>, %arg4: memref<1x144xf32, #tpu.memory_space<vmem>>, %arg5: memref<3x3x144x128xf32, #tpu.memory_space<vmem>>, %arg6: memref<1x128xf32, #tpu.memory_space<vmem>>, %arg7: memref<3x2x128x64xf32, #tpu.memory_space<vmem>>, %arg8: memref<1x64xf32, #tpu.memory_space<vmem>>, %arg9: memref<64x16xf32, #tpu.memory_space<vmem>>, %arg10: memref<1x16xf32, #tpu.memory_space<vmem>>, %arg11: memref<16x4xf32, #tpu.memory_space<vmem>>, %arg12: memref<1x4xf32, #tpu.memory_space<vmem>>, %arg13: memref<2x4xf32, #tpu.memory_space<vmem>>, %arg14: memref<2x11x144xf32, #tpu.memory_space<vmem>>, %arg15: memref<2x4x128xf32, #tpu.memory_space<vmem>>, %arg16: memref<2x64xf32, #tpu.memory_space<vmem>>, %arg17: memref<19x144xf32, #tpu.memory_space<vmem>>, %arg18: memref<9x128xf32, #tpu.memory_space<vmem>>, %arg19: memref<2x64xf32, #tpu.memory_space<vmem>>) attributes {dimension_semantics = [], scalar_prefetch = 0 : i64, scratch_operands = 6 : i64, tpu.core_type = #tpu.core_type<tc>} {
    %c0 = arith.constant 0 : index
    %c0_0 = arith.constant 0 : index
    %0 = vector.load %arg3[%c0, %c0_0] : memref<1x144xf32, #tpu.memory_space<vmem>>, vector<1x144xf32>
    %c0_1 = arith.constant 0 : index
    %c0_2 = arith.constant 0 : index
    %1 = vector.load %arg4[%c0_1, %c0_2] : memref<1x144xf32, #tpu.memory_space<vmem>>, vector<1x144xf32>
    %cst = arith.constant 0.000000e+00 : f32
    %2 = vector.broadcast %cst : f32 to vector<1x144xf32>
    %c0_3 = arith.constant 0 : index
    %c0_4 = arith.constant 0 : index
    %c0_5 = arith.constant 0 : index
    %3 = vector.load %arg14[%c0_3, %c0_4, %c0_5] : memref<2x11x144xf32, #tpu.memory_space<vmem>>, vector<1x1x144xf32>
    %4 = vector.shape_cast %3 : vector<1x1x144xf32> to vector<1x144xf32>
    %5 = vector.shape_cast %2 : vector<1x144xf32> to vector<1x1x144xf32>
    tpu.vector_store %arg14[%c0_3, %c0_4, %c0_5], %5 {strides = array<i32>} : memref<2x11x144xf32, #tpu.memory_space<vmem>>, vector<1x1x144xf32>,
    %cst_6 = arith.constant 0.000000e+00 : f32
    %6 = vector.broadcast %cst_6 : f32 to vector<1x144xf32>
    %c0_7 = arith.constant 0 : index
    %c10 = arith.constant 10 : index
    %c0_8 = arith.constant 0 : index
    %7 = vector.load %arg14[%c0_7, %c10, %c0_8] : memref<2x11x144xf32, #tpu.memory_space<vmem>>, vector<1x1x144xf32>
    %8 = vector.shape_cast %7 : vector<1x1x144xf32> to vector<1x144xf32>
    %9 = vector.shape_cast %6 : vector<1x144xf32> to vector<1x1x144xf32>
    tpu.vector_store %arg14[%c0_7, %c10, %c0_8], %9 {strides = array<i32>} : memref<2x11x144xf32, #tpu.memory_space<vmem>>, vector<1x1x144xf32>,
    %c0_9 = arith.constant 0 : index
    %c0_10 = arith.constant 0 : index
    %c0_11 = arith.constant 0 : index
    %10 = vector.load %arg0[%c0_9, %c0_10, %c0_11] : memref<2x22x44xf32, #tpu.memory_space<vmem>>, vector<1x19x44xf32>
    %11 = vector.shape_cast %10 : vector<1x19x44xf32> to vector<19x44xf32>
    %c0_12 = arith.constant 0 : index
    %c1 = arith.constant 1 : index
    %c0_13 = arith.constant 0 : index
    %12 = vector.load %arg0[%c0_12, %c1, %c0_13] : memref<2x22x44xf32, #tpu.memory_space<vmem>>, vector<1x19x44xf32>
    %13 = vector.shape_cast %12 : vector<1x19x44xf32> to vector<19x44xf32>
    %c0_14 = arith.constant 0 : index
    %c2 = arith.constant 2 : index
    %c0_15 = arith.constant 0 : index
    %14 = vector.load %arg0[%c0_14, %c2, %c0_15] : memref<2x22x44xf32, #tpu.memory_space<vmem>>, vector<1x19x44xf32>
    %15 = vector.shape_cast %14 : vector<1x19x44xf32> to vector<19x44xf32>
    %c0_16 = arith.constant 0 : index
    %c0_17 = arith.constant 0 : index
    %c0_18 = arith.constant 0 : index
    %c0_19 = arith.constant 0 : index
    %16 = vector.load %arg1[%c0_16, %c0_17, %c0_18, %c0_19] : memref<3x3x44x144xf32, #tpu.memory_space<vmem>>, vector<1x1x44x144xf32>
    %17 = vector.shape_cast %16 : vector<1x1x44x144xf32> to vector<44x144xf32>
    %cst_20 = arith.constant dense<0.000000e+00> : vector<19x144xf32>
    %18 = tpu.matmul %11, %17, %cst_20 {dimension_numbers = #tpu.dot_dimension_numbers<[1], [0], [0], [1], [0, 0, 1, 1], [], []>} : vector<19x44xf32>, vector<44x144xf32>, vector<19x144xf32> -> vector<19x144xf32>
    %c1_21 = arith.constant 1 : index
    %c0_22 = arith.constant 0 : index
    %c0_23 = arith.constant 0 : index
    %c0_24 = arith.constant 0 : index
    %19 = vector.load %arg1[%c1_21, %c0_22, %c0_23, %c0_24] : memref<3x3x44x144xf32, #tpu.memory_space<vmem>>, vector<1x1x44x144xf32>
    %20 = vector.shape_cast %19 : vector<1x1x44x144xf32> to vector<44x144xf32>
    %cst_25 = arith.constant dense<0.000000e+00> : vector<19x144xf32>
    %21 = tpu.matmul %13, %20, %cst_25 {dimension_numbers = #tpu.dot_dimension_numbers<[1], [0], [0], [1], [0, 0, 1, 1], [], []>} : vector<19x44xf32>, vector<44x144xf32>, vector<19x144xf32> -> vector<19x144xf32>
    %22 = arith.addf %18, %21 : vector<19x144xf32>
    %c2_26 = arith.constant 2 : index
    %c0_27 = arith.constant 0 : index
    %c0_28 = arith.constant 0 : index
    %c0_29 = arith.constant 0 : index
    %23 = vector.load %arg1[%c2_26, %c0_27, %c0_28, %c0_29] : memref<3x3x44x144xf32, #tpu.memory_space<vmem>>, vector<1x1x44x144xf32>
    %24 = vector.shape_cast %23 : vector<1x1x44x144xf32> to vector<44x144xf32>
    %cst_30 = arith.constant dense<0.000000e+00> : vector<19x144xf32>
    %25 = tpu.matmul %15, %24, %cst_30 {dimension_numbers = #tpu.dot_dimension_numbers<[1], [0], [0], [1], [0, 0, 1, 1], [], []>} : vector<19x44xf32>, vector<44x144xf32>, vector<19x144xf32> -> vector<19x144xf32>
    %26 = arith.addf %22, %25 : vector<19x144xf32>
    %c0_31 = arith.constant 0 : index
    %c1_32 = arith.constant 1 : index
    %c0_33 = arith.constant 0 : index
    %c0_34 = arith.constant 0 : index
    %27 = vector.load %arg1[%c0_31, %c1_32, %c0_33, %c0_34] : memref<3x3x44x144xf32, #tpu.memory_space<vmem>>, vector<1x1x44x144xf32>
    %28 = vector.shape_cast %27 : vector<1x1x44x144xf32> to vector<44x144xf32>
    %cst_35 = arith.constant dense<0.000000e+00> : vector<19x144xf32>
    %29 = tpu.matmul %11, %28, %cst_35 {dimension_numbers = #tpu.dot_dimension_numbers<[1], [0], [0], [1], [0, 0, 1, 1], [], []>} : vector<19x44xf32>, vector<44x144xf32>, vector<19x144xf32> -> vector<19x144xf32>
    %c1_36 = arith.constant 1 : index
    %c1_37 = arith.constant 1 : index
    %c0_38 = arith.constant 0 : index
    %c0_39 = arith.constant 0 : index
    %30 = vector.load %arg1[%c1_36, %c1_37, %c0_38, %c0_39] : memref<3x3x44x144xf32, #tpu.memory_space<vmem>>, vector<1x1x44x144xf32>
    %31 = vector.shape_cast %30 : vector<1x1x44x144xf32> to vector<44x144xf32>
    %cst_40 = arith.constant dense<0.000000e+00> : vector<19x144xf32>
    %32 = tpu.matmul %13, %31, %cst_40 {dimension_numbers = #tpu.dot_dimension_numbers<[1], [0], [0], [1], [0, 0, 1, 1], [], []>} : vector<19x44xf32>, vector<44x144xf32>, vector<19x144xf32> -> vector<19x144xf32>
    %33 = arith.addf %29, %32 : vector<19x144xf32>
    %c2_41 = arith.constant 2 : index
    %c1_42 = arith.constant 1 : index
    %c0_43 = arith.constant 0 : index
    %c0_44 = arith.constant 0 : index
    %34 = vector.load %arg1[%c2_41, %c1_42, %c0_43, %c0_44] : memref<3x3x44x144xf32, #tpu.memory_space<vmem>>, vector<1x1x44x144xf32>
    %35 = vector.shape_cast %34 : vector<1x1x44x144xf32> to vector<44x144xf32>
    %cst_45 = arith.constant dense<0.000000e+00> : vector<19x144xf32>
    %36 = tpu.matmul %15, %35, %cst_45 {dimension_numbers = #tpu.dot_dimension_numbers<[1], [0], [0], [1], [0, 0, 1, 1], [], []>} : vector<19x44xf32>, vector<44x144xf32>, vector<19x144xf32> -> vector<19x144xf32>
    %37 = arith.addf %33, %36 : vector<19x144xf32>
    %38 = arith.maximumf %26, %37 : vector<19x144xf32>
    %c0_46 = arith.constant 0 : index
    %c2_47 = arith.constant 2 : index
    %c0_48 = arith.constant 0 : index
    %c0_49 = arith.constant 0 : index
    %39 = vector.load %arg1[%c0_46, %c2_47, %c0_48, %c0_49] : memref<3x3x44x144xf32, #tpu.memory_space<vmem>>, vector<1x1x44x144xf32>
    %40 = vector.shape_cast %39 : vector<1x1x44x144xf32> to vector<44x144xf32>
    %cst_50 = arith.constant dense<0.000000e+00> : vector<19x144xf32>
    %41 = tpu.matmul %11, %40, %cst_50 {dimension_numbers = #tpu.dot_dimension_numbers<[1], [0], [0], [1], [0, 0, 1, 1], [], []>} : vector<19x44xf32>, vector<44x144xf32>, vector<19x144xf32> -> vector<19x144xf32>
    %c1_51 = arith.constant 1 : index
    %c2_52 = arith.constant 2 : index
    %c0_53 = arith.constant 0 : index
    %c0_54 = arith.constant 0 : index
    %42 = vector.load %arg1[%c1_51, %c2_52, %c0_53, %c0_54] : memref<3x3x44x144xf32, #tpu.memory_space<vmem>>, vector<1x1x44x144xf32>
    %43 = vector.shape_cast %42 : vector<1x1x44x144xf32> to vector<44x144xf32>
    %cst_55 = arith.constant dense<0.000000e+00> : vector<19x144xf32>
    %44 = tpu.matmul %13, %43, %cst_55 {dimension_numbers = #tpu.dot_dimension_numbers<[1], [0], [0], [1], [0, 0, 1, 1], [], []>} : vector<19x44xf32>, vector<44x144xf32>, vector<19x144xf32> -> vector<19x144xf32>
    %45 = arith.addf %41, %44 : vector<19x144xf32>
    %c2_56 = arith.constant 2 : index
    %c2_57 = arith.constant 2 : index
    %c0_58 = arith.constant 0 : index
    %c0_59 = arith.constant 0 : index
    %46 = vector.load %arg1[%c2_56, %c2_57, %c0_58, %c0_59] : memref<3x3x44x144xf32, #tpu.memory_space<vmem>>, vector<1x1x44x144xf32>
    %47 = vector.shape_cast %46 : vector<1x1x44x144xf32> to vector<44x144xf32>
    %cst_60 = arith.constant dense<0.000000e+00> : vector<19x144xf32>
    %48 = tpu.matmul %15, %47, %cst_60 {dimension_numbers = #tpu.dot_dimension_numbers<[1], [0], [0], [1], [0, 0, 1, 1], [], []>} : vector<19x44xf32>, vector<44x144xf32>, vector<19x144xf32> -> vector<19x144xf32>
    %49 = arith.addf %45, %48 : vector<19x144xf32>
    %50 = arith.maximumf %38, %49 : vector<19x144xf32>
    %c0_61 = arith.constant 0 : index
    %c0_62 = arith.constant 0 : index
    %51 = vector.load %arg17[%c0_61, %c0_62] : memref<19x144xf32, #tpu.memory_space<vmem>>, vector<19x144xf32>
    tpu.vector_store %arg17[%c0_61, %c0_62], %50 {strides = array<i32>} : memref<19x144xf32, #tpu.memory_space<vmem>>, vector<19x144xf32>,
    %c0_63 = arith.constant 0 : index
    %c0_64 = arith.constant 0 : index
    %52 = vector.load %arg2[%c0_63, %c0_64] : memref<1x144xf32, #tpu.memory_space<vmem>>, vector<1x144xf32>
    %c0_65 = arith.constant 0 : index
    %c0_66 = arith.constant 0 : index
    %53 = vector.load %arg17[%c0_65, %c0_66] : memref<19x144xf32, #tpu.memory_space<vmem>>, vector<1x144xf32>
    %c1_67 = arith.constant 1 : index
    %c0_68 = arith.constant 0 : index
    %54 = vector.load %arg17[%c1_67, %c0_68] : memref<19x144xf32, #tpu.memory_space<vmem>>, vector<1x144xf32>
    %55 = arith.maximumf %53, %54 : vector<1x144xf32>
    %c2_69 = arith.constant 2 : index
    %c0_70 = arith.constant 0 : index
    %56 = vector.load %arg17[%c2_69, %c0_70] : memref<19x144xf32, #tpu.memory_space<vmem>>, vector<1x144xf32>
    %57 = arith.maximumf %55, %56 : vector<1x144xf32>
    %58 = arith.addf %57, %52 : vector<1x144xf32>
    %cst_71 = arith.constant 0.000000e+00 : f32
    %59 = vector.broadcast %cst_71 : f32 to vector<1x144xf32>
    %60 = arith.maximumf %58, %59 : vector<1x144xf32>
    %61 = arith.mulf %60, %0 : vector<1x144xf32>
    %62 = arith.addf %61, %1 : vector<1x144xf32>
    %c0_72 = arith.constant 0 : index
    %c1_73 = arith.constant 1 : index
    %c0_74 = arith.constant 0 : index
    %63 = vector.load %arg14[%c0_72, %c1_73, %c0_74] : memref<2x11x144xf32, #tpu.memory_space<vmem>>, vector<1x1x144xf32>
    %64 = vector.shape_cast %63 : vector<1x1x144xf32> to vector<1x144xf32>
    %65 = vector.shape_cast %62 : vector<1x144xf32> to vector<1x1x144xf32>
    tpu.vector_store %arg14[%c0_72, %c1_73, %c0_74], %65 {strides = array<i32>} : memref<2x11x144xf32, #tpu.memory_space<vmem>>, vector<1x1x144xf32>,
    %c2_75 = arith.constant 2 : index
    %c0_76 = arith.constant 0 : index
    %66 = vector.load %arg17[%c2_75, %c0_76] : memref<19x144xf32, #tpu.memory_space<vmem>>, vector<1x144xf32>
    %c3 = arith.constant 3 : index
    %c0_77 = arith.constant 0 : index
    %67 = vector.load %arg17[%c3, %c0_77] : memref<19x144xf32, #tpu.memory_space<vmem>>, vector<1x144xf32>
    %68 = arith.maximumf %66, %67 : vector<1x144xf32>
    %c4 = arith.constant 4 : index
    %c0_78 = arith.constant 0 : index
    %69 = vector.load %arg17[%c4, %c0_78] : memref<19x144xf32, #tpu.memory_space<vmem>>, vector<1x144xf32>
    %70 = arith.maximumf %68, %69 : vector<1x144xf32>
    %71 = arith.addf %70, %52 : vector<1x144xf32>
    %cst_79 = arith.constant 0.000000e+00 : f32
    %72 = vector.broadcast %cst_79 : f32 to vector<1x144xf32>
    %73 = arith.maximumf %71, %72 : vector<1x144xf32>
    %74 = arith.mulf %73, %0 : vector<1x144xf32>
    %75 = arith.addf %74, %1 : vector<1x144xf32>
    %c0_80 = arith.constant 0 : index
    %c2_81 = arith.constant 2 : index
    %c0_82 = arith.constant 0 : index
    %76 = vector.load %arg14[%c0_80, %c2_81, %c0_82] : memref<2x11x144xf32, #tpu.memory_space<vmem>>, vector<1x1x144xf32>
    %77 = vector.shape_cast %76 : vector<1x1x144xf32> to vector<1x144xf32>
    %78 = vector.shape_cast %75 : vector<1x144xf32> to vector<1x1x144xf32>
    tpu.vector_store %arg14[%c0_80, %c2_81, %c0_82], %78 {strides = array<i32>} : memref<2x11x144xf32, #tpu.memory_space<vmem>>, vector<1x1x144xf32>,
    %c4_83 = arith.constant 4 : index
    %c0_84 = arith.constant 0 : index
    %79 = vector.load %arg17[%c4_83, %c0_84] : memref<19x144xf32, #tpu.memory_space<vmem>>, vector<1x144xf32>
    %c5 = arith.constant 5 : index
    %c0_85 = arith.constant 0 : index
    %80 = vector.load %arg17[%c5, %c0_85] : memref<19x144xf32, #tpu.memory_space<vmem>>, vector<1x144xf32>
    %81 = arith.maximumf %79, %80 : vector<1x144xf32>
    %c6 = arith.constant 6 : index
    %c0_86 = arith.constant 0 : index
    %82 = vector.load %arg17[%c6, %c0_86] : memref<19x144xf32, #tpu.memory_space<vmem>>, vector<1x144xf32>
    %83 = arith.maximumf %81, %82 : vector<1x144xf32>
    %84 = arith.addf %83, %52 : vector<1x144xf32>
    %cst_87 = arith.constant 0.000000e+00 : f32
    %85 = vector.broadcast %cst_87 : f32 to vector<1x144xf32>
    %86 = arith.maximumf %84, %85 : vector<1x144xf32>
    %87 = arith.mulf %86, %0 : vector<1x144xf32>
    %88 = arith.addf %87, %1 : vector<1x144xf32>
    %c0_88 = arith.constant 0 : index
    %c3_89 = arith.constant 3 : index
    %c0_90 = arith.constant 0 : index
    %89 = vector.load %arg14[%c0_88, %c3_89, %c0_90] : memref<2x11x144xf32, #tpu.memory_space<vmem>>, vector<1x1x144xf32>
    %90 = vector.shape_cast %89 : vector<1x1x144xf32> to vector<1x144xf32>
    %91 = vector.shape_cast %88 : vector<1x144xf32> to vector<1x1x144xf32>
    tpu.vector_store %arg14[%c0_88, %c3_89, %c0_90], %91 {strides = array<i32>} : memref<2x11x144xf32, #tpu.memory_space<vmem>>, vector<1x1x144xf32>,
    %c6_91 = arith.constant 6 : index
    %c0_92 = arith.constant 0 : index
    %92 = vector.load %arg17[%c6_91, %c0_92] : memref<19x144xf32, #tpu.memory_space<vmem>>, vector<1x144xf32>
    %c7 = arith.constant 7 : index
    %c0_93 = arith.constant 0 : index
    %93 = vector.load %arg17[%c7, %c0_93] : memref<19x144xf32, #tpu.memory_space<vmem>>, vector<1x144xf32>
    %94 = arith.maximumf %92, %93 : vector<1x144xf32>
    %c8 = arith.constant 8 : index
    %c0_94 = arith.constant 0 : index
    %95 = vector.load %arg17[%c8, %c0_94] : memref<19x144xf32, #tpu.memory_space<vmem>>, vector<1x144xf32>
    %96 = arith.maximumf %94, %95 : vector<1x144xf32>
    %97 = arith.addf %96, %52 : vector<1x144xf32>
    %cst_95 = arith.constant 0.000000e+00 : f32
    %98 = vector.broadcast %cst_95 : f32 to vector<1x144xf32>
    %99 = arith.maximumf %97, %98 : vector<1x144xf32>
    %100 = arith.mulf %99, %0 : vector<1x144xf32>
    %101 = arith.addf %100, %1 : vector<1x144xf32>
    %c0_96 = arith.constant 0 : index
    %c4_97 = arith.constant 4 : index
    %c0_98 = arith.constant 0 : index
    %102 = vector.load %arg14[%c0_96, %c4_97, %c0_98] : memref<2x11x144xf32, #tpu.memory_space<vmem>>, vector<1x1x144xf32>
    %103 = vector.shape_cast %102 : vector<1x1x144xf32> to vector<1x144xf32>
    %104 = vector.shape_cast %101 : vector<1x144xf32> to vector<1x1x144xf32>
    tpu.vector_store %arg14[%c0_96, %c4_97, %c0_98], %104 {strides = array<i32>} : memref<2x11x144xf32, #tpu.memory_space<vmem>>, vector<1x1x144xf32>,
    %c8_99 = arith.constant 8 : index
    %c0_100 = arith.constant 0 : index
    %105 = vector.load %arg17[%c8_99, %c0_100] : memref<19x144xf32, #tpu.memory_space<vmem>>, vector<1x144xf32>
    %c9 = arith.constant 9 : index
    %c0_101 = arith.constant 0 : index
    %106 = vector.load %arg17[%c9, %c0_101] : memref<19x144xf32, #tpu.memory_space<vmem>>, vector<1x144xf32>
    %107 = arith.maximumf %105, %106 : vector<1x144xf32>
    %c10_102 = arith.constant 10 : index
    %c0_103 = arith.constant 0 : index
    %108 = vector.load %arg17[%c10_102, %c0_103] : memref<19x144xf32, #tpu.memory_space<vmem>>, vector<1x144xf32>
    %109 = arith.maximumf %107, %108 : vector<1x144xf32>
    %110 = arith.addf %109, %52 : vector<1x144xf32>
    %cst_104 = arith.constant 0.000000e+00 : f32
    %111 = vector.broadcast %cst_104 : f32 to vector<1x144xf32>
    %112 = arith.maximumf %110, %111 : vector<1x144xf32>
    %113 = arith.mulf %112, %0 : vector<1x144xf32>
    %114 = arith.addf %113, %1 : vector<1x144xf32>
    %c0_105 = arith.constant 0 : index
    %c5_106 = arith.constant 5 : index
    %c0_107 = arith.constant 0 : index
    %115 = vector.load %arg14[%c0_105, %c5_106, %c0_107] : memref<2x11x144xf32, #tpu.memory_space<vmem>>, vector<1x1x144xf32>
    %116 = vector.shape_cast %115 : vector<1x1x144xf32> to vector<1x144xf32>
    %117 = vector.shape_cast %114 : vector<1x144xf32> to vector<1x1x144xf32>
    tpu.vector_store %arg14[%c0_105, %c5_106, %c0_107], %117 {strides = array<i32>} : memref<2x11x144xf32, #tpu.memory_space<vmem>>, vector<1x1x144xf32>,
    %c10_108 = arith.constant 10 : index
    %c0_109 = arith.constant 0 : index
    %118 = vector.load %arg17[%c10_108, %c0_109] : memref<19x144xf32, #tpu.memory_space<vmem>>, vector<1x144xf32>
    %c11 = arith.constant 11 : index
    %c0_110 = arith.constant 0 : index
    %119 = vector.load %arg17[%c11, %c0_110] : memref<19x144xf32, #tpu.memory_space<vmem>>, vector<1x144xf32>
    %120 = arith.maximumf %118, %119 : vector<1x144xf32>
    %c12 = arith.constant 12 : index
    %c0_111 = arith.constant 0 : index
    %121 = vector.load %arg17[%c12, %c0_111] : memref<19x144xf32, #tpu.memory_space<vmem>>, vector<1x144xf32>
    %122 = arith.maximumf %120, %121 : vector<1x144xf32>
    %123 = arith.addf %122, %52 : vector<1x144xf32>
    %cst_112 = arith.constant 0.000000e+00 : f32
    %124 = vector.broadcast %cst_112 : f32 to vector<1x144xf32>
    %125 = arith.maximumf %123, %124 : vector<1x144xf32>
    %126 = arith.mulf %125, %0 : vector<1x144xf32>
    %127 = arith.addf %126, %1 : vector<1x144xf32>
    %c0_113 = arith.constant 0 : index
    %c6_114 = arith.constant 6 : index
    %c0_115 = arith.constant 0 : index
    %128 = vector.load %arg14[%c0_113, %c6_114, %c0_115] : memref<2x11x144xf32, #tpu.memory_space<vmem>>, vector<1x1x144xf32>
    %129 = vector.shape_cast %128 : vector<1x1x144xf32> to vector<1x144xf32>
    %130 = vector.shape_cast %127 : vector<1x144xf32> to vector<1x1x144xf32>
    tpu.vector_store %arg14[%c0_113, %c6_114, %c0_115], %130 {strides = array<i32>} : memref<2x11x144xf32, #tpu.memory_space<vmem>>, vector<1x1x144xf32>,
    %c12_116 = arith.constant 12 : index
    %c0_117 = arith.constant 0 : index
    %131 = vector.load %arg17[%c12_116, %c0_117] : memref<19x144xf32, #tpu.memory_space<vmem>>, vector<1x144xf32>
    %c13 = arith.constant 13 : index
    %c0_118 = arith.constant 0 : index
    %132 = vector.load %arg17[%c13, %c0_118] : memref<19x144xf32, #tpu.memory_space<vmem>>, vector<1x144xf32>
    %133 = arith.maximumf %131, %132 : vector<1x144xf32>
    %c14 = arith.constant 14 : index
    %c0_119 = arith.constant 0 : index
    %134 = vector.load %arg17[%c14, %c0_119] : memref<19x144xf32, #tpu.memory_space<vmem>>, vector<1x144xf32>
    %135 = arith.maximumf %133, %134 : vector<1x144xf32>
    %136 = arith.addf %135, %52 : vector<1x144xf32>
    %cst_120 = arith.constant 0.000000e+00 : f32
    %137 = vector.broadcast %cst_120 : f32 to vector<1x144xf32>
    %138 = arith.maximumf %136, %137 : vector<1x144xf32>
    %139 = arith.mulf %138, %0 : vector<1x144xf32>
    %140 = arith.addf %139, %1 : vector<1x144xf32>
    %c0_121 = arith.constant 0 : index
    %c7_122 = arith.constant 7 : index
    %c0_123 = arith.constant 0 : index
    %141 = vector.load %arg14[%c0_121, %c7_122, %c0_123] : memref<2x11x144xf32, #tpu.memory_space<vmem>>, vector<1x1x144xf32>
    %142 = vector.shape_cast %141 : vector<1x1x144xf32> to vector<1x144xf32>
    %143 = vector.shape_cast %140 : vector<1x144xf32> to vector<1x1x144xf32>
    tpu.vector_store %arg14[%c0_121, %c7_122, %c0_123], %143 {strides = array<i32>} : memref<2x11x144xf32, #tpu.memory_space<vmem>>, vector<1x1x144xf32>,
    %c14_124 = arith.constant 14 : index
    %c0_125 = arith.constant 0 : index
    %144 = vector.load %arg17[%c14_124, %c0_125] : memref<19x144xf32, #tpu.memory_space<vmem>>, vector<1x144xf32>
    %c15 = arith.constant 15 : index
    %c0_126 = arith.constant 0 : index
    %145 = vector.load %arg17[%c15, %c0_126] : memref<19x144xf32, #tpu.memory_space<vmem>>, vector<1x144xf32>
    %146 = arith.maximumf %144, %145 : vector<1x144xf32>
    %c16 = arith.constant 16 : index
    %c0_127 = arith.constant 0 : index
    %147 = vector.load %arg17[%c16, %c0_127] : memref<19x144xf32, #tpu.memory_space<vmem>>, vector<1x144xf32>
    %148 = arith.maximumf %146, %147 : vector<1x144xf32>
    %149 = arith.addf %148, %52 : vector<1x144xf32>
    %cst_128 = arith.constant 0.000000e+00 : f32
    %150 = vector.broadcast %cst_128 : f32 to vector<1x144xf32>
    %151 = arith.maximumf %149, %150 : vector<1x144xf32>
    %152 = arith.mulf %151, %0 : vector<1x144xf32>
    %153 = arith.addf %152, %1 : vector<1x144xf32>
    %c0_129 = arith.constant 0 : index
    %c8_130 = arith.constant 8 : index
    %c0_131 = arith.constant 0 : index
    %154 = vector.load %arg14[%c0_129, %c8_130, %c0_131] : memref<2x11x144xf32, #tpu.memory_space<vmem>>, vector<1x1x144xf32>
    %155 = vector.shape_cast %154 : vector<1x1x144xf32> to vector<1x144xf32>
    %156 = vector.shape_cast %153 : vector<1x144xf32> to vector<1x1x144xf32>
    tpu.vector_store %arg14[%c0_129, %c8_130, %c0_131], %156 {strides = array<i32>} : memref<2x11x144xf32, #tpu.memory_space<vmem>>, vector<1x1x144xf32>,
    %c16_132 = arith.constant 16 : index
    %c0_133 = arith.constant 0 : index
    %157 = vector.load %arg17[%c16_132, %c0_133] : memref<19x144xf32, #tpu.memory_space<vmem>>, vector<1x144xf32>
    %c17 = arith.constant 17 : index
    %c0_134 = arith.constant 0 : index
    %158 = vector.load %arg17[%c17, %c0_134] : memref<19x144xf32, #tpu.memory_space<vmem>>, vector<1x144xf32>
    %159 = arith.maximumf %157, %158 : vector<1x144xf32>
    %c18 = arith.constant 18 : index
    %c0_135 = arith.constant 0 : index
    %160 = vector.load %arg17[%c18, %c0_135] : memref<19x144xf32, #tpu.memory_space<vmem>>, vector<1x144xf32>
    %161 = arith.maximumf %159, %160 : vector<1x144xf32>
    %162 = arith.addf %161, %52 : vector<1x144xf32>
    %cst_136 = arith.constant 0.000000e+00 : f32
    %163 = vector.broadcast %cst_136 : f32 to vector<1x144xf32>
    %164 = arith.maximumf %162, %163 : vector<1x144xf32>
    %165 = arith.mulf %164, %0 : vector<1x144xf32>
    %166 = arith.addf %165, %1 : vector<1x144xf32>
    %c0_137 = arith.constant 0 : index
    %c9_138 = arith.constant 9 : index
    %c0_139 = arith.constant 0 : index
    %167 = vector.load %arg14[%c0_137, %c9_138, %c0_139] : memref<2x11x144xf32, #tpu.memory_space<vmem>>, vector<1x1x144xf32>
    %168 = vector.shape_cast %167 : vector<1x1x144xf32> to vector<1x144xf32>
    %169 = vector.shape_cast %166 : vector<1x144xf32> to vector<1x1x144xf32>
    tpu.vector_store %arg14[%c0_137, %c9_138, %c0_139], %169 {strides = array<i32>} : memref<2x11x144xf32, #tpu.memory_space<vmem>>, vector<1x1x144xf32>,
    %c0_140 = arith.constant 0 : index
    %c0_141 = arith.constant 0 : index
    %c0_142 = arith.constant 0 : index
    %170 = vector.load %arg14[%c0_140, %c0_141, %c0_142] : memref<2x11x144xf32, #tpu.memory_space<vmem>>, vector<1x9x144xf32>
    %171 = vector.shape_cast %170 : vector<1x9x144xf32> to vector<9x144xf32>
    %c0_143 = arith.constant 0 : index
    %c1_144 = arith.constant 1 : index
    %c0_145 = arith.constant 0 : index
    %172 = vector.load %arg14[%c0_143, %c1_144, %c0_145] : memref<2x11x144xf32, #tpu.memory_space<vmem>>, vector<1x9x144xf32>
    %173 = vector.shape_cast %172 : vector<1x9x144xf32> to vector<9x144xf32>
    %c0_146 = arith.constant 0 : index
    %c2_147 = arith.constant 2 : index
    %c0_148 = arith.constant 0 : index
    %174 = vector.load %arg14[%c0_146, %c2_147, %c0_148] : memref<2x11x144xf32, #tpu.memory_space<vmem>>, vector<1x9x144xf32>
    %175 = vector.shape_cast %174 : vector<1x9x144xf32> to vector<9x144xf32>
    %c0_149 = arith.constant 0 : index
    %c0_150 = arith.constant 0 : index
    %c0_151 = arith.constant 0 : index
    %c0_152 = arith.constant 0 : index
    %176 = vector.load %arg5[%c0_149, %c0_150, %c0_151, %c0_152] : memref<3x3x144x128xf32, #tpu.memory_space<vmem>>, vector<1x1x144x128xf32>
    %177 = vector.shape_cast %176 : vector<1x1x144x128xf32> to vector<144x128xf32>
    %cst_153 = arith.constant dense<0.000000e+00> : vector<9x128xf32>
    %178 = tpu.matmul %171, %177, %cst_153 {dimension_numbers = #tpu.dot_dimension_numbers<[1], [0], [0], [1], [0, 0, 1, 1], [], []>} : vector<9x144xf32>, vector<144x128xf32>, vector<9x128xf32> -> vector<9x128xf32>
    %c1_154 = arith.constant 1 : index
    %c0_155 = arith.constant 0 : index
    %c0_156 = arith.constant 0 : index
    %c0_157 = arith.constant 0 : index
    %179 = vector.load %arg5[%c1_154, %c0_155, %c0_156, %c0_157] : memref<3x3x144x128xf32, #tpu.memory_space<vmem>>, vector<1x1x144x128xf32>
    %180 = vector.shape_cast %179 : vector<1x1x144x128xf32> to vector<144x128xf32>
    %cst_158 = arith.constant dense<0.000000e+00> : vector<9x128xf32>
    %181 = tpu.matmul %173, %180, %cst_158 {dimension_numbers = #tpu.dot_dimension_numbers<[1], [0], [0], [1], [0, 0, 1, 1], [], []>} : vector<9x144xf32>, vector<144x128xf32>, vector<9x128xf32> -> vector<9x128xf32>
    %182 = arith.addf %178, %181 : vector<9x128xf32>
    %c2_159 = arith.constant 2 : index
    %c0_160 = arith.constant 0 : index
    %c0_161 = arith.constant 0 : index
    %c0_162 = arith.constant 0 : index
    %183 = vector.load %arg5[%c2_159, %c0_160, %c0_161, %c0_162] : memref<3x3x144x128xf32, #tpu.memory_space<vmem>>, vector<1x1x144x128xf32>
    %184 = vector.shape_cast %183 : vector<1x1x144x128xf32> to vector<144x128xf32>
    %cst_163 = arith.constant dense<0.000000e+00> : vector<9x128xf32>
    %185 = tpu.matmul %175, %184, %cst_163 {dimension_numbers = #tpu.dot_dimension_numbers<[1], [0], [0], [1], [0, 0, 1, 1], [], []>} : vector<9x144xf32>, vector<144x128xf32>, vector<9x128xf32> -> vector<9x128xf32>
    %186 = arith.addf %182, %185 : vector<9x128xf32>
    %c0_164 = arith.constant 0 : index
    %c1_165 = arith.constant 1 : index
    %c0_166 = arith.constant 0 : index
    %c0_167 = arith.constant 0 : index
    %187 = vector.load %arg5[%c0_164, %c1_165, %c0_166, %c0_167] : memref<3x3x144x128xf32, #tpu.memory_space<vmem>>, vector<1x1x144x128xf32>
    %188 = vector.shape_cast %187 : vector<1x1x144x128xf32> to vector<144x128xf32>
    %cst_168 = arith.constant dense<0.000000e+00> : vector<9x128xf32>
    %189 = tpu.matmul %171, %188, %cst_168 {dimension_numbers = #tpu.dot_dimension_numbers<[1], [0], [0], [1], [0, 0, 1, 1], [], []>} : vector<9x144xf32>, vector<144x128xf32>, vector<9x128xf32> -> vector<9x128xf32>
    %c1_169 = arith.constant 1 : index
    %c1_170 = arith.constant 1 : index
    %c0_171 = arith.constant 0 : index
    %c0_172 = arith.constant 0 : index
    %190 = vector.load %arg5[%c1_169, %c1_170, %c0_171, %c0_172] : memref<3x3x144x128xf32, #tpu.memory_space<vmem>>, vector<1x1x144x128xf32>
    %191 = vector.shape_cast %190 : vector<1x1x144x128xf32> to vector<144x128xf32>
    %cst_173 = arith.constant dense<0.000000e+00> : vector<9x128xf32>
    %192 = tpu.matmul %173, %191, %cst_173 {dimension_numbers = #tpu.dot_dimension_numbers<[1], [0], [0], [1], [0, 0, 1, 1], [], []>} : vector<9x144xf32>, vector<144x128xf32>, vector<9x128xf32> -> vector<9x128xf32>
    %193 = arith.addf %189, %192 : vector<9x128xf32>
    %c2_174 = arith.constant 2 : index
    %c1_175 = arith.constant 1 : index
    %c0_176 = arith.constant 0 : index
    %c0_177 = arith.constant 0 : index
    %194 = vector.load %arg5[%c2_174, %c1_175, %c0_176, %c0_177] : memref<3x3x144x128xf32, #tpu.memory_space<vmem>>, vector<1x1x144x128xf32>
    %195 = vector.shape_cast %194 : vector<1x1x144x128xf32> to vector<144x128xf32>
    %cst_178 = arith.constant dense<0.000000e+00> : vector<9x128xf32>
    %196 = tpu.matmul %175, %195, %cst_178 {dimension_numbers = #tpu.dot_dimension_numbers<[1], [0], [0], [1], [0, 0, 1, 1], [], []>} : vector<9x144xf32>, vector<144x128xf32>, vector<9x128xf32> -> vector<9x128xf32>
    %197 = arith.addf %193, %196 : vector<9x128xf32>
    %198 = arith.maximumf %186, %197 : vector<9x128xf32>
    %c0_179 = arith.constant 0 : index
    %c2_180 = arith.constant 2 : index
    %c0_181 = arith.constant 0 : index
    %c0_182 = arith.constant 0 : index
    %199 = vector.load %arg5[%c0_179, %c2_180, %c0_181, %c0_182] : memref<3x3x144x128xf32, #tpu.memory_space<vmem>>, vector<1x1x144x128xf32>
    %200 = vector.shape_cast %199 : vector<1x1x144x128xf32> to vector<144x128xf32>
    %cst_183 = arith.constant dense<0.000000e+00> : vector<9x128xf32>
    %201 = tpu.matmul %171, %200, %cst_183 {dimension_numbers = #tpu.dot_dimension_numbers<[1], [0], [0], [1], [0, 0, 1, 1], [], []>} : vector<9x144xf32>, vector<144x128xf32>, vector<9x128xf32> -> vector<9x128xf32>
    %c1_184 = arith.constant 1 : index
    %c2_185 = arith.constant 2 : index
    %c0_186 = arith.constant 0 : index
    %c0_187 = arith.constant 0 : index
    %202 = vector.load %arg5[%c1_184, %c2_185, %c0_186, %c0_187] : memref<3x3x144x128xf32, #tpu.memory_space<vmem>>, vector<1x1x144x128xf32>
    %203 = vector.shape_cast %202 : vector<1x1x144x128xf32> to vector<144x128xf32>
    %cst_188 = arith.constant dense<0.000000e+00> : vector<9x128xf32>
    %204 = tpu.matmul %173, %203, %cst_188 {dimension_numbers = #tpu.dot_dimension_numbers<[1], [0], [0], [1], [0, 0, 1, 1], [], []>} : vector<9x144xf32>, vector<144x128xf32>, vector<9x128xf32> -> vector<9x128xf32>
    %205 = arith.addf %201, %204 : vector<9x128xf32>
    %c2_189 = arith.constant 2 : index
    %c2_190 = arith.constant 2 : index
    %c0_191 = arith.constant 0 : index
    %c0_192 = arith.constant 0 : index
    %206 = vector.load %arg5[%c2_189, %c2_190, %c0_191, %c0_192] : memref<3x3x144x128xf32, #tpu.memory_space<vmem>>, vector<1x1x144x128xf32>
    %207 = vector.shape_cast %206 : vector<1x1x144x128xf32> to vector<144x128xf32>
    %cst_193 = arith.constant dense<0.000000e+00> : vector<9x128xf32>
    %208 = tpu.matmul %175, %207, %cst_193 {dimension_numbers = #tpu.dot_dimension_numbers<[1], [0], [0], [1], [0, 0, 1, 1], [], []>} : vector<9x144xf32>, vector<144x128xf32>, vector<9x128xf32> -> vector<9x128xf32>
    %209 = arith.addf %205, %208 : vector<9x128xf32>
    %210 = arith.maximumf %198, %209 : vector<9x128xf32>
    %c0_194 = arith.constant 0 : index
    %c0_195 = arith.constant 0 : index
    %211 = vector.load %arg18[%c0_194, %c0_195] : memref<9x128xf32, #tpu.memory_space<vmem>>, vector<9x128xf32>
    tpu.vector_store %arg18[%c0_194, %c0_195], %210 {strides = array<i32>} : memref<9x128xf32, #tpu.memory_space<vmem>>, vector<9x128xf32>,
    %c0_196 = arith.constant 0 : index
    %c0_197 = arith.constant 0 : index
    %212 = vector.load %arg6[%c0_196, %c0_197] : memref<1x128xf32, #tpu.memory_space<vmem>>, vector<1x128xf32>
    %c0_198 = arith.constant 0 : index
    %c0_199 = arith.constant 0 : index
    %213 = vector.load %arg18[%c0_198, %c0_199] : memref<9x128xf32, #tpu.memory_space<vmem>>, vector<1x128xf32>
    %c1_200 = arith.constant 1 : index
    %c0_201 = arith.constant 0 : index
    %214 = vector.load %arg18[%c1_200, %c0_201] : memref<9x128xf32, #tpu.memory_space<vmem>>, vector<1x128xf32>
    %215 = arith.maximumf %213, %214 : vector<1x128xf32>
    %c2_202 = arith.constant 2 : index
    %c0_203 = arith.constant 0 : index
    %216 = vector.load %arg18[%c2_202, %c0_203] : memref<9x128xf32, #tpu.memory_space<vmem>>, vector<1x128xf32>
    %217 = arith.maximumf %215, %216 : vector<1x128xf32>
    %218 = arith.addf %217, %212 : vector<1x128xf32>
    %cst_204 = arith.constant 0.000000e+00 : f32
    %219 = vector.broadcast %cst_204 : f32 to vector<1x128xf32>
    %220 = arith.maximumf %218, %219 : vector<1x128xf32>
    %c0_205 = arith.constant 0 : index
    %c0_206 = arith.constant 0 : index
    %c0_207 = arith.constant 0 : index
    %221 = vector.load %arg15[%c0_205, %c0_206, %c0_207] : memref<2x4x128xf32, #tpu.memory_space<vmem>>, vector<1x1x128xf32>
    %222 = vector.shape_cast %221 : vector<1x1x128xf32> to vector<1x128xf32>
    %223 = vector.shape_cast %220 : vector<1x128xf32> to vector<1x1x128xf32>
    tpu.vector_store %arg15[%c0_205, %c0_206, %c0_207], %223 {strides = array<i32>} : memref<2x4x128xf32, #tpu.memory_space<vmem>>, vector<1x1x128xf32>,
    %c2_208 = arith.constant 2 : index
    %c0_209 = arith.constant 0 : index
    %224 = vector.load %arg18[%c2_208, %c0_209] : memref<9x128xf32, #tpu.memory_space<vmem>>, vector<1x128xf32>
    %c3_210 = arith.constant 3 : index
    %c0_211 = arith.constant 0 : index
    %225 = vector.load %arg18[%c3_210, %c0_211] : memref<9x128xf32, #tpu.memory_space<vmem>>, vector<1x128xf32>
    %226 = arith.maximumf %224, %225 : vector<1x128xf32>
    %c4_212 = arith.constant 4 : index
    %c0_213 = arith.constant 0 : index
    %227 = vector.load %arg18[%c4_212, %c0_213] : memref<9x128xf32, #tpu.memory_space<vmem>>, vector<1x128xf32>
    %228 = arith.maximumf %226, %227 : vector<1x128xf32>
    %229 = arith.addf %228, %212 : vector<1x128xf32>
    %cst_214 = arith.constant 0.000000e+00 : f32
    %230 = vector.broadcast %cst_214 : f32 to vector<1x128xf32>
    %231 = arith.maximumf %229, %230 : vector<1x128xf32>
    %c0_215 = arith.constant 0 : index
    %c1_216 = arith.constant 1 : index
    %c0_217 = arith.constant 0 : index
    %232 = vector.load %arg15[%c0_215, %c1_216, %c0_217] : memref<2x4x128xf32, #tpu.memory_space<vmem>>, vector<1x1x128xf32>
    %233 = vector.shape_cast %232 : vector<1x1x128xf32> to vector<1x128xf32>
    %234 = vector.shape_cast %231 : vector<1x128xf32> to vector<1x1x128xf32>
    tpu.vector_store %arg15[%c0_215, %c1_216, %c0_217], %234 {strides = array<i32>} : memref<2x4x128xf32, #tpu.memory_space<vmem>>, vector<1x1x128xf32>,
    %c4_218 = arith.constant 4 : index
    %c0_219 = arith.constant 0 : index
    %235 = vector.load %arg18[%c4_218, %c0_219] : memref<9x128xf32, #tpu.memory_space<vmem>>, vector<1x128xf32>
    %c5_220 = arith.constant 5 : index
    %c0_221 = arith.constant 0 : index
    %236 = vector.load %arg18[%c5_220, %c0_221] : memref<9x128xf32, #tpu.memory_space<vmem>>, vector<1x128xf32>
    %237 = arith.maximumf %235, %236 : vector<1x128xf32>
    %c6_222 = arith.constant 6 : index
    %c0_223 = arith.constant 0 : index
    %238 = vector.load %arg18[%c6_222, %c0_223] : memref<9x128xf32, #tpu.memory_space<vmem>>, vector<1x128xf32>
    %239 = arith.maximumf %237, %238 : vector<1x128xf32>
    %240 = arith.addf %239, %212 : vector<1x128xf32>
    %cst_224 = arith.constant 0.000000e+00 : f32
    %241 = vector.broadcast %cst_224 : f32 to vector<1x128xf32>
    %242 = arith.maximumf %240, %241 : vector<1x128xf32>
    %c0_225 = arith.constant 0 : index
    %c2_226 = arith.constant 2 : index
    %c0_227 = arith.constant 0 : index
    %243 = vector.load %arg15[%c0_225, %c2_226, %c0_227] : memref<2x4x128xf32, #tpu.memory_space<vmem>>, vector<1x1x128xf32>
    %244 = vector.shape_cast %243 : vector<1x1x128xf32> to vector<1x128xf32>
    %245 = vector.shape_cast %242 : vector<1x128xf32> to vector<1x1x128xf32>
    tpu.vector_store %arg15[%c0_225, %c2_226, %c0_227], %245 {strides = array<i32>} : memref<2x4x128xf32, #tpu.memory_space<vmem>>, vector<1x1x128xf32>,
    %c6_228 = arith.constant 6 : index
    %c0_229 = arith.constant 0 : index
    %246 = vector.load %arg18[%c6_228, %c0_229] : memref<9x128xf32, #tpu.memory_space<vmem>>, vector<1x128xf32>
    %c7_230 = arith.constant 7 : index
    %c0_231 = arith.constant 0 : index
    %247 = vector.load %arg18[%c7_230, %c0_231] : memref<9x128xf32, #tpu.memory_space<vmem>>, vector<1x128xf32>
    %248 = arith.maximumf %246, %247 : vector<1x128xf32>
    %c8_232 = arith.constant 8 : index
    %c0_233 = arith.constant 0 : index
    %249 = vector.load %arg18[%c8_232, %c0_233] : memref<9x128xf32, #tpu.memory_space<vmem>>, vector<1x128xf32>
    %250 = arith.maximumf %248, %249 : vector<1x128xf32>
    %251 = arith.addf %250, %212 : vector<1x128xf32>
    %cst_234 = arith.constant 0.000000e+00 : f32
    %252 = vector.broadcast %cst_234 : f32 to vector<1x128xf32>
    %253 = arith.maximumf %251, %252 : vector<1x128xf32>
    %c0_235 = arith.constant 0 : index
    %c3_236 = arith.constant 3 : index
    %c0_237 = arith.constant 0 : index
    %254 = vector.load %arg15[%c0_235, %c3_236, %c0_237] : memref<2x4x128xf32, #tpu.memory_space<vmem>>, vector<1x1x128xf32>
    %255 = vector.shape_cast %254 : vector<1x1x128xf32> to vector<1x128xf32>
    %256 = vector.shape_cast %253 : vector<1x128xf32> to vector<1x1x128xf32>
    tpu.vector_store %arg15[%c0_235, %c3_236, %c0_237], %256 {strides = array<i32>} : memref<2x4x128xf32, #tpu.memory_space<vmem>>, vector<1x1x128xf32>,
    %c0_238 = arith.constant 0 : index
    %c0_239 = arith.constant 0 : index
    %c0_240 = arith.constant 0 : index
    %257 = vector.load %arg15[%c0_238, %c0_239, %c0_240] : memref<2x4x128xf32, #tpu.memory_space<vmem>>, vector<1x2x128xf32>
    %258 = vector.shape_cast %257 : vector<1x2x128xf32> to vector<2x128xf32>
    %c0_241 = arith.constant 0 : index
    %c1_242 = arith.constant 1 : index
    %c0_243 = arith.constant 0 : index
    %259 = vector.load %arg15[%c0_241, %c1_242, %c0_243] : memref<2x4x128xf32, #tpu.memory_space<vmem>>, vector<1x2x128xf32>
    %260 = vector.shape_cast %259 : vector<1x2x128xf32> to vector<2x128xf32>
    %c0_244 = arith.constant 0 : index
    %c2_245 = arith.constant 2 : index
    %c0_246 = arith.constant 0 : index
    %261 = vector.load %arg15[%c0_244, %c2_245, %c0_246] : memref<2x4x128xf32, #tpu.memory_space<vmem>>, vector<1x2x128xf32>
    %262 = vector.shape_cast %261 : vector<1x2x128xf32> to vector<2x128xf32>
    %c0_247 = arith.constant 0 : index
    %c0_248 = arith.constant 0 : index
    %c0_249 = arith.constant 0 : index
    %c0_250 = arith.constant 0 : index
    %263 = vector.load %arg7[%c0_247, %c0_248, %c0_249, %c0_250] : memref<3x2x128x64xf32, #tpu.memory_space<vmem>>, vector<1x1x128x64xf32>
    %264 = vector.shape_cast %263 : vector<1x1x128x64xf32> to vector<128x64xf32>
    %cst_251 = arith.constant dense<0.000000e+00> : vector<2x64xf32>
    %265 = tpu.matmul %258, %264, %cst_251 {dimension_numbers = #tpu.dot_dimension_numbers<[1], [0], [0], [1], [0, 0, 1, 1], [], []>} : vector<2x128xf32>, vector<128x64xf32>, vector<2x64xf32> -> vector<2x64xf32>
    %c1_252 = arith.constant 1 : index
    %c0_253 = arith.constant 0 : index
    %c0_254 = arith.constant 0 : index
    %c0_255 = arith.constant 0 : index
    %266 = vector.load %arg7[%c1_252, %c0_253, %c0_254, %c0_255] : memref<3x2x128x64xf32, #tpu.memory_space<vmem>>, vector<1x1x128x64xf32>
    %267 = vector.shape_cast %266 : vector<1x1x128x64xf32> to vector<128x64xf32>
    %cst_256 = arith.constant dense<0.000000e+00> : vector<2x64xf32>
    %268 = tpu.matmul %260, %267, %cst_256 {dimension_numbers = #tpu.dot_dimension_numbers<[1], [0], [0], [1], [0, 0, 1, 1], [], []>} : vector<2x128xf32>, vector<128x64xf32>, vector<2x64xf32> -> vector<2x64xf32>
    %269 = arith.addf %265, %268 : vector<2x64xf32>
    %c2_257 = arith.constant 2 : index
    %c0_258 = arith.constant 0 : index
    %c0_259 = arith.constant 0 : index
    %c0_260 = arith.constant 0 : index
    %270 = vector.load %arg7[%c2_257, %c0_258, %c0_259, %c0_260] : memref<3x2x128x64xf32, #tpu.memory_space<vmem>>, vector<1x1x128x64xf32>
    %271 = vector.shape_cast %270 : vector<1x1x128x64xf32> to vector<128x64xf32>
    %cst_261 = arith.constant dense<0.000000e+00> : vector<2x64xf32>
    %272 = tpu.matmul %262, %271, %cst_261 {dimension_numbers = #tpu.dot_dimension_numbers<[1], [0], [0], [1], [0, 0, 1, 1], [], []>} : vector<2x128xf32>, vector<128x64xf32>, vector<2x64xf32> -> vector<2x64xf32>
    %273 = arith.addf %269, %272 : vector<2x64xf32>
    %c0_262 = arith.constant 0 : index
    %c1_263 = arith.constant 1 : index
    %c0_264 = arith.constant 0 : index
    %c0_265 = arith.constant 0 : index
    %274 = vector.load %arg7[%c0_262, %c1_263, %c0_264, %c0_265] : memref<3x2x128x64xf32, #tpu.memory_space<vmem>>, vector<1x1x128x64xf32>
    %275 = vector.shape_cast %274 : vector<1x1x128x64xf32> to vector<128x64xf32>
    %cst_266 = arith.constant dense<0.000000e+00> : vector<2x64xf32>
    %276 = tpu.matmul %258, %275, %cst_266 {dimension_numbers = #tpu.dot_dimension_numbers<[1], [0], [0], [1], [0, 0, 1, 1], [], []>} : vector<2x128xf32>, vector<128x64xf32>, vector<2x64xf32> -> vector<2x64xf32>
    %c1_267 = arith.constant 1 : index
    %c1_268 = arith.constant 1 : index
    %c0_269 = arith.constant 0 : index
    %c0_270 = arith.constant 0 : index
    %277 = vector.load %arg7[%c1_267, %c1_268, %c0_269, %c0_270] : memref<3x2x128x64xf32, #tpu.memory_space<vmem>>, vector<1x1x128x64xf32>
    %278 = vector.shape_cast %277 : vector<1x1x128x64xf32> to vector<128x64xf32>
    %cst_271 = arith.constant dense<0.000000e+00> : vector<2x64xf32>
    %279 = tpu.matmul %260, %278, %cst_271 {dimension_numbers = #tpu.dot_dimension_numbers<[1], [0], [0], [1], [0, 0, 1, 1], [], []>} : vector<2x128xf32>, vector<128x64xf32>, vector<2x64xf32> -> vector<2x64xf32>
    %280 = arith.addf %276, %279 : vector<2x64xf32>
    %c2_272 = arith.constant 2 : index
    %c1_273 = arith.constant 1 : index
    %c0_274 = arith.constant 0 : index
    %c0_275 = arith.constant 0 : index
    %281 = vector.load %arg7[%c2_272, %c1_273, %c0_274, %c0_275] : memref<3x2x128x64xf32, #tpu.memory_space<vmem>>, vector<1x1x128x64xf32>
    %282 = vector.shape_cast %281 : vector<1x1x128x64xf32> to vector<128x64xf32>
    %cst_276 = arith.constant dense<0.000000e+00> : vector<2x64xf32>
    %283 = tpu.matmul %262, %282, %cst_276 {dimension_numbers = #tpu.dot_dimension_numbers<[1], [0], [0], [1], [0, 0, 1, 1], [], []>} : vector<2x128xf32>, vector<128x64xf32>, vector<2x64xf32> -> vector<2x64xf32>
    %284 = arith.addf %280, %283 : vector<2x64xf32>
    %285 = arith.maximumf %273, %284 : vector<2x64xf32>
    %c0_277 = arith.constant 0 : index
    %c0_278 = arith.constant 0 : index
    %286 = vector.load %arg19[%c0_277, %c0_278] : memref<2x64xf32, #tpu.memory_space<vmem>>, vector<2x64xf32>
    tpu.vector_store %arg19[%c0_277, %c0_278], %285 {strides = array<i32>} : memref<2x64xf32, #tpu.memory_space<vmem>>, vector<2x64xf32>,
    %c0_279 = arith.constant 0 : index
    %c0_280 = arith.constant 0 : index
    %287 = vector.load %arg8[%c0_279, %c0_280] : memref<1x64xf32, #tpu.memory_space<vmem>>, vector<1x64xf32>
    %c0_281 = arith.constant 0 : index
    %c0_282 = arith.constant 0 : index
    %288 = vector.load %arg19[%c0_281, %c0_282] : memref<2x64xf32, #tpu.memory_space<vmem>>, vector<1x64xf32>
    %c1_283 = arith.constant 1 : index
    %c0_284 = arith.constant 0 : index
    %289 = vector.load %arg19[%c1_283, %c0_284] : memref<2x64xf32, #tpu.memory_space<vmem>>, vector<1x64xf32>
    %290 = arith.maximumf %288, %289 : vector<1x64xf32>
    %291 = arith.addf %290, %287 : vector<1x64xf32>
    %cst_285 = arith.constant 0.000000e+00 : f32
    %292 = vector.broadcast %cst_285 : f32 to vector<1x64xf32>
    %293 = arith.maximumf %291, %292 : vector<1x64xf32>
    %c0_286 = arith.constant 0 : index
    %c0_287 = arith.constant 0 : index
    %294 = vector.load %arg16[%c0_286, %c0_287] : memref<2x64xf32, #tpu.memory_space<vmem>>, vector<1x64xf32>
    tpu.vector_store %arg16[%c0_286, %c0_287], %293 {strides = array<i32>} : memref<2x64xf32, #tpu.memory_space<vmem>>, vector<1x64xf32>,
    %cst_288 = arith.constant 0.000000e+00 : f32
    %295 = vector.broadcast %cst_288 : f32 to vector<1x144xf32>
    %c1_289 = arith.constant 1 : index
    %c0_290 = arith.constant 0 : index
    %c0_291 = arith.constant 0 : index
    %296 = vector.load %arg14[%c1_289, %c0_290, %c0_291] : memref<2x11x144xf32, #tpu.memory_space<vmem>>, vector<1x1x144xf32>
    %297 = vector.shape_cast %296 : vector<1x1x144xf32> to vector<1x144xf32>
    %298 = vector.shape_cast %295 : vector<1x144xf32> to vector<1x1x144xf32>
    tpu.vector_store %arg14[%c1_289, %c0_290, %c0_291], %298 {strides = array<i32>} : memref<2x11x144xf32, #tpu.memory_space<vmem>>, vector<1x1x144xf32>,
    %cst_292 = arith.constant 0.000000e+00 : f32
    %299 = vector.broadcast %cst_292 : f32 to vector<1x144xf32>
    %c1_293 = arith.constant 1 : index
    %c10_294 = arith.constant 10 : index
    %c0_295 = arith.constant 0 : index
    %300 = vector.load %arg14[%c1_293, %c10_294, %c0_295] : memref<2x11x144xf32, #tpu.memory_space<vmem>>, vector<1x1x144xf32>
    %301 = vector.shape_cast %300 : vector<1x1x144xf32> to vector<1x144xf32>
    %302 = vector.shape_cast %299 : vector<1x144xf32> to vector<1x1x144xf32>
    tpu.vector_store %arg14[%c1_293, %c10_294, %c0_295], %302 {strides = array<i32>} : memref<2x11x144xf32, #tpu.memory_space<vmem>>, vector<1x1x144xf32>,
    %c1_296 = arith.constant 1 : index
    %c0_297 = arith.constant 0 : index
    %c0_298 = arith.constant 0 : index
    %303 = vector.load %arg0[%c1_296, %c0_297, %c0_298] : memref<2x22x44xf32, #tpu.memory_space<vmem>>, vector<1x19x44xf32>
    %304 = vector.shape_cast %303 : vector<1x19x44xf32> to vector<19x44xf32>
    %c1_299 = arith.constant 1 : index
    %c1_300 = arith.constant 1 : index
    %c0_301 = arith.constant 0 : index
    %305 = vector.load %arg0[%c1_299, %c1_300, %c0_301] : memref<2x22x44xf32, #tpu.memory_space<vmem>>, vector<1x19x44xf32>
    %306 = vector.shape_cast %305 : vector<1x19x44xf32> to vector<19x44xf32>
    %c1_302 = arith.constant 1 : index
    %c2_303 = arith.constant 2 : index
    %c0_304 = arith.constant 0 : index
    %307 = vector.load %arg0[%c1_302, %c2_303, %c0_304] : memref<2x22x44xf32, #tpu.memory_space<vmem>>, vector<1x19x44xf32>
    %308 = vector.shape_cast %307 : vector<1x19x44xf32> to vector<19x44xf32>
    %c0_305 = arith.constant 0 : index
    %c0_306 = arith.constant 0 : index
    %c0_307 = arith.constant 0 : index
    %c0_308 = arith.constant 0 : index
    %309 = vector.load %arg1[%c0_305, %c0_306, %c0_307, %c0_308] : memref<3x3x44x144xf32, #tpu.memory_space<vmem>>, vector<1x1x44x144xf32>
    %310 = vector.shape_cast %309 : vector<1x1x44x144xf32> to vector<44x144xf32>
    %cst_309 = arith.constant dense<0.000000e+00> : vector<19x144xf32>
    %311 = tpu.matmul %304, %310, %cst_309 {dimension_numbers = #tpu.dot_dimension_numbers<[1], [0], [0], [1], [0, 0, 1, 1], [], []>} : vector<19x44xf32>, vector<44x144xf32>, vector<19x144xf32> -> vector<19x144xf32>
    %c1_310 = arith.constant 1 : index
    %c0_311 = arith.constant 0 : index
    %c0_312 = arith.constant 0 : index
    %c0_313 = arith.constant 0 : index
    %312 = vector.load %arg1[%c1_310, %c0_311, %c0_312, %c0_313] : memref<3x3x44x144xf32, #tpu.memory_space<vmem>>, vector<1x1x44x144xf32>
    %313 = vector.shape_cast %312 : vector<1x1x44x144xf32> to vector<44x144xf32>
    %cst_314 = arith.constant dense<0.000000e+00> : vector<19x144xf32>
    %314 = tpu.matmul %306, %313, %cst_314 {dimension_numbers = #tpu.dot_dimension_numbers<[1], [0], [0], [1], [0, 0, 1, 1], [], []>} : vector<19x44xf32>, vector<44x144xf32>, vector<19x144xf32> -> vector<19x144xf32>
    %315 = arith.addf %311, %314 : vector<19x144xf32>
    %c2_315 = arith.constant 2 : index
    %c0_316 = arith.constant 0 : index
    %c0_317 = arith.constant 0 : index
    %c0_318 = arith.constant 0 : index
    %316 = vector.load %arg1[%c2_315, %c0_316, %c0_317, %c0_318] : memref<3x3x44x144xf32, #tpu.memory_space<vmem>>, vector<1x1x44x144xf32>
    %317 = vector.shape_cast %316 : vector<1x1x44x144xf32> to vector<44x144xf32>
    %cst_319 = arith.constant dense<0.000000e+00> : vector<19x144xf32>
    %318 = tpu.matmul %308, %317, %cst_319 {dimension_numbers = #tpu.dot_dimension_numbers<[1], [0], [0], [1], [0, 0, 1, 1], [], []>} : vector<19x44xf32>, vector<44x144xf32>, vector<19x144xf32> -> vector<19x144xf32>
    %319 = arith.addf %315, %318 : vector<19x144xf32>
    %c0_320 = arith.constant 0 : index
    %c1_321 = arith.constant 1 : index
    %c0_322 = arith.constant 0 : index
    %c0_323 = arith.constant 0 : index
    %320 = vector.load %arg1[%c0_320, %c1_321, %c0_322, %c0_323] : memref<3x3x44x144xf32, #tpu.memory_space<vmem>>, vector<1x1x44x144xf32>
    %321 = vector.shape_cast %320 : vector<1x1x44x144xf32> to vector<44x144xf32>
    %cst_324 = arith.constant dense<0.000000e+00> : vector<19x144xf32>
    %322 = tpu.matmul %304, %321, %cst_324 {dimension_numbers = #tpu.dot_dimension_numbers<[1], [0], [0], [1], [0, 0, 1, 1], [], []>} : vector<19x44xf32>, vector<44x144xf32>, vector<19x144xf32> -> vector<19x144xf32>
    %c1_325 = arith.constant 1 : index
    %c1_326 = arith.constant 1 : index
    %c0_327 = arith.constant 0 : index
    %c0_328 = arith.constant 0 : index
    %323 = vector.load %arg1[%c1_325, %c1_326, %c0_327, %c0_328] : memref<3x3x44x144xf32, #tpu.memory_space<vmem>>, vector<1x1x44x144xf32>
    %324 = vector.shape_cast %323 : vector<1x1x44x144xf32> to vector<44x144xf32>
    %cst_329 = arith.constant dense<0.000000e+00> : vector<19x144xf32>
    %325 = tpu.matmul %306, %324, %cst_329 {dimension_numbers = #tpu.dot_dimension_numbers<[1], [0], [0], [1], [0, 0, 1, 1], [], []>} : vector<19x44xf32>, vector<44x144xf32>, vector<19x144xf32> -> vector<19x144xf32>
    %326 = arith.addf %322, %325 : vector<19x144xf32>
    %c2_330 = arith.constant 2 : index
    %c1_331 = arith.constant 1 : index
    %c0_332 = arith.constant 0 : index
    %c0_333 = arith.constant 0 : index
    %327 = vector.load %arg1[%c2_330, %c1_331, %c0_332, %c0_333] : memref<3x3x44x144xf32, #tpu.memory_space<vmem>>, vector<1x1x44x144xf32>
    %328 = vector.shape_cast %327 : vector<1x1x44x144xf32> to vector<44x144xf32>
    %cst_334 = arith.constant dense<0.000000e+00> : vector<19x144xf32>
    %329 = tpu.matmul %308, %328, %cst_334 {dimension_numbers = #tpu.dot_dimension_numbers<[1], [0], [0], [1], [0, 0, 1, 1], [], []>} : vector<19x44xf32>, vector<44x144xf32>, vector<19x144xf32> -> vector<19x144xf32>
    %330 = arith.addf %326, %329 : vector<19x144xf32>
    %331 = arith.maximumf %319, %330 : vector<19x144xf32>
    %c0_335 = arith.constant 0 : index
    %c2_336 = arith.constant 2 : index
    %c0_337 = arith.constant 0 : index
    %c0_338 = arith.constant 0 : index
    %332 = vector.load %arg1[%c0_335, %c2_336, %c0_337, %c0_338] : memref<3x3x44x144xf32, #tpu.memory_space<vmem>>, vector<1x1x44x144xf32>
    %333 = vector.shape_cast %332 : vector<1x1x44x144xf32> to vector<44x144xf32>
    %cst_339 = arith.constant dense<0.000000e+00> : vector<19x144xf32>
    %334 = tpu.matmul %304, %333, %cst_339 {dimension_numbers = #tpu.dot_dimension_numbers<[1], [0], [0], [1], [0, 0, 1, 1], [], []>} : vector<19x44xf32>, vector<44x144xf32>, vector<19x144xf32> -> vector<19x144xf32>
    %c1_340 = arith.constant 1 : index
    %c2_341 = arith.constant 2 : index
    %c0_342 = arith.constant 0 : index
    %c0_343 = arith.constant 0 : index
    %335 = vector.load %arg1[%c1_340, %c2_341, %c0_342, %c0_343] : memref<3x3x44x144xf32, #tpu.memory_space<vmem>>, vector<1x1x44x144xf32>
    %336 = vector.shape_cast %335 : vector<1x1x44x144xf32> to vector<44x144xf32>
    %cst_344 = arith.constant dense<0.000000e+00> : vector<19x144xf32>
    %337 = tpu.matmul %306, %336, %cst_344 {dimension_numbers = #tpu.dot_dimension_numbers<[1], [0], [0], [1], [0, 0, 1, 1], [], []>} : vector<19x44xf32>, vector<44x144xf32>, vector<19x144xf32> -> vector<19x144xf32>
    %338 = arith.addf %334, %337 : vector<19x144xf32>
    %c2_345 = arith.constant 2 : index
    %c2_346 = arith.constant 2 : index
    %c0_347 = arith.constant 0 : index
    %c0_348 = arith.constant 0 : index
    %339 = vector.load %arg1[%c2_345, %c2_346, %c0_347, %c0_348] : memref<3x3x44x144xf32, #tpu.memory_space<vmem>>, vector<1x1x44x144xf32>
    %340 = vector.shape_cast %339 : vector<1x1x44x144xf32> to vector<44x144xf32>
    %cst_349 = arith.constant dense<0.000000e+00> : vector<19x144xf32>
    %341 = tpu.matmul %308, %340, %cst_349 {dimension_numbers = #tpu.dot_dimension_numbers<[1], [0], [0], [1], [0, 0, 1, 1], [], []>} : vector<19x44xf32>, vector<44x144xf32>, vector<19x144xf32> -> vector<19x144xf32>
    %342 = arith.addf %338, %341 : vector<19x144xf32>
    %343 = arith.maximumf %331, %342 : vector<19x144xf32>
    %c0_350 = arith.constant 0 : index
    %c0_351 = arith.constant 0 : index
    %344 = vector.load %arg17[%c0_350, %c0_351] : memref<19x144xf32, #tpu.memory_space<vmem>>, vector<19x144xf32>
    tpu.vector_store %arg17[%c0_350, %c0_351], %343 {strides = array<i32>} : memref<19x144xf32, #tpu.memory_space<vmem>>, vector<19x144xf32>,
    %c0_352 = arith.constant 0 : index
    %c0_353 = arith.constant 0 : index
    %345 = vector.load %arg2[%c0_352, %c0_353] : memref<1x144xf32, #tpu.memory_space<vmem>>, vector<1x144xf32>
    %c0_354 = arith.constant 0 : index
    %c0_355 = arith.constant 0 : index
    %346 = vector.load %arg17[%c0_354, %c0_355] : memref<19x144xf32, #tpu.memory_space<vmem>>, vector<1x144xf32>
    %c1_356 = arith.constant 1 : index
    %c0_357 = arith.constant 0 : index
    %347 = vector.load %arg17[%c1_356, %c0_357] : memref<19x144xf32, #tpu.memory_space<vmem>>, vector<1x144xf32>
    %348 = arith.maximumf %346, %347 : vector<1x144xf32>
    %c2_358 = arith.constant 2 : index
    %c0_359 = arith.constant 0 : index
    %349 = vector.load %arg17[%c2_358, %c0_359] : memref<19x144xf32, #tpu.memory_space<vmem>>, vector<1x144xf32>
    %350 = arith.maximumf %348, %349 : vector<1x144xf32>
    %351 = arith.addf %350, %345 : vector<1x144xf32>
    %cst_360 = arith.constant 0.000000e+00 : f32
    %352 = vector.broadcast %cst_360 : f32 to vector<1x144xf32>
    %353 = arith.maximumf %351, %352 : vector<1x144xf32>
    %354 = arith.mulf %353, %0 : vector<1x144xf32>
    %355 = arith.addf %354, %1 : vector<1x144xf32>
    %c1_361 = arith.constant 1 : index
    %c1_362 = arith.constant 1 : index
    %c0_363 = arith.constant 0 : index
    %356 = vector.load %arg14[%c1_361, %c1_362, %c0_363] : memref<2x11x144xf32, #tpu.memory_space<vmem>>, vector<1x1x144xf32>
    %357 = vector.shape_cast %356 : vector<1x1x144xf32> to vector<1x144xf32>
    %358 = vector.shape_cast %355 : vector<1x144xf32> to vector<1x1x144xf32>
    tpu.vector_store %arg14[%c1_361, %c1_362, %c0_363], %358 {strides = array<i32>} : memref<2x11x144xf32, #tpu.memory_space<vmem>>, vector<1x1x144xf32>,
    %c2_364 = arith.constant 2 : index
    %c0_365 = arith.constant 0 : index
    %359 = vector.load %arg17[%c2_364, %c0_365] : memref<19x144xf32, #tpu.memory_space<vmem>>, vector<1x144xf32>
    %c3_366 = arith.constant 3 : index
    %c0_367 = arith.constant 0 : index
    %360 = vector.load %arg17[%c3_366, %c0_367] : memref<19x144xf32, #tpu.memory_space<vmem>>, vector<1x144xf32>
    %361 = arith.maximumf %359, %360 : vector<1x144xf32>
    %c4_368 = arith.constant 4 : index
    %c0_369 = arith.constant 0 : index
    %362 = vector.load %arg17[%c4_368, %c0_369] : memref<19x144xf32, #tpu.memory_space<vmem>>, vector<1x144xf32>
    %363 = arith.maximumf %361, %362 : vector<1x144xf32>
    %364 = arith.addf %363, %345 : vector<1x144xf32>
    %cst_370 = arith.constant 0.000000e+00 : f32
    %365 = vector.broadcast %cst_370 : f32 to vector<1x144xf32>
    %366 = arith.maximumf %364, %365 : vector<1x144xf32>
    %367 = arith.mulf %366, %0 : vector<1x144xf32>
    %368 = arith.addf %367, %1 : vector<1x144xf32>
    %c1_371 = arith.constant 1 : index
    %c2_372 = arith.constant 2 : index
    %c0_373 = arith.constant 0 : index
    %369 = vector.load %arg14[%c1_371, %c2_372, %c0_373] : memref<2x11x144xf32, #tpu.memory_space<vmem>>, vector<1x1x144xf32>
    %370 = vector.shape_cast %369 : vector<1x1x144xf32> to vector<1x144xf32>
    %371 = vector.shape_cast %368 : vector<1x144xf32> to vector<1x1x144xf32>
    tpu.vector_store %arg14[%c1_371, %c2_372, %c0_373], %371 {strides = array<i32>} : memref<2x11x144xf32, #tpu.memory_space<vmem>>, vector<1x1x144xf32>,
    %c4_374 = arith.constant 4 : index
    %c0_375 = arith.constant 0 : index
    %372 = vector.load %arg17[%c4_374, %c0_375] : memref<19x144xf32, #tpu.memory_space<vmem>>, vector<1x144xf32>
    %c5_376 = arith.constant 5 : index
    %c0_377 = arith.constant 0 : index
    %373 = vector.load %arg17[%c5_376, %c0_377] : memref<19x144xf32, #tpu.memory_space<vmem>>, vector<1x144xf32>
    %374 = arith.maximumf %372, %373 : vector<1x144xf32>
    %c6_378 = arith.constant 6 : index
    %c0_379 = arith.constant 0 : index
    %375 = vector.load %arg17[%c6_378, %c0_379] : memref<19x144xf32, #tpu.memory_space<vmem>>, vector<1x144xf32>
    %376 = arith.maximumf %374, %375 : vector<1x144xf32>
    %377 = arith.addf %376, %345 : vector<1x144xf32>
    %cst_380 = arith.constant 0.000000e+00 : f32
    %378 = vector.broadcast %cst_380 : f32 to vector<1x144xf32>
    %379 = arith.maximumf %377, %378 : vector<1x144xf32>
    %380 = arith.mulf %379, %0 : vector<1x144xf32>
    %381 = arith.addf %380, %1 : vector<1x144xf32>
    %c1_381 = arith.constant 1 : index
    %c3_382 = arith.constant 3 : index
    %c0_383 = arith.constant 0 : index
    %382 = vector.load %arg14[%c1_381, %c3_382, %c0_383] : memref<2x11x144xf32, #tpu.memory_space<vmem>>, vector<1x1x144xf32>
    %383 = vector.shape_cast %382 : vector<1x1x144xf32> to vector<1x144xf32>
    %384 = vector.shape_cast %381 : vector<1x144xf32> to vector<1x1x144xf32>
    tpu.vector_store %arg14[%c1_381, %c3_382, %c0_383], %384 {strides = array<i32>} : memref<2x11x144xf32, #tpu.memory_space<vmem>>, vector<1x1x144xf32>,
    %c6_384 = arith.constant 6 : index
    %c0_385 = arith.constant 0 : index
    %385 = vector.load %arg17[%c6_384, %c0_385] : memref<19x144xf32, #tpu.memory_space<vmem>>, vector<1x144xf32>
    %c7_386 = arith.constant 7 : index
    %c0_387 = arith.constant 0 : index
    %386 = vector.load %arg17[%c7_386, %c0_387] : memref<19x144xf32, #tpu.memory_space<vmem>>, vector<1x144xf32>
    %387 = arith.maximumf %385, %386 : vector<1x144xf32>
    %c8_388 = arith.constant 8 : index
    %c0_389 = arith.constant 0 : index
    %388 = vector.load %arg17[%c8_388, %c0_389] : memref<19x144xf32, #tpu.memory_space<vmem>>, vector<1x144xf32>
    %389 = arith.maximumf %387, %388 : vector<1x144xf32>
    %390 = arith.addf %389, %345 : vector<1x144xf32>
    %cst_390 = arith.constant 0.000000e+00 : f32
    %391 = vector.broadcast %cst_390 : f32 to vector<1x144xf32>
    %392 = arith.maximumf %390, %391 : vector<1x144xf32>
    %393 = arith.mulf %392, %0 : vector<1x144xf32>
    %394 = arith.addf %393, %1 : vector<1x144xf32>
    %c1_391 = arith.constant 1 : index
    %c4_392 = arith.constant 4 : index
    %c0_393 = arith.constant 0 : index
    %395 = vector.load %arg14[%c1_391, %c4_392, %c0_393] : memref<2x11x144xf32, #tpu.memory_space<vmem>>, vector<1x1x144xf32>
    %396 = vector.shape_cast %395 : vector<1x1x144xf32> to vector<1x144xf32>
    %397 = vector.shape_cast %394 : vector<1x144xf32> to vector<1x1x144xf32>
    tpu.vector_store %arg14[%c1_391, %c4_392, %c0_393], %397 {strides = array<i32>} : memref<2x11x144xf32, #tpu.memory_space<vmem>>, vector<1x1x144xf32>,
    %c8_394 = arith.constant 8 : index
    %c0_395 = arith.constant 0 : index
    %398 = vector.load %arg17[%c8_394, %c0_395] : memref<19x144xf32, #tpu.memory_space<vmem>>, vector<1x144xf32>
    %c9_396 = arith.constant 9 : index
    %c0_397 = arith.constant 0 : index
    %399 = vector.load %arg17[%c9_396, %c0_397] : memref<19x144xf32, #tpu.memory_space<vmem>>, vector<1x144xf32>
    %400 = arith.maximumf %398, %399 : vector<1x144xf32>
    %c10_398 = arith.constant 10 : index
    %c0_399 = arith.constant 0 : index
    %401 = vector.load %arg17[%c10_398, %c0_399] : memref<19x144xf32, #tpu.memory_space<vmem>>, vector<1x144xf32>
    %402 = arith.maximumf %400, %401 : vector<1x144xf32>
    %403 = arith.addf %402, %345 : vector<1x144xf32>
    %cst_400 = arith.constant 0.000000e+00 : f32
    %404 = vector.broadcast %cst_400 : f32 to vector<1x144xf32>
    %405 = arith.maximumf %403, %404 : vector<1x144xf32>
    %406 = arith.mulf %405, %0 : vector<1x144xf32>
    %407 = arith.addf %406, %1 : vector<1x144xf32>
    %c1_401 = arith.constant 1 : index
    %c5_402 = arith.constant 5 : index
    %c0_403 = arith.constant 0 : index
    %408 = vector.load %arg14[%c1_401, %c5_402, %c0_403] : memref<2x11x144xf32, #tpu.memory_space<vmem>>, vector<1x1x144xf32>
    %409 = vector.shape_cast %408 : vector<1x1x144xf32> to vector<1x144xf32>
    %410 = vector.shape_cast %407 : vector<1x144xf32> to vector<1x1x144xf32>
    tpu.vector_store %arg14[%c1_401, %c5_402, %c0_403], %410 {strides = array<i32>} : memref<2x11x144xf32, #tpu.memory_space<vmem>>, vector<1x1x144xf32>,
    %c10_404 = arith.constant 10 : index
    %c0_405 = arith.constant 0 : index
    %411 = vector.load %arg17[%c10_404, %c0_405] : memref<19x144xf32, #tpu.memory_space<vmem>>, vector<1x144xf32>
    %c11_406 = arith.constant 11 : index
    %c0_407 = arith.constant 0 : index
    %412 = vector.load %arg17[%c11_406, %c0_407] : memref<19x144xf32, #tpu.memory_space<vmem>>, vector<1x144xf32>
    %413 = arith.maximumf %411, %412 : vector<1x144xf32>
    %c12_408 = arith.constant 12 : index
    %c0_409 = arith.constant 0 : index
    %414 = vector.load %arg17[%c12_408, %c0_409] : memref<19x144xf32, #tpu.memory_space<vmem>>, vector<1x144xf32>
    %415 = arith.maximumf %413, %414 : vector<1x144xf32>
    %416 = arith.addf %415, %345 : vector<1x144xf32>
    %cst_410 = arith.constant 0.000000e+00 : f32
    %417 = vector.broadcast %cst_410 : f32 to vector<1x144xf32>
    %418 = arith.maximumf %416, %417 : vector<1x144xf32>
    %419 = arith.mulf %418, %0 : vector<1x144xf32>
    %420 = arith.addf %419, %1 : vector<1x144xf32>
    %c1_411 = arith.constant 1 : index
    %c6_412 = arith.constant 6 : index
    %c0_413 = arith.constant 0 : index
    %421 = vector.load %arg14[%c1_411, %c6_412, %c0_413] : memref<2x11x144xf32, #tpu.memory_space<vmem>>, vector<1x1x144xf32>
    %422 = vector.shape_cast %421 : vector<1x1x144xf32> to vector<1x144xf32>
    %423 = vector.shape_cast %420 : vector<1x144xf32> to vector<1x1x144xf32>
    tpu.vector_store %arg14[%c1_411, %c6_412, %c0_413], %423 {strides = array<i32>} : memref<2x11x144xf32, #tpu.memory_space<vmem>>, vector<1x1x144xf32>,
    %c12_414 = arith.constant 12 : index
    %c0_415 = arith.constant 0 : index
    %424 = vector.load %arg17[%c12_414, %c0_415] : memref<19x144xf32, #tpu.memory_space<vmem>>, vector<1x144xf32>
    %c13_416 = arith.constant 13 : index
    %c0_417 = arith.constant 0 : index
    %425 = vector.load %arg17[%c13_416, %c0_417] : memref<19x144xf32, #tpu.memory_space<vmem>>, vector<1x144xf32>
    %426 = arith.maximumf %424, %425 : vector<1x144xf32>
    %c14_418 = arith.constant 14 : index
    %c0_419 = arith.constant 0 : index
    %427 = vector.load %arg17[%c14_418, %c0_419] : memref<19x144xf32, #tpu.memory_space<vmem>>, vector<1x144xf32>
    %428 = arith.maximumf %426, %427 : vector<1x144xf32>
    %429 = arith.addf %428, %345 : vector<1x144xf32>
    %cst_420 = arith.constant 0.000000e+00 : f32
    %430 = vector.broadcast %cst_420 : f32 to vector<1x144xf32>
    %431 = arith.maximumf %429, %430 : vector<1x144xf32>
    %432 = arith.mulf %431, %0 : vector<1x144xf32>
    %433 = arith.addf %432, %1 : vector<1x144xf32>
    %c1_421 = arith.constant 1 : index
    %c7_422 = arith.constant 7 : index
    %c0_423 = arith.constant 0 : index
    %434 = vector.load %arg14[%c1_421, %c7_422, %c0_423] : memref<2x11x144xf32, #tpu.memory_space<vmem>>, vector<1x1x144xf32>
    %435 = vector.shape_cast %434 : vector<1x1x144xf32> to vector<1x144xf32>
    %436 = vector.shape_cast %433 : vector<1x144xf32> to vector<1x1x144xf32>
    tpu.vector_store %arg14[%c1_421, %c7_422, %c0_423], %436 {strides = array<i32>} : memref<2x11x144xf32, #tpu.memory_space<vmem>>, vector<1x1x144xf32>,
    %c14_424 = arith.constant 14 : index
    %c0_425 = arith.constant 0 : index
    %437 = vector.load %arg17[%c14_424, %c0_425] : memref<19x144xf32, #tpu.memory_space<vmem>>, vector<1x144xf32>
    %c15_426 = arith.constant 15 : index
    %c0_427 = arith.constant 0 : index
    %438 = vector.load %arg17[%c15_426, %c0_427] : memref<19x144xf32, #tpu.memory_space<vmem>>, vector<1x144xf32>
    %439 = arith.maximumf %437, %438 : vector<1x144xf32>
    %c16_428 = arith.constant 16 : index
    %c0_429 = arith.constant 0 : index
    %440 = vector.load %arg17[%c16_428, %c0_429] : memref<19x144xf32, #tpu.memory_space<vmem>>, vector<1x144xf32>
    %441 = arith.maximumf %439, %440 : vector<1x144xf32>
    %442 = arith.addf %441, %345 : vector<1x144xf32>
    %cst_430 = arith.constant 0.000000e+00 : f32
    %443 = vector.broadcast %cst_430 : f32 to vector<1x144xf32>
    %444 = arith.maximumf %442, %443 : vector<1x144xf32>
    %445 = arith.mulf %444, %0 : vector<1x144xf32>
    %446 = arith.addf %445, %1 : vector<1x144xf32>
    %c1_431 = arith.constant 1 : index
    %c8_432 = arith.constant 8 : index
    %c0_433 = arith.constant 0 : index
    %447 = vector.load %arg14[%c1_431, %c8_432, %c0_433] : memref<2x11x144xf32, #tpu.memory_space<vmem>>, vector<1x1x144xf32>
    %448 = vector.shape_cast %447 : vector<1x1x144xf32> to vector<1x144xf32>
    %449 = vector.shape_cast %446 : vector<1x144xf32> to vector<1x1x144xf32>
    tpu.vector_store %arg14[%c1_431, %c8_432, %c0_433], %449 {strides = array<i32>} : memref<2x11x144xf32, #tpu.memory_space<vmem>>, vector<1x1x144xf32>,
    %c16_434 = arith.constant 16 : index
    %c0_435 = arith.constant 0 : index
    %450 = vector.load %arg17[%c16_434, %c0_435] : memref<19x144xf32, #tpu.memory_space<vmem>>, vector<1x144xf32>
    %c17_436 = arith.constant 17 : index
    %c0_437 = arith.constant 0 : index
    %451 = vector.load %arg17[%c17_436, %c0_437] : memref<19x144xf32, #tpu.memory_space<vmem>>, vector<1x144xf32>
    %452 = arith.maximumf %450, %451 : vector<1x144xf32>
    %c18_438 = arith.constant 18 : index
    %c0_439 = arith.constant 0 : index
    %453 = vector.load %arg17[%c18_438, %c0_439] : memref<19x144xf32, #tpu.memory_space<vmem>>, vector<1x144xf32>
    %454 = arith.maximumf %452, %453 : vector<1x144xf32>
    %455 = arith.addf %454, %345 : vector<1x144xf32>
    %cst_440 = arith.constant 0.000000e+00 : f32
    %456 = vector.broadcast %cst_440 : f32 to vector<1x144xf32>
    %457 = arith.maximumf %455, %456 : vector<1x144xf32>
    %458 = arith.mulf %457, %0 : vector<1x144xf32>
    %459 = arith.addf %458, %1 : vector<1x144xf32>
    %c1_441 = arith.constant 1 : index
    %c9_442 = arith.constant 9 : index
    %c0_443 = arith.constant 0 : index
    %460 = vector.load %arg14[%c1_441, %c9_442, %c0_443] : memref<2x11x144xf32, #tpu.memory_space<vmem>>, vector<1x1x144xf32>
    %461 = vector.shape_cast %460 : vector<1x1x144xf32> to vector<1x144xf32>
    %462 = vector.shape_cast %459 : vector<1x144xf32> to vector<1x1x144xf32>
    tpu.vector_store %arg14[%c1_441, %c9_442, %c0_443], %462 {strides = array<i32>} : memref<2x11x144xf32, #tpu.memory_space<vmem>>, vector<1x1x144xf32>,
    %c1_444 = arith.constant 1 : index
    %c0_445 = arith.constant 0 : index
    %c0_446 = arith.constant 0 : index
    %463 = vector.load %arg14[%c1_444, %c0_445, %c0_446] : memref<2x11x144xf32, #tpu.memory_space<vmem>>, vector<1x9x144xf32>
    %464 = vector.shape_cast %463 : vector<1x9x144xf32> to vector<9x144xf32>
    %c1_447 = arith.constant 1 : index
    %c1_448 = arith.constant 1 : index
    %c0_449 = arith.constant 0 : index
    %465 = vector.load %arg14[%c1_447, %c1_448, %c0_449] : memref<2x11x144xf32, #tpu.memory_space<vmem>>, vector<1x9x144xf32>
    %466 = vector.shape_cast %465 : vector<1x9x144xf32> to vector<9x144xf32>
    %c1_450 = arith.constant 1 : index
    %c2_451 = arith.constant 2 : index
    %c0_452 = arith.constant 0 : index
    %467 = vector.load %arg14[%c1_450, %c2_451, %c0_452] : memref<2x11x144xf32, #tpu.memory_space<vmem>>, vector<1x9x144xf32>
    %468 = vector.shape_cast %467 : vector<1x9x144xf32> to vector<9x144xf32>
    %c0_453 = arith.constant 0 : index
    %c0_454 = arith.constant 0 : index
    %c0_455 = arith.constant 0 : index
    %c0_456 = arith.constant 0 : index
    %469 = vector.load %arg5[%c0_453, %c0_454, %c0_455, %c0_456] : memref<3x3x144x128xf32, #tpu.memory_space<vmem>>, vector<1x1x144x128xf32>
    %470 = vector.shape_cast %469 : vector<1x1x144x128xf32> to vector<144x128xf32>
    %cst_457 = arith.constant dense<0.000000e+00> : vector<9x128xf32>
    %471 = tpu.matmul %464, %470, %cst_457 {dimension_numbers = #tpu.dot_dimension_numbers<[1], [0], [0], [1], [0, 0, 1, 1], [], []>} : vector<9x144xf32>, vector<144x128xf32>, vector<9x128xf32> -> vector<9x128xf32>
    %c1_458 = arith.constant 1 : index
    %c0_459 = arith.constant 0 : index
    %c0_460 = arith.constant 0 : index
    %c0_461 = arith.constant 0 : index
    %472 = vector.load %arg5[%c1_458, %c0_459, %c0_460, %c0_461] : memref<3x3x144x128xf32, #tpu.memory_space<vmem>>, vector<1x1x144x128xf32>
    %473 = vector.shape_cast %472 : vector<1x1x144x128xf32> to vector<144x128xf32>
    %cst_462 = arith.constant dense<0.000000e+00> : vector<9x128xf32>
    %474 = tpu.matmul %466, %473, %cst_462 {dimension_numbers = #tpu.dot_dimension_numbers<[1], [0], [0], [1], [0, 0, 1, 1], [], []>} : vector<9x144xf32>, vector<144x128xf32>, vector<9x128xf32> -> vector<9x128xf32>
    %475 = arith.addf %471, %474 : vector<9x128xf32>
    %c2_463 = arith.constant 2 : index
    %c0_464 = arith.constant 0 : index
    %c0_465 = arith.constant 0 : index
    %c0_466 = arith.constant 0 : index
    %476 = vector.load %arg5[%c2_463, %c0_464, %c0_465, %c0_466] : memref<3x3x144x128xf32, #tpu.memory_space<vmem>>, vector<1x1x144x128xf32>
    %477 = vector.shape_cast %476 : vector<1x1x144x128xf32> to vector<144x128xf32>
    %cst_467 = arith.constant dense<0.000000e+00> : vector<9x128xf32>
    %478 = tpu.matmul %468, %477, %cst_467 {dimension_numbers = #tpu.dot_dimension_numbers<[1], [0], [0], [1], [0, 0, 1, 1], [], []>} : vector<9x144xf32>, vector<144x128xf32>, vector<9x128xf32> -> vector<9x128xf32>
    %479 = arith.addf %475, %478 : vector<9x128xf32>
    %c0_468 = arith.constant 0 : index
    %c1_469 = arith.constant 1 : index
    %c0_470 = arith.constant 0 : index
    %c0_471 = arith.constant 0 : index
    %480 = vector.load %arg5[%c0_468, %c1_469, %c0_470, %c0_471] : memref<3x3x144x128xf32, #tpu.memory_space<vmem>>, vector<1x1x144x128xf32>
    %481 = vector.shape_cast %480 : vector<1x1x144x128xf32> to vector<144x128xf32>
    %cst_472 = arith.constant dense<0.000000e+00> : vector<9x128xf32>
    %482 = tpu.matmul %464, %481, %cst_472 {dimension_numbers = #tpu.dot_dimension_numbers<[1], [0], [0], [1], [0, 0, 1, 1], [], []>} : vector<9x144xf32>, vector<144x128xf32>, vector<9x128xf32> -> vector<9x128xf32>
    %c1_473 = arith.constant 1 : index
    %c1_474 = arith.constant 1 : index
    %c0_475 = arith.constant 0 : index
    %c0_476 = arith.constant 0 : index
    %483 = vector.load %arg5[%c1_473, %c1_474, %c0_475, %c0_476] : memref<3x3x144x128xf32, #tpu.memory_space<vmem>>, vector<1x1x144x128xf32>
    %484 = vector.shape_cast %483 : vector<1x1x144x128xf32> to vector<144x128xf32>
    %cst_477 = arith.constant dense<0.000000e+00> : vector<9x128xf32>
    %485 = tpu.matmul %466, %484, %cst_477 {dimension_numbers = #tpu.dot_dimension_numbers<[1], [0], [0], [1], [0, 0, 1, 1], [], []>} : vector<9x144xf32>, vector<144x128xf32>, vector<9x128xf32> -> vector<9x128xf32>
    %486 = arith.addf %482, %485 : vector<9x128xf32>
    %c2_478 = arith.constant 2 : index
    %c1_479 = arith.constant 1 : index
    %c0_480 = arith.constant 0 : index
    %c0_481 = arith.constant 0 : index
    %487 = vector.load %arg5[%c2_478, %c1_479, %c0_480, %c0_481] : memref<3x3x144x128xf32, #tpu.memory_space<vmem>>, vector<1x1x144x128xf32>
    %488 = vector.shape_cast %487 : vector<1x1x144x128xf32> to vector<144x128xf32>
    %cst_482 = arith.constant dense<0.000000e+00> : vector<9x128xf32>
    %489 = tpu.matmul %468, %488, %cst_482 {dimension_numbers = #tpu.dot_dimension_numbers<[1], [0], [0], [1], [0, 0, 1, 1], [], []>} : vector<9x144xf32>, vector<144x128xf32>, vector<9x128xf32> -> vector<9x128xf32>
    %490 = arith.addf %486, %489 : vector<9x128xf32>
    %491 = arith.maximumf %479, %490 : vector<9x128xf32>
    %c0_483 = arith.constant 0 : index
    %c2_484 = arith.constant 2 : index
    %c0_485 = arith.constant 0 : index
    %c0_486 = arith.constant 0 : index
    %492 = vector.load %arg5[%c0_483, %c2_484, %c0_485, %c0_486] : memref<3x3x144x128xf32, #tpu.memory_space<vmem>>, vector<1x1x144x128xf32>
    %493 = vector.shape_cast %492 : vector<1x1x144x128xf32> to vector<144x128xf32>
    %cst_487 = arith.constant dense<0.000000e+00> : vector<9x128xf32>
    %494 = tpu.matmul %464, %493, %cst_487 {dimension_numbers = #tpu.dot_dimension_numbers<[1], [0], [0], [1], [0, 0, 1, 1], [], []>} : vector<9x144xf32>, vector<144x128xf32>, vector<9x128xf32> -> vector<9x128xf32>
    %c1_488 = arith.constant 1 : index
    %c2_489 = arith.constant 2 : index
    %c0_490 = arith.constant 0 : index
    %c0_491 = arith.constant 0 : index
    %495 = vector.load %arg5[%c1_488, %c2_489, %c0_490, %c0_491] : memref<3x3x144x128xf32, #tpu.memory_space<vmem>>, vector<1x1x144x128xf32>
    %496 = vector.shape_cast %495 : vector<1x1x144x128xf32> to vector<144x128xf32>
    %cst_492 = arith.constant dense<0.000000e+00> : vector<9x128xf32>
    %497 = tpu.matmul %466, %496, %cst_492 {dimension_numbers = #tpu.dot_dimension_numbers<[1], [0], [0], [1], [0, 0, 1, 1], [], []>} : vector<9x144xf32>, vector<144x128xf32>, vector<9x128xf32> -> vector<9x128xf32>
    %498 = arith.addf %494, %497 : vector<9x128xf32>
    %c2_493 = arith.constant 2 : index
    %c2_494 = arith.constant 2 : index
    %c0_495 = arith.constant 0 : index
    %c0_496 = arith.constant 0 : index
    %499 = vector.load %arg5[%c2_493, %c2_494, %c0_495, %c0_496] : memref<3x3x144x128xf32, #tpu.memory_space<vmem>>, vector<1x1x144x128xf32>
    %500 = vector.shape_cast %499 : vector<1x1x144x128xf32> to vector<144x128xf32>
    %cst_497 = arith.constant dense<0.000000e+00> : vector<9x128xf32>
    %501 = tpu.matmul %468, %500, %cst_497 {dimension_numbers = #tpu.dot_dimension_numbers<[1], [0], [0], [1], [0, 0, 1, 1], [], []>} : vector<9x144xf32>, vector<144x128xf32>, vector<9x128xf32> -> vector<9x128xf32>
    %502 = arith.addf %498, %501 : vector<9x128xf32>
    %503 = arith.maximumf %491, %502 : vector<9x128xf32>
    %c0_498 = arith.constant 0 : index
    %c0_499 = arith.constant 0 : index
    %504 = vector.load %arg18[%c0_498, %c0_499] : memref<9x128xf32, #tpu.memory_space<vmem>>, vector<9x128xf32>
    tpu.vector_store %arg18[%c0_498, %c0_499], %503 {strides = array<i32>} : memref<9x128xf32, #tpu.memory_space<vmem>>, vector<9x128xf32>,
    %c0_500 = arith.constant 0 : index
    %c0_501 = arith.constant 0 : index
    %505 = vector.load %arg6[%c0_500, %c0_501] : memref<1x128xf32, #tpu.memory_space<vmem>>, vector<1x128xf32>
    %c0_502 = arith.constant 0 : index
    %c0_503 = arith.constant 0 : index
    %506 = vector.load %arg18[%c0_502, %c0_503] : memref<9x128xf32, #tpu.memory_space<vmem>>, vector<1x128xf32>
    %c1_504 = arith.constant 1 : index
    %c0_505 = arith.constant 0 : index
    %507 = vector.load %arg18[%c1_504, %c0_505] : memref<9x128xf32, #tpu.memory_space<vmem>>, vector<1x128xf32>
    %508 = arith.maximumf %506, %507 : vector<1x128xf32>
    %c2_506 = arith.constant 2 : index
    %c0_507 = arith.constant 0 : index
    %509 = vector.load %arg18[%c2_506, %c0_507] : memref<9x128xf32, #tpu.memory_space<vmem>>, vector<1x128xf32>
    %510 = arith.maximumf %508, %509 : vector<1x128xf32>
    %511 = arith.addf %510, %505 : vector<1x128xf32>
    %cst_508 = arith.constant 0.000000e+00 : f32
    %512 = vector.broadcast %cst_508 : f32 to vector<1x128xf32>
    %513 = arith.maximumf %511, %512 : vector<1x128xf32>
    %c1_509 = arith.constant 1 : index
    %c0_510 = arith.constant 0 : index
    %c0_511 = arith.constant 0 : index
    %514 = vector.load %arg15[%c1_509, %c0_510, %c0_511] : memref<2x4x128xf32, #tpu.memory_space<vmem>>, vector<1x1x128xf32>
    %515 = vector.shape_cast %514 : vector<1x1x128xf32> to vector<1x128xf32>
    %516 = vector.shape_cast %513 : vector<1x128xf32> to vector<1x1x128xf32>
    tpu.vector_store %arg15[%c1_509, %c0_510, %c0_511], %516 {strides = array<i32>} : memref<2x4x128xf32, #tpu.memory_space<vmem>>, vector<1x1x128xf32>,
    %c2_512 = arith.constant 2 : index
    %c0_513 = arith.constant 0 : index
    %517 = vector.load %arg18[%c2_512, %c0_513] : memref<9x128xf32, #tpu.memory_space<vmem>>, vector<1x128xf32>
    %c3_514 = arith.constant 3 : index
    %c0_515 = arith.constant 0 : index
    %518 = vector.load %arg18[%c3_514, %c0_515] : memref<9x128xf32, #tpu.memory_space<vmem>>, vector<1x128xf32>
    %519 = arith.maximumf %517, %518 : vector<1x128xf32>
    %c4_516 = arith.constant 4 : index
    %c0_517 = arith.constant 0 : index
    %520 = vector.load %arg18[%c4_516, %c0_517] : memref<9x128xf32, #tpu.memory_space<vmem>>, vector<1x128xf32>
    %521 = arith.maximumf %519, %520 : vector<1x128xf32>
    %522 = arith.addf %521, %505 : vector<1x128xf32>
    %cst_518 = arith.constant 0.000000e+00 : f32
    %523 = vector.broadcast %cst_518 : f32 to vector<1x128xf32>
    %524 = arith.maximumf %522, %523 : vector<1x128xf32>
    %c1_519 = arith.constant 1 : index
    %c1_520 = arith.constant 1 : index
    %c0_521 = arith.constant 0 : index
    %525 = vector.load %arg15[%c1_519, %c1_520, %c0_521] : memref<2x4x128xf32, #tpu.memory_space<vmem>>, vector<1x1x128xf32>
    %526 = vector.shape_cast %525 : vector<1x1x128xf32> to vector<1x128xf32>
    %527 = vector.shape_cast %524 : vector<1x128xf32> to vector<1x1x128xf32>
    tpu.vector_store %arg15[%c1_519, %c1_520, %c0_521], %527 {strides = array<i32>} : memref<2x4x128xf32, #tpu.memory_space<vmem>>, vector<1x1x128xf32>,
    %c4_522 = arith.constant 4 : index
    %c0_523 = arith.constant 0 : index
    %528 = vector.load %arg18[%c4_522, %c0_523] : memref<9x128xf32, #tpu.memory_space<vmem>>, vector<1x128xf32>
    %c5_524 = arith.constant 5 : index
    %c0_525 = arith.constant 0 : index
    %529 = vector.load %arg18[%c5_524, %c0_525] : memref<9x128xf32, #tpu.memory_space<vmem>>, vector<1x128xf32>
    %530 = arith.maximumf %528, %529 : vector<1x128xf32>
    %c6_526 = arith.constant 6 : index
    %c0_527 = arith.constant 0 : index
    %531 = vector.load %arg18[%c6_526, %c0_527] : memref<9x128xf32, #tpu.memory_space<vmem>>, vector<1x128xf32>
    %532 = arith.maximumf %530, %531 : vector<1x128xf32>
    %533 = arith.addf %532, %505 : vector<1x128xf32>
    %cst_528 = arith.constant 0.000000e+00 : f32
    %534 = vector.broadcast %cst_528 : f32 to vector<1x128xf32>
    %535 = arith.maximumf %533, %534 : vector<1x128xf32>
    %c1_529 = arith.constant 1 : index
    %c2_530 = arith.constant 2 : index
    %c0_531 = arith.constant 0 : index
    %536 = vector.load %arg15[%c1_529, %c2_530, %c0_531] : memref<2x4x128xf32, #tpu.memory_space<vmem>>, vector<1x1x128xf32>
    %537 = vector.shape_cast %536 : vector<1x1x128xf32> to vector<1x128xf32>
    %538 = vector.shape_cast %535 : vector<1x128xf32> to vector<1x1x128xf32>
    tpu.vector_store %arg15[%c1_529, %c2_530, %c0_531], %538 {strides = array<i32>} : memref<2x4x128xf32, #tpu.memory_space<vmem>>, vector<1x1x128xf32>,
    %c6_532 = arith.constant 6 : index
    %c0_533 = arith.constant 0 : index
    %539 = vector.load %arg18[%c6_532, %c0_533] : memref<9x128xf32, #tpu.memory_space<vmem>>, vector<1x128xf32>
    %c7_534 = arith.constant 7 : index
    %c0_535 = arith.constant 0 : index
    %540 = vector.load %arg18[%c7_534, %c0_535] : memref<9x128xf32, #tpu.memory_space<vmem>>, vector<1x128xf32>
    %541 = arith.maximumf %539, %540 : vector<1x128xf32>
    %c8_536 = arith.constant 8 : index
    %c0_537 = arith.constant 0 : index
    %542 = vector.load %arg18[%c8_536, %c0_537] : memref<9x128xf32, #tpu.memory_space<vmem>>, vector<1x128xf32>
    %543 = arith.maximumf %541, %542 : vector<1x128xf32>
    %544 = arith.addf %543, %505 : vector<1x128xf32>
    %cst_538 = arith.constant 0.000000e+00 : f32
    %545 = vector.broadcast %cst_538 : f32 to vector<1x128xf32>
    %546 = arith.maximumf %544, %545 : vector<1x128xf32>
    %c1_539 = arith.constant 1 : index
    %c3_540 = arith.constant 3 : index
    %c0_541 = arith.constant 0 : index
    %547 = vector.load %arg15[%c1_539, %c3_540, %c0_541] : memref<2x4x128xf32, #tpu.memory_space<vmem>>, vector<1x1x128xf32>
    %548 = vector.shape_cast %547 : vector<1x1x128xf32> to vector<1x128xf32>
    %549 = vector.shape_cast %546 : vector<1x128xf32> to vector<1x1x128xf32>
    tpu.vector_store %arg15[%c1_539, %c3_540, %c0_541], %549 {strides = array<i32>} : memref<2x4x128xf32, #tpu.memory_space<vmem>>, vector<1x1x128xf32>,
    %c1_542 = arith.constant 1 : index
    %c0_543 = arith.constant 0 : index
    %c0_544 = arith.constant 0 : index
    %550 = vector.load %arg15[%c1_542, %c0_543, %c0_544] : memref<2x4x128xf32, #tpu.memory_space<vmem>>, vector<1x2x128xf32>
    %551 = vector.shape_cast %550 : vector<1x2x128xf32> to vector<2x128xf32>
    %c1_545 = arith.constant 1 : index
    %c1_546 = arith.constant 1 : index
    %c0_547 = arith.constant 0 : index
    %552 = vector.load %arg15[%c1_545, %c1_546, %c0_547] : memref<2x4x128xf32, #tpu.memory_space<vmem>>, vector<1x2x128xf32>
    %553 = vector.shape_cast %552 : vector<1x2x128xf32> to vector<2x128xf32>
    %c1_548 = arith.constant 1 : index
    %c2_549 = arith.constant 2 : index
    %c0_550 = arith.constant 0 : index
    %554 = vector.load %arg15[%c1_548, %c2_549, %c0_550] : memref<2x4x128xf32, #tpu.memory_space<vmem>>, vector<1x2x128xf32>
    %555 = vector.shape_cast %554 : vector<1x2x128xf32> to vector<2x128xf32>
    %c0_551 = arith.constant 0 : index
    %c0_552 = arith.constant 0 : index
    %c0_553 = arith.constant 0 : index
    %c0_554 = arith.constant 0 : index
    %556 = vector.load %arg7[%c0_551, %c0_552, %c0_553, %c0_554] : memref<3x2x128x64xf32, #tpu.memory_space<vmem>>, vector<1x1x128x64xf32>
    %557 = vector.shape_cast %556 : vector<1x1x128x64xf32> to vector<128x64xf32>
    %cst_555 = arith.constant dense<0.000000e+00> : vector<2x64xf32>
    %558 = tpu.matmul %551, %557, %cst_555 {dimension_numbers = #tpu.dot_dimension_numbers<[1], [0], [0], [1], [0, 0, 1, 1], [], []>} : vector<2x128xf32>, vector<128x64xf32>, vector<2x64xf32> -> vector<2x64xf32>
    %c1_556 = arith.constant 1 : index
    %c0_557 = arith.constant 0 : index
    %c0_558 = arith.constant 0 : index
    %c0_559 = arith.constant 0 : index
    %559 = vector.load %arg7[%c1_556, %c0_557, %c0_558, %c0_559] : memref<3x2x128x64xf32, #tpu.memory_space<vmem>>, vector<1x1x128x64xf32>
    %560 = vector.shape_cast %559 : vector<1x1x128x64xf32> to vector<128x64xf32>
    %cst_560 = arith.constant dense<0.000000e+00> : vector<2x64xf32>
    %561 = tpu.matmul %553, %560, %cst_560 {dimension_numbers = #tpu.dot_dimension_numbers<[1], [0], [0], [1], [0, 0, 1, 1], [], []>} : vector<2x128xf32>, vector<128x64xf32>, vector<2x64xf32> -> vector<2x64xf32>
    %562 = arith.addf %558, %561 : vector<2x64xf32>
    %c2_561 = arith.constant 2 : index
    %c0_562 = arith.constant 0 : index
    %c0_563 = arith.constant 0 : index
    %c0_564 = arith.constant 0 : index
    %563 = vector.load %arg7[%c2_561, %c0_562, %c0_563, %c0_564] : memref<3x2x128x64xf32, #tpu.memory_space<vmem>>, vector<1x1x128x64xf32>
    %564 = vector.shape_cast %563 : vector<1x1x128x64xf32> to vector<128x64xf32>
    %cst_565 = arith.constant dense<0.000000e+00> : vector<2x64xf32>
    %565 = tpu.matmul %555, %564, %cst_565 {dimension_numbers = #tpu.dot_dimension_numbers<[1], [0], [0], [1], [0, 0, 1, 1], [], []>} : vector<2x128xf32>, vector<128x64xf32>, vector<2x64xf32> -> vector<2x64xf32>
    %566 = arith.addf %562, %565 : vector<2x64xf32>
    %c0_566 = arith.constant 0 : index
    %c1_567 = arith.constant 1 : index
    %c0_568 = arith.constant 0 : index
    %c0_569 = arith.constant 0 : index
    %567 = vector.load %arg7[%c0_566, %c1_567, %c0_568, %c0_569] : memref<3x2x128x64xf32, #tpu.memory_space<vmem>>, vector<1x1x128x64xf32>
    %568 = vector.shape_cast %567 : vector<1x1x128x64xf32> to vector<128x64xf32>
    %cst_570 = arith.constant dense<0.000000e+00> : vector<2x64xf32>
    %569 = tpu.matmul %551, %568, %cst_570 {dimension_numbers = #tpu.dot_dimension_numbers<[1], [0], [0], [1], [0, 0, 1, 1], [], []>} : vector<2x128xf32>, vector<128x64xf32>, vector<2x64xf32> -> vector<2x64xf32>
    %c1_571 = arith.constant 1 : index
    %c1_572 = arith.constant 1 : index
    %c0_573 = arith.constant 0 : index
    %c0_574 = arith.constant 0 : index
    %570 = vector.load %arg7[%c1_571, %c1_572, %c0_573, %c0_574] : memref<3x2x128x64xf32, #tpu.memory_space<vmem>>, vector<1x1x128x64xf32>
    %571 = vector.shape_cast %570 : vector<1x1x128x64xf32> to vector<128x64xf32>
    %cst_575 = arith.constant dense<0.000000e+00> : vector<2x64xf32>
    %572 = tpu.matmul %553, %571, %cst_575 {dimension_numbers = #tpu.dot_dimension_numbers<[1], [0], [0], [1], [0, 0, 1, 1], [], []>} : vector<2x128xf32>, vector<128x64xf32>, vector<2x64xf32> -> vector<2x64xf32>
    %573 = arith.addf %569, %572 : vector<2x64xf32>
    %c2_576 = arith.constant 2 : index
    %c1_577 = arith.constant 1 : index
    %c0_578 = arith.constant 0 : index
    %c0_579 = arith.constant 0 : index
    %574 = vector.load %arg7[%c2_576, %c1_577, %c0_578, %c0_579] : memref<3x2x128x64xf32, #tpu.memory_space<vmem>>, vector<1x1x128x64xf32>
    %575 = vector.shape_cast %574 : vector<1x1x128x64xf32> to vector<128x64xf32>
    %cst_580 = arith.constant dense<0.000000e+00> : vector<2x64xf32>
    %576 = tpu.matmul %555, %575, %cst_580 {dimension_numbers = #tpu.dot_dimension_numbers<[1], [0], [0], [1], [0, 0, 1, 1], [], []>} : vector<2x128xf32>, vector<128x64xf32>, vector<2x64xf32> -> vector<2x64xf32>
    %577 = arith.addf %573, %576 : vector<2x64xf32>
    %578 = arith.maximumf %566, %577 : vector<2x64xf32>
    %c0_581 = arith.constant 0 : index
    %c0_582 = arith.constant 0 : index
    %579 = vector.load %arg19[%c0_581, %c0_582] : memref<2x64xf32, #tpu.memory_space<vmem>>, vector<2x64xf32>
    tpu.vector_store %arg19[%c0_581, %c0_582], %578 {strides = array<i32>} : memref<2x64xf32, #tpu.memory_space<vmem>>, vector<2x64xf32>,
    %c0_583 = arith.constant 0 : index
    %c0_584 = arith.constant 0 : index
    %580 = vector.load %arg8[%c0_583, %c0_584] : memref<1x64xf32, #tpu.memory_space<vmem>>, vector<1x64xf32>
    %c0_585 = arith.constant 0 : index
    %c0_586 = arith.constant 0 : index
    %581 = vector.load %arg19[%c0_585, %c0_586] : memref<2x64xf32, #tpu.memory_space<vmem>>, vector<1x64xf32>
    %c1_587 = arith.constant 1 : index
    %c0_588 = arith.constant 0 : index
    %582 = vector.load %arg19[%c1_587, %c0_588] : memref<2x64xf32, #tpu.memory_space<vmem>>, vector<1x64xf32>
    %583 = arith.maximumf %581, %582 : vector<1x64xf32>
    %584 = arith.addf %583, %580 : vector<1x64xf32>
    %cst_589 = arith.constant 0.000000e+00 : f32
    %585 = vector.broadcast %cst_589 : f32 to vector<1x64xf32>
    %586 = arith.maximumf %584, %585 : vector<1x64xf32>
    %c1_590 = arith.constant 1 : index
    %c0_591 = arith.constant 0 : index
    %587 = vector.load %arg16[%c1_590, %c0_591] : memref<2x64xf32, #tpu.memory_space<vmem>>, vector<1x64xf32>
    tpu.vector_store %arg16[%c1_590, %c0_591], %586 {strides = array<i32>} : memref<2x64xf32, #tpu.memory_space<vmem>>, vector<1x64xf32>,
    %c0_592 = arith.constant 0 : index
    %c0_593 = arith.constant 0 : index
    %588 = vector.load %arg16[%c0_592, %c0_593] : memref<2x64xf32, #tpu.memory_space<vmem>>, vector<2x64xf32>
    %c0_594 = arith.constant 0 : index
    %c0_595 = arith.constant 0 : index
    %589 = vector.load %arg9[%c0_594, %c0_595] : memref<64x16xf32, #tpu.memory_space<vmem>>, vector<64x16xf32>
    %cst_596 = arith.constant dense<0.000000e+00> : vector<2x16xf32>
    %590 = tpu.matmul %588, %589, %cst_596 {dimension_numbers = #tpu.dot_dimension_numbers<[1], [0], [0], [1], [0, 0, 1, 1], [], []>} : vector<2x64xf32>, vector<64x16xf32>, vector<2x16xf32> -> vector<2x16xf32>
    %c0_597 = arith.constant 0 : index
    %c0_598 = arith.constant 0 : index
    %591 = vector.load %arg10[%c0_597, %c0_598] : memref<1x16xf32, #tpu.memory_space<vmem>>, vector<1x16xf32>
    %592 = vector.broadcast %591 : vector<1x16xf32> to vector<2x16xf32>
    %593 = arith.addf %590, %592 : vector<2x16xf32>
    %cst_599 = arith.constant 0.000000e+00 : f32
    %594 = vector.broadcast %cst_599 : f32 to vector<2x16xf32>
    %595 = arith.maximumf %593, %594 : vector<2x16xf32>
    %c0_600 = arith.constant 0 : index
    %c0_601 = arith.constant 0 : index
    %596 = vector.load %arg11[%c0_600, %c0_601] : memref<16x4xf32, #tpu.memory_space<vmem>>, vector<16x4xf32>
    %cst_602 = arith.constant dense<0.000000e+00> : vector<2x4xf32>
    %597 = tpu.matmul %595, %596, %cst_602 {dimension_numbers = #tpu.dot_dimension_numbers<[1], [0], [0], [1], [0, 0, 1, 1], [], []>} : vector<2x16xf32>, vector<16x4xf32>, vector<2x4xf32> -> vector<2x4xf32>
    %c0_603 = arith.constant 0 : index
    %c0_604 = arith.constant 0 : index
    %598 = vector.load %arg12[%c0_603, %c0_604] : memref<1x4xf32, #tpu.memory_space<vmem>>, vector<1x4xf32>
    %599 = vector.broadcast %598 : vector<1x4xf32> to vector<2x4xf32>
    %600 = arith.addf %597, %599 : vector<2x4xf32>
    %c0_605 = arith.constant 0 : index
    %c0_606 = arith.constant 0 : index
    %601 = vector.load %arg13[%c0_605, %c0_606] : memref<2x4xf32, #tpu.memory_space<vmem>>, vector<2x4xf32>
    tpu.vector_store %arg13[%c0_605, %c0_606], %600 {strides = array<i32>} : memref<2x4xf32, #tpu.memory_space<vmem>>, vector<2x4xf32>,
    return
  }
}

</mosaic_0001>

<bundles_post_ra>
// kernel: custom_cnn_forward.1
= control target key start
LH: loop header
LB: loop body
LE: loop exit
PB: predicated region body
PF: predicated region fallthrough
CT: control target
= control target key end

     0   :  { %18 = vsyncpa [#allocation9], 0  ;;  %s10523_s0 = inlined_call_operand.vmem [shape: f32[2,22,44], index: 0, kind: input, shape index: {}]   ;;  %s10524_s1 = inlined_call_operand.hbm [shape: f32[3,3,44,144], index: 1, kind: input, shape index: {}]   ;;  %s10525_s2 = inlined_call_operand.vmem [shape: f32[1,144], index: 2, kind: input, shape index: {}]   ;;  %s10526_s3 = inlined_call_operand.vmem [shape: f32[1,144], index: 3, kind: input, shape index: {}]   ;;  %s10527_s4 = inlined_call_operand.vmem [shape: f32[1,144], index: 4, kind: input, shape index: {}]   ;;  %s10528_s5 = inlined_call_operand.vmem [shape: f32[3,3,144,128], index: 5, kind: input, shape index: {}]   ;;  %s10529_s6 = inlined_call_operand.vmem [shape: f32[1,128], index: 6, kind: input, shape index: {}]   ;;  %s10530_s7 = inlined_call_operand.vmem [shape: f32[3,2,128,64], index: 7, kind: input, shape index: {}]   ;;  %s10531_s8 = inlined_call_operand.vmem [shape: f32[1,64], index: 8, kind: input, shape index: {}]   ;;  %s10532_s9 = inlined_call_operand.vmem [shape: f32[64,16], index: 9, kind: input, shape index: {}]   ;;  %s10533_s10 = inlined_call_operand.vmem [shape: f32[1,16], index: 10, kind: input, shape index: {}]   ;;  %s10534_s11 = inlined_call_operand.vmem [shape: f32[16,4], index: 11, kind: input, shape index: {}]   ;;  %s10535_s12 = inlined_call_operand.vmem [shape: f32[1,4], index: 12, kind: input, shape index: {}]   ;;  %s10536_s13 = inlined_call_operand.hbm [shape: f32[2,4], index: 13, kind: output, shape index: {}]  }
   0x1   :  { %19 = vsyncpa [#allocation10], 0  ;;  %s7912_s25 = smov [#allocation8]   ;;  %s7864_s29 = scalar_lea.hbm %s10524_s1, 13824 }
   0x2   :  { %s27_s26 = sshll.u32 %s7912_s25, 4  ;;  %p7865_p0 = scmp.ne.s32.totalorder %s10524_s1, %s7864_s29  ;;  %s28_s26 = int_to_ptr.vmem [resolvable:$true] %s27_s26 }
   0x3   :  { %p7868_p1 = scmp.lt.u32.totalorder %s7864_s29, %s10524_s1 }
   0x5   :  { %p7870_p2 = pnand %p7868_p1, %p7865_p0 }
   0x7   :  { %7873 = shalt.err (!%p7870_p2)
}
   0x8   :  { %s7874_s17 = scalar_lea.vmem %s28_s26, 13824  ;;  %p7879_p4 = scmp.lt.s32.totalorder %s28_s26, %s28_s26 }
   0x9   :  { %p7875_p3 = scmp.ne.s32.totalorder %s28_s26, %s7874_s17  ;;  %p7880_p5 = scmp.lt.s32.totalorder %s7874_s17, %s7874_s17 }
   0xb   :  { %p7881_p6 = por %p7880_p5, %p7879_p4 }
   0xd   :  { %p7882_p7 = pnand %p7881_p6, %p7875_p3 }
   0xf   :  { %7885 = shalt.err (!%p7882_p7)
}
  0x10   :  { %s7913_s18 = smov 256   ;;  %s7914_s19 = smov 16  }
  0x11   :  { %33 = dma.hbm_to_vmem [thread:$0]  %s10524_s1, 13824, %s28_s26, [#allocation9], %s7913_s18, %s7913_s18, %s7914_s19  }
  0x12   :  { %7908 = dma.done.wait [#allocation9], 13824  }
  0x13   :  { %7909 = vsyncadd [#allocation9], 4294953472  ;;  %v7915_v0 = vmov 0.0   ;;  %vm114_vm0 = vcmask 1043456   ;;  %vm7916_vm1 = vmmov 1   ;;  %v93_v2 = vld [vmem:[#allocation8 + $0x128] sm:$0xff] }
  0x14   :  { %185 = vmatprep.mubr.f32.mxu0 %v7915_v0  ;;  %515 = vmatprep.mubr.f32.mxu1 %v7915_v0  ;;  %vm8004_vm2 = vmpackc.low %vm114_vm0, %vm7916_vm1  ;;  %v95_v3 = vld [vmem:[#allocation8 + $0x138] sm:$0xff]  ;;  %v434_v4 = vld [vmem:[#allocation8 + $0x188] sm:$0xff]  ;;  %vm104_vm3 = vcmask 359424   ;;  %vm1056_vm5 = vcmask 130048   ;;  %vm1061_vm6 = vcmask 124928   ;;  %vm1243_vm7 = vcmask 1046528  }
  0x15   :  { %v6678_v5 = vpack.c.bf16 %v95_v3, %v93_v2  ;;  %v436_v6 = vld [vmem:[#allocation8 + $0x198] sm:$0xff]  ;;  %v92_v7 = vld [vmem:[#allocation8 + $0x120] sm:$0xff]  ;;  %v94_v8 = vld [vmem:[#allocation8 + $0x130] sm:$0xff]  ;;  %vm1435_vm8 = vcmask 1045504   ;;  %vm7918_vm9 = vmmov 0   ;;  %vm2659_vm10 = vcmask 517120  }
  0x16   :  { %v6720_v9 = vpack.c.bf16 %v436_v6, %v434_v4  ;;  %v6680_v10 = vpack.c.bf16 %v94_v8, %v92_v7  ;;  %v433_v11 = vld [vmem:[#allocation8 + $0x180] sm:$0xff]  ;;  %v435_v12 = vld [vmem:[#allocation8 + $0x190] sm:$0xff]  ;;  %v97_v13 = vld [vmem:[#allocation8 + $0x148] sm:$0xff]  ;;  %vm2667_vm11 = vcmask 516096   ;;  %vm5245_vm12 = vcmask 523264   ;;  %s7919_s19 = smov [#allocation11]  }
  0x17   :  { %6679 = vmatprep.subr.bf16.mxu0 %v6678_v5  ;;  %v6722_v14 = vpack.c.bf16 %v435_v12, %v433_v11  ;;  %v99_v15 = vld [vmem:[#allocation8 + $0x158] sm:$0xff]  ;;  %v438_v16 = vld [vmem:[#allocation8 + $0x1a8] sm:$0xff]  ;;  %v96_v20 = vld [vmem:[#allocation8 + $0x140] sm:$0xff]  ;;  %vm5402_vm13 = vcmask 25600  }
  0x18   :  { %v440_v17 = vld [vmem:[#allocation8 + $0x1b8] sm:$0xff]  ;;  %6721 = vmatprep.subr.bf16.mxu1 %v6720_v9  ;;  %6681 = vmatpush1.bf16.msra.mxu0 %v6680_v10  ;;  %v6682_v18 = vpack.c.bf16 %v99_v15, %v97_v13  ;;  %v98_v21 = vld [vmem:[#allocation8 + $0x150] sm:$0xff]  ;;  %v437_v22 = vld [vmem:[#allocation8 + $0x1a0] sm:$0xff] }
  0x19   :  { %v6724_v19 = vpack.c.bf16 %v440_v17, %v438_v16  ;;  %6723 = vmatpush1.bf16.msra.mxu1 %v6722_v14  ;;  %v6684_v23 = vpack.c.bf16 %v98_v21, %v96_v20  ;;  %v439_v24 = vld [vmem:[#allocation8 + $0x1b0] sm:$0xff]  ;;  %v101_v25 = vld [vmem:[#allocation8 + $0x168] sm:$0xff]  ;;  %v103_v26 = vld [vmem:[#allocation8 + $0x178] sm:$0xf] }
  0x1a   :  { %6683 = vmatprep.subr.bf16.mxu0 %v6682_v18  ;;  %v6726_v27 = vpack.c.bf16 %v439_v24, %v437_v22  ;;  %v6686_v28 = vpack.c.bf16 %v103_v26, %v101_v25  ;;  %v442_v29 = vld [vmem:[#allocation8 + $0x1c8] sm:$0xff]  ;;  %v444_v30 = vld [vmem:[#allocation8 + $0x1d8] sm:$0xf]  ;;  %v100_v31 = vld [vmem:[#allocation8 + $0x160] sm:$0xff] }
  0x1b   :  { %6725 = vmatprep.subr.bf16.mxu1 %v6724_v19  ;;  %v6728_v32 = vpack.c.bf16 %v444_v30, %v442_v29  ;;  %v102_v33 = vld [vmem:[#allocation8 + $0x170] sm:$0xf]  ;;  %v441_v34 = vld [vmem:[#allocation8 + $0x1c0] sm:$0xff]  ;;  %v80_v37 = vld [vmem:[#allocation8 + $0x8] sm:$0xff] }
  0x1c   :  { %v443_v35 = vld [vmem:[#allocation8 + $0x1d0] sm:$0xf]  ;;  %6685 = vmatpush1.bf16.msra.mxu0 %v6684_v23  ;;  %v6689_v36 = vpack.c.bf16 %v102_v33, %v100_v31  ;;  %v82_v38 = vld [vmem:[#allocation8 + $0x18] sm:$0xff]  ;;  %v421_v41 = vld [vmem:[#allocation8 + $0x68] sm:$0xff] }
  0x1d   :  { %6727 = vmatpush1.bf16.msra.mxu1 %v6726_v27  ;;  %6688 = vmatprep.subr.msk.bf16.mxu0 %vm8004_vm2, %v6686_v28  ;;  %v6731_v39 = vpack.c.bf16 %v443_v35, %v441_v34  ;;  %v6692_v40 = vpack.c.bf16 %v82_v38, %v80_v37  ;;  %v423_v42 = vld [vmem:[#allocation8 + $0x78] sm:$0xff]  ;;  %v79_v43 = vld [vmem:[#allocation8] sm:$0xff]  ;;  %v81_v45 = vld [vmem:[#allocation8 + $0x10] sm:$0xff] }
  0x1e   :  { %6730 = vmatprep.subr.msk.bf16.mxu1 %vm8004_vm2, %v6728_v32  ;;  %v6734_v44 = vpack.c.bf16 %v423_v42, %v421_v41  ;;  %v420_v46 = vld [vmem:[#allocation8 + $0x60] sm:$0xff]  ;;  %v422_v47 = vld [vmem:[#allocation8 + $0x70] sm:$0xff]  ;;  %v84_v48 = vld [vmem:[#allocation8 + $0x28] sm:$0xff]  ;;  %v6694_v51 = vpack.c.bf16 %v81_v45, %v79_v43 }
  0x1f   :  { %v86_v49 = vld [vmem:[#allocation8 + $0x38] sm:$0xff]  ;;  %v425_v52 = vld [vmem:[#allocation8 + $0x88] sm:$0xff]  ;;  %v6736_v54 = vpack.c.bf16 %v422_v47, %v420_v46  ;;  %v83_v55 = vld [vmem:[#allocation8 + $0x20] sm:$0xff] }
  0x20   :  { %6691 = vmatpush1.bf16.msk.msra.mxu0 %vm8004_vm2, %v6689_v36  ;;  %v8017_v50 = vld [vmem:[%s10523_s0 + $0x1] sm:$0xff]  ;;  %v6696_v57 = vpack.c.bf16 %v86_v49, %v84_v48  ;;  %v424_v58 = vld [vmem:[#allocation8 + $0x80] sm:$0xff]  ;;  %v88_v61 = vld [vmem:[#allocation8 + $0x48] sm:$0xff] }
  0x21   :  { %v427_v53 = vld [vmem:[#allocation8 + $0x98] sm:$0xff]  ;;  %6733 = vmatpush1.bf16.msk.msra.mxu1 %vm8004_vm2, %v6731_v39  ;;  %6693 = vmatprep.subr.bf16.mxu0 %v6692_v40  ;;  %v85_v56 = vld [vmem:[#allocation8 + $0x30] sm:$0xff]  ;;  %v429_v3 = vld [vmem:[#allocation8 + $0xa8] sm:$0xff] }
  0x22   :  { %6735 = vmatprep.subr.bf16.mxu1 %v6734_v44  ;;  %v426_v59 = vld [vmem:[#allocation8 + $0x90] sm:$0xff]  ;;  %v6738_v60 = vpack.c.bf16 %v427_v53, %v425_v52  ;;  %v90_v62 = vld [vmem:[#allocation8 + $0x58] sm:$0xf]  ;;  %v8028_v63 = vld [vmem:[%s10523_s0 + $0x9] sm:$0xff]  ;;  %v6698_v2 = vpack.c.bf16 %v85_v56, %v83_v55 }
  0x23   :  { %5431 = vmatmul.mubr.msk.f32.vlgmr.msra.gmra.mrb[0].mxu0 %vm104_vm3, %v8017_v50  ;;  %v431_v4 = vld [vmem:[#allocation8 + $0xb8] sm:$0xf]  ;;  %v6740_v5 = vpack.c.bf16 %v426_v59, %v424_v58  ;;  %v87_v6 = vld [vmem:[#allocation8 + $0x40] sm:$0xff]  ;;  %v89_v7 = vld [vmem:[#allocation8 + $0x50] sm:$0xf]  ;;  %v6700_v8 = vpack.c.bf16 %v90_v62, %v88_v61 }
  0x24   :  { %5446 = vmatmul.mubr.msk.f32.vlgmr.msra.gmra.mrb[0].mxu1 %vm104_vm3, %v8017_v50  ;;  %6695 = vmatpush1.bf16.msra.mxu0 %v6694_v51  ;;  %v428_v9 = vld [vmem:[#allocation8 + $0xa0] sm:$0xff]  ;;  %v430_v10 = vld [vmem:[#allocation8 + $0xb0] sm:$0xf]  ;;  %v6742_v11 = vpack.c.bf16 %v431_v4, %v429_v3  ;;  %v304_v12 = vld [vmem:[#allocation8 + $0x248] sm:$0xff]  ;;  %v6703_v15 = vpack.c.bf16 %v89_v7, %v87_v6 }
  0x25   :  { %6737 = vmatpush1.bf16.msra.mxu1 %v6736_v54  ;;  %191 = vmatprep.mubr.f32.mxu0 %v7915_v0  ;;  %v306_v13 = vld [vmem:[#allocation8 + $0x258] sm:$0xff]  ;;  %v8039_v14 = vld [vmem:[%s10523_s0 + $0x11] sm:$0x7]  ;;  %v625_v16 = vld [vmem:[#allocation8 + $0x2a8] sm:$0xff]  ;;  %v6745_v18 = vpack.c.bf16 %v430_v10, %v428_v9 }
  0x26   :  { %521 = vmatprep.mubr.f32.mxu1 %v7915_v0  ;;  %6697 = vmatprep.subr.bf16.mxu0 %v6696_v57  ;;  %v627_v17 = vld [vmem:[#allocation8 + $0x2b8] sm:$0xff]  ;;  %v303_v19 = vld [vmem:[#allocation8 + $0x240] sm:$0xff]  ;;  %v305_v20 = vld [vmem:[#allocation8 + $0x250] sm:$0xff]  ;;  %v6706_v21 = vpack.c.bf16 %v306_v13, %v304_v12 }
  0x27   :  { %5432 = vmatmul.mubr.msk.f32.gmra.mrb[2].mxu0 %vm104_vm3, %v8028_v63  ;;  %6739 = vmatprep.subr.bf16.mxu1 %v6738_v60  ;;  %v624_v22 = vld [vmem:[#allocation8 + $0x2a0] sm:$0xff]  ;;  %v626_v23 = vld [vmem:[#allocation8 + $0x2b0] sm:$0xff]  ;;  %v6748_v24 = vpack.c.bf16 %v627_v17, %v625_v16  ;;  %v308_v25 = vld [vmem:[#allocation8 + $0x268] sm:$0xff]  ;;  %v6708_v28 = vpack.c.bf16 %v305_v20, %v303_v19 }
  0x28   :  { %5447 = vmatmul.mubr.msk.f32.gmra.mrb[2].mxu1 %vm104_vm3, %v8028_v63  ;;  %6699 = vmatpush1.bf16.msra.mxu0 %v6698_v2  ;;  %v310_v26 = vld [vmem:[#allocation8 + $0x278] sm:$0xff]  ;;  %v629_v29 = vld [vmem:[#allocation8 + $0x2c8] sm:$0xff]  ;;  %v6750_v31 = vpack.c.bf16 %v626_v23, %v624_v22  ;;  %v307_v32 = vld [vmem:[#allocation8 + $0x260] sm:$0xff] }
  0x29   :  { %6741 = vmatpush1.bf16.msra.mxu1 %v6740_v5  ;;  %197 = vmatprep.mubr.f32.mxu0 %v7915_v0  ;;  %v8056_v27 = vld [vmem:[%s10523_s0] sm:$0xff]  ;;  %v6710_v34 = vpack.c.bf16 %v310_v26, %v308_v25  ;;  %v628_v35 = vld [vmem:[#allocation8 + $0x2c0] sm:$0xff]  ;;  %v312_v38 = vld [vmem:[#allocation8 + $0x288] sm:$0xff] }
  0x2a   :  { %527 = vmatprep.mubr.f32.mxu1 %v7915_v0  ;;  %6702 = vmatprep.subr.msk.bf16.mxu0 %vm8004_vm2, %v6700_v8  ;;  %v631_v30 = vld [vmem:[#allocation8 + $0x2d8] sm:$0xff]  ;;  %v309_v33 = vld [vmem:[#allocation8 + $0x270] sm:$0xff]  ;;  %v633_v42 = vld [vmem:[#allocation8 + $0x2e8] sm:$0xff] }
  0x2b   :  { %5433 = vmatmul.mubr.msk.f32.gmra.mrb[4].mxu0 %vm104_vm3, %v8039_v14  ;;  %6744 = vmatprep.subr.msk.bf16.mxu1 %vm8004_vm2, %v6742_v11  ;;  %v630_v36 = vld [vmem:[#allocation8 + $0x2d0] sm:$0xff]  ;;  %v6752_v37 = vpack.c.bf16 %v631_v30, %v629_v29  ;;  %v314_v39 = vld [vmem:[#allocation8 + $0x298] sm:$0xf]  ;;  %v8069_v40 = vld [vmem:[%s10523_s0 + $0x8] sm:$0xff]  ;;  %v6712_v41 = vpack.c.bf16 %v309_v33, %v307_v32 }
  0x2c   :  { %5448 = vmatmul.mubr.msk.f32.gmra.mrb[4].mxu1 %vm104_vm3, %v8039_v14  ;;  %6705 = vmatpush1.bf16.msk.msra.mxu0 %vm8004_vm2, %v6703_v15  ;;  %v635_v43 = vld [vmem:[#allocation8 + $0x2f8] sm:$0xf]  ;;  %v6754_v44 = vpack.c.bf16 %v630_v36, %v628_v35  ;;  %v311_v45 = vld [vmem:[#allocation8 + $0x280] sm:$0xff]  ;;  %v313_v46 = vld [vmem:[#allocation8 + $0x290] sm:$0xf]  ;;  %v6714_v47 = vpack.c.bf16 %v314_v39, %v312_v38 }
  0x2d   :  { %6747 = vmatpush1.bf16.msk.msra.mxu1 %vm8004_vm2, %v6745_v18  ;;  %283 = vmatprep.mubr.f32.mxu0 %v7915_v0  ;;  %v632_v48 = vld [vmem:[#allocation8 + $0x2e0] sm:$0xff]  ;;  %v634_v49 = vld [vmem:[#allocation8 + $0x2f0] sm:$0xf]  ;;  %v6756_v51 = vpack.c.bf16 %v635_v43, %v633_v42  ;;  %v752_v52 = vld [vmem:[#allocation8 + $0x1e8] sm:$0xff]  ;;  %v6717_v55 = vpack.c.bf16 %v313_v46, %v311_v45 }
  0x2e   :  { %604 = vmatprep.mubr.f32.mxu1 %v7915_v0  ;;  %6707 = vmatprep.subr.bf16.mxu0 %v6706_v21  ;;  %v754_v53 = vld [vmem:[#allocation8 + $0x1f8] sm:$0xff]  ;;  %v8080_v54 = vld [vmem:[%s10523_s0 + $0x10] sm:$0x7]  ;;  %v6759_v56 = vpack.c.bf16 %v634_v49, %v632_v48  ;;  %v753_v58 = vld [vmem:[#allocation8 + $0x1f0] sm:$0xff] }
  0x2f   :  { %5436 = vmatmul.mubr.msk.f32.vlgmr.msra.gmra.mrb[0].mxu0 %vm104_vm3, %v8056_v27  ;;  %6749 = vmatprep.subr.bf16.mxu1 %v6748_v24  ;;  %v751_v57 = vld [vmem:[#allocation8 + $0x1e0] sm:$0xff]  ;;  %v6762_v59 = vpack.c.bf16 %v754_v53, %v752_v52  ;;  %v756_v60 = vld [vmem:[#allocation8 + $0x208] sm:$0xff]  ;;  %v758_v61 = vld [vmem:[#allocation8 + $0x218] sm:$0xff] }
  0x30   :  { %5451 = vmatmul.mubr.msk.f32.vlgmr.msra.gmra.mrb[0].mxu1 %vm104_vm3, %v8056_v27  ;;  %6709 = vmatpush1.bf16.msra.mxu0 %v6708_v28  ;;  %v8097_v62 = vld [vmem:[%s10523_s0 + $0x2] sm:$0xff]  ;;  %v6764_v2 = vpack.c.bf16 %v753_v58, %v751_v57  ;;  %v755_v3 = vld [vmem:[#allocation8 + $0x200] sm:$0xff]  ;;  %v6766_v5 = vpack.c.bf16 %v758_v61, %v756_v60  ;;  %v760_v6 = vld [vmem:[#allocation8 + $0x228] sm:$0xff] }
  0x31   :  { %6751 = vmatpush1.bf16.msra.mxu1 %v6750_v31  ;;  %289 = vmatprep.mubr.f32.mxu0 %v7915_v0  ;;  %v757_v4 = vld [vmem:[#allocation8 + $0x210] sm:$0xff]  ;;  %v762_v7 = vld [vmem:[#allocation8 + $0x238] sm:$0xf]  ;;  %v8110_v8 = vld [vmem:[%s10523_s0 + $0xa] sm:$0xff] }
  0x32   :  { %610 = vmatprep.mubr.f32.mxu1 %v7915_v0  ;;  %6711 = vmatprep.subr.bf16.mxu0 %v6710_v34  ;;  %v6768_v9 = vpack.c.bf16 %v757_v4, %v755_v3  ;;  %v759_v10 = vld [vmem:[#allocation8 + $0x220] sm:$0xff]  ;;  %v761_v11 = vld [vmem:[#allocation8 + $0x230] sm:$0xf]  ;;  %v6770_v12 = vpack.c.bf16 %v762_v7, %v760_v6  ;;  %v739_v13 = vld [vmem:[#allocation8 + $0xc8] sm:$0xff] }
  0x33   :  { %5437 = vmatmul.mubr.msk.f32.gmra.mrb[2].mxu0 %vm104_vm3, %v8069_v40  ;;  %6753 = vmatprep.subr.bf16.mxu1 %v6752_v37  ;;  %v741_v15 = vld [vmem:[#allocation8 + $0xd8] sm:$0xff]  ;;  %v8121_v16 = vld [vmem:[%s10523_s0 + $0x12] sm:$0x7]  ;;  %v6773_v17 = vpack.c.bf16 %v761_v11, %v759_v10  ;;  %v740_v20 = vld [vmem:[#allocation8 + $0xd0] sm:$0xff] }
  0x34   :  { %5452 = vmatmul.mubr.msk.f32.gmra.mrb[2].mxu1 %vm104_vm3, %v8069_v40  ;;  %6713 = vmatpush1.bf16.msra.mxu0 %v6712_v41  ;;  %v6776_v18 = vpack.c.bf16 %v741_v15, %v739_v13  ;;  %v738_v19 = vld [vmem:[#allocation8 + $0xc0] sm:$0xff]  ;;  %v743_v21 = vld [vmem:[#allocation8 + $0xe8] sm:$0xff]  ;;  %v745_v22 = vld [vmem:[#allocation8 + $0xf8] sm:$0xff] }
  0x35   :  { %6755 = vmatpush1.bf16.msra.mxu1 %v6754_v44  ;;  %295 = vmatprep.mubr.f32.mxu0 %v7915_v0  ;;  %v6778_v23 = vpack.c.bf16 %v740_v20, %v738_v19  ;;  %v6780_v24 = vpack.c.bf16 %v745_v22, %v743_v21  ;;  %v742_v25 = vld [vmem:[#allocation8 + $0xe0] sm:$0xff]  ;;  %v744_v26 = vld [vmem:[#allocation8 + $0xf0] sm:$0xff]  ;;  %v747_v28 = vld [vmem:[#allocation8 + $0x108] sm:$0xff] }
  0x36   :  { %616 = vmatprep.mubr.f32.mxu1 %v7915_v0  ;;  %6716 = vmatprep.subr.msk.bf16.mxu0 %vm8004_vm2, %v6714_v47  ;;  %v749_v29 = vld [vmem:[#allocation8 + $0x118] sm:$0xf]  ;;  %v6782_v30 = vpack.c.bf16 %v744_v26, %v742_v25  ;;  %v746_v32 = vld [vmem:[#allocation8 + $0x100] sm:$0xff]  ;;  %v748_v33 = vld [vmem:[#allocation8 + $0x110] sm:$0xf] }
  0x37   :  { %5438 = vmatmul.mubr.msk.f32.gmra.mrb[4].mxu0 %vm104_vm3, %v8080_v54  ;;  %6758 = vmatprep.subr.msk.bf16.mxu1 %vm8004_vm2, %v6756_v51  ;;  %v6784_v31 = vpack.c.bf16 %v749_v29, %v747_v28  ;;  %v943_v34 = vld [vmem:[#allocation8 + $0x308] sm:$0xff]  ;;  %v945_v35 = vld [vmem:[#allocation8 + $0x318] sm:$0xff]  ;;  %v6787_v36 = vpack.c.bf16 %v748_v33, %v746_v32  ;;  %v942_v37 = vld [vmem:[#allocation8 + $0x300] sm:$0xff] }
  0x38   :  { %5453 = vmatmul.mubr.msk.f32.gmra.mrb[4].mxu1 %vm104_vm3, %v8080_v54  ;;  %6719 = vmatpush1.bf16.msk.msra.mxu0 %vm8004_vm2, %v6717_v55  ;;  %v944_v38 = vld [vmem:[#allocation8 + $0x310] sm:$0xff]  ;;  %v947_v39 = vld [vmem:[#allocation8 + $0x328] sm:$0xff]  ;;  %v949_v41 = vld [vmem:[#allocation8 + $0x338] sm:$0xff]  ;;  %v7917_v55 = vmov 0.0|0.0  }
  0x39   :  { %6761 = vmatpush1.bf16.msk.msra.mxu1 %vm8004_vm2, %v6759_v56  ;;  %394 = vmatprep.mubr.f32.mxu0 %v7915_v0  ;;  %v6794_v42 = vpack.c.bf16 %v949_v41, %v947_v39  ;;  %v946_v43 = vld [vmem:[#allocation8 + $0x320] sm:$0xff]  ;;  %v948_v44 = vld [vmem:[#allocation8 + $0x330] sm:$0xff]  ;;  %v951_v45 = vld [vmem:[#allocation8 + $0x348] sm:$0xff] }
  0x3a   :  { %706 = vmatprep.mubr.f32.mxu1 %v7915_v0  ;;  %6763 = vmatprep.subr.bf16.mxu0 %v6762_v59  ;;  %v953_v46 = vld [vmem:[#allocation8 + $0x358] sm:$0xf]  ;;  %v6796_v47 = vpack.c.bf16 %v948_v44, %v946_v43  ;;  %v950_v48 = vld [vmem:[#allocation8 + $0x340] sm:$0xff]  ;;  %v952_v49 = vld [vmem:[#allocation8 + $0x350] sm:$0xf] }
  0x3b   :  { %5441 = vmatmul.mubr.msk.f32.vlgmr.msra.gmra.mrb[0].mxu0 %vm104_vm3, %v8097_v62  ;;  %v6801_v51 = vpack.c.bf16 %v952_v49, %v950_v48  ;;  %v5534_v52 = vld [vmem:[%s10528_s5 + $0x240] sm:$0xff]  ;;  %6804 = vmatprep.subr.bf16.mxu1 %v7917_v55  ;;  %v5477_v58 = vld [vmem:[%s10528_s5 + $0x1c8] sm:$0xff]  ;;  %v5536_v59 = vld [vmem:[%s10528_s5 + $0x250] sm:$0xff] }
  0x3c   :  { %5456 = vmatmul.mubr.msk.f32.vlgmr.msra.gmra.mrb[0].mxu1 %vm104_vm3, %v8097_v62  ;;  %6765 = vmatpush1.bf16.msra.mxu0 %v6764_v2  ;;  %v5476_v57 = vld [vmem:[%s10528_s5 + $0x1c0] sm:$0xff]  ;;  %v5537_v61 = vld [vmem:[%s10528_s5 + $0x258] sm:$0xff]  ;;  %v5478_v2 = vld [vmem:[%s10528_s5 + $0x1d0] sm:$0xff] }
  0x3d   :  { %400 = vmatprep.mubr.f32.mxu0 %v7915_v0  ;;  %712 = vmatprep.mubr.f32.mxu1 %v7915_v0  ;;  %v6808_v60 = vpack.c.bf16 %v5477_v58, %v5476_v57  ;;  %v5479_v3 = vld [vmem:[%s10528_s5 + $0x1d8] sm:$0xff]  ;;  %v5538_v4 = vld [vmem:[%s10528_s5 + $0x260] sm:$0xff]  ;;  %v5539_v6 = vld [vmem:[%s10528_s5 + $0x268] sm:$0xff] }
  0x3e   :  { %6767 = vmatprep.subr.bf16.mxu0 %v6766_v5  ;;  %v6811_v5 = vpack.c.bf16 %v5479_v3, %v5478_v2  ;;  %v6892_v7 = vpack.c.bf16 %v5539_v6, %v5538_v4  ;;  %v5540_v10 = vld [vmem:[%s10528_s5 + $0x270] sm:$0xff]  ;;  %v5542_v19 = vld [vmem:[%s10528_s5 + $0x280] sm:$0xff]  ;;  %v5543_v20 = vld [vmem:[%s10528_s5 + $0x288] sm:$0xff] }
  0x3f   :  { %5442 = vmatmul.mubr.msk.f32.gmra.mrb[2].mxu0 %vm104_vm3, %v8110_v8  ;;  %v5482_v15 = vld [vmem:[%s10528_s5 + $0x1f0] sm:$0xff]  ;;  %v6898_v21 = vpack.c.bf16 %v5543_v20, %v5542_v19  ;;  %v5545_v28 = vld [vmem:[%s10528_s5 + $0x298] sm:$0xff]  ;;  %v5546_v32 = vld [vmem:[%s10528_s5 + $0x2a0] sm:$0xff] }
  0x40   :  { %5457 = vmatmul.mubr.msk.f32.gmra.mrb[2].mxu1 %vm104_vm3, %v8110_v8  ;;  %6769 = vmatpush1.bf16.msra.mxu0 %v6768_v9  ;;  %v5481_v9 = vld [vmem:[%s10528_s5 + $0x1e8] sm:$0xff]  ;;  %v5544_v25 = vld [vmem:[%s10528_s5 + $0x290] sm:$0xff]  ;;  %v5550_v43 = vld [vmem:[%s10528_s5 + $0x2c0] sm:$0xff] }
  0x41   :  { %406 = vmatprep.mubr.f32.mxu0 %v7915_v0  ;;  %718 = vmatprep.mubr.f32.mxu1 %v7915_v0  ;;  %v6901_v29 = vpack.c.bf16 %v5545_v28, %v5544_v25  ;;  %v5551_v44 = vld [vmem:[%s10528_s5 + $0x2c8] sm:$0xff] }
  0x42   :  { %6772 = vmatprep.subr.msk.bf16.mxu0 %vm8004_vm2, %v6770_v12  ;;  %v5541_v12 = vld [vmem:[%s10528_s5 + $0x278] sm:$0xff] }
  0x43   :  { %5443 = vmatmul.mubr.msk.f32.gmra.mrb[4].mxu0 %vm104_vm3, %v8121_v16  ;;  %v6895_v13 = vpack.c.bf16 %v5541_v12, %v5540_v10 }
  0x44   :  { %5458 = vmatmul.mubr.msk.f32.gmra.mrb[4].mxu1 %vm104_vm3, %v8121_v16  ;;  %6775 = vmatpush1.bf16.msk.msra.mxu0 %vm8004_vm2, %v6773_v17  ;;  %v61_v17 = vlaneseq }
  0x45   :  { %833 = vmatprep.mubr.f32.mxu0 %v7915_v0  ;;  %6777 = vmatprep.subr.bf16.mxu0 %v6776_v18 }
  0x46   :  { %vm8238_vm4 = vcmp.lt.s32.totalorder %v61_v17, 144 }
  0x47   :  { %5461 = vmatmul.mubr.msk.f32.vlgmr.msra.gmra.mrb[6].mxu0 %vm104_vm3, %v8017_v50  ;;  %v6790_v50 = vpack.c.bf16 %v945_v35, %v943_v34  ;;  %65 = vst.msk [vmem:[#allocation2] ss:$8 sm:$0x3] %vm8238_vm4, %v7915_v0  ;;  %68 = vst.msk [vmem:[#allocation2 + $0x12] ss:$8 sm:$0x3] %vm8238_vm4, %v7915_v0 }
  0x48   :  { %6779 = vmatpush1.bf16.msra.mxu0 %v6778_v23  ;;  %839 = vmatprep.mubr.f32.mxu0 %v7915_v0  ;;  %2670 = vst.msk [vmem:[#allocation2 + $0x20] ss:$8 sm:$0x3] %vm8238_vm4, %v7915_v0  ;;  %2673 = vst.msk [vmem:[#allocation2 + $0x32] ss:$8 sm:$0x3] %vm8238_vm4, %v7915_v0 }
  0x49   :  { %6781 = vmatprep.subr.bf16.mxu0 %v6780_v24  ;;  %v5484_v23 = vld [vmem:[%s10528_s5 + $0x200] sm:$0xff]  ;;  %v5485_v24 = vld [vmem:[%s10528_s5 + $0x208] sm:$0xff] }
  0x4a   :  { %v6820_v26 = vpack.c.bf16 %v5485_v24, %v5484_v23  ;;  %v5547_v34 = vld [vmem:[%s10528_s5 + $0x2a8] sm:$0xff]  ;;  %v5488_v35 = vld [vmem:[%s10528_s5 + $0x220] sm:$0xff] }
  0x4b   :  { %5462 = vmatmul.mubr.msk.f32.gmra.mrb[8].mxu0 %vm104_vm3, %v8028_v63  ;;  %v6792_v63 = vpack.c.bf16 %v944_v38, %v942_v37  ;;  %v5548_v37 = vld [vmem:[%s10528_s5 + $0x2b0] sm:$0xff]  ;;  %v5549_v38 = vld [vmem:[%s10528_s5 + $0x2b8] sm:$0xff] }
  0x4c   :  { %6783 = vmatpush1.bf16.msra.mxu0 %v6782_v30  ;;  %845 = vmatprep.mubr.f32.mxu0 %v7915_v0  ;;  %v5486_v30 = vld [vmem:[%s10528_s5 + $0x210] sm:$0xff]  ;;  %v6907_v41 = vpack.c.bf16 %v5549_v38, %v5548_v37 }
  0x4d   :  { %6786 = vmatprep.subr.msk.bf16.mxu0 %vm8004_vm2, %v6784_v31  ;;  %v5487_v31 = vld [vmem:[%s10528_s5 + $0x218] sm:$0xff] }
  0x4e   :  { %v6823_v33 = vpack.c.bf16 %v5487_v31, %v5486_v30  ;;  %v8323_v30 = vld [vmem:[%s10526_s3] sm:$0x3] }
  0x4f   :  { %5463 = vmatmul.mubr.msk.f32.gmra.mrb[10].mxu0 %vm104_vm3, %v8039_v14  ;;  %v6798_v14 = vpack.c.bf16 %v953_v46, %v951_v45  ;;  %v6910_v46 = vpack.c.bf16 %v5551_v44, %v5550_v43 }
  0x50   :  { %6789 = vmatpush1.bf16.msk.msra.mxu0 %vm8004_vm2, %v6787_v36  ;;  %922 = vmatprep.mubr.f32.mxu0 %v7915_v0  ;;  %v5489_v36 = vld [vmem:[%s10528_s5 + $0x228] sm:$0xff] }
  0x51   :  { %6791 = vmatprep.subr.bf16.mxu0 %v6790_v50  ;;  %v6904_v50 = vpack.c.bf16 %v5547_v34, %v5546_v32  ;;  %v6826_v39 = vpack.c.bf16 %v5489_v36, %v5488_v35 }
  0x53   :  { %5466 = vmatmul.mubr.msk.f32.vlgmr.msra.gmra.mrb[6].mxu0 %vm104_vm3, %v8056_v27  ;;  %v5474_v27 = vld [vmem:[%s10528_s5 + $0x1b0] sm:$0xff] }
  0x54   :  { %6793 = vmatpush1.bf16.msra.mxu0 %v6792_v63  ;;  %928 = vmatprep.mubr.f32.mxu0 %v7915_v0  ;;  %v5490_v63 = vld [vmem:[%s10528_s5 + $0x230] sm:$0xff] }
  0x55   :  { %6795 = vmatprep.subr.bf16.mxu0 %v6794_v42  ;;  %v5491_v42 = vld [vmem:[%s10528_s5 + $0x238] sm:$0xff] }
  0x56   :  { %v6829_v45 = vpack.c.bf16 %v5491_v42, %v5490_v63 }
  0x57   :  { %5467 = vmatmul.mubr.msk.f32.gmra.mrb[8].mxu0 %vm104_vm3, %v8069_v40  ;;  %v5475_v40 = vld [vmem:[%s10528_s5 + $0x1b8] sm:$0xff] }
  0x58   :  { %6797 = vmatpush1.bf16.msra.mxu0 %v6796_v47  ;;  %934 = vmatprep.mubr.f32.mxu0 %v7915_v0  ;;  %v6805_v53 = vpack.c.bf16 %v5475_v40, %v5474_v27 }
  0x59   :  { %6800 = vmatprep.subr.msk.bf16.mxu0 %vm8004_vm2, %v6798_v14 }
  0x5a   :  { %6806 = vmatpush1.bf16.msra.mxu1 %v6805_v53 }
  0x5b   :  { %5468 = vmatmul.mubr.msk.f32.gmra.mrb[10].mxu0 %vm104_vm3, %v8080_v54  ;;  %v5535_v54 = vld [vmem:[%s10528_s5 + $0x248] sm:$0xff]  ;;  %6807 = vmatprep.subr.bf16.mxu1 %v7917_v55 }
  0x5c   :  { %6803 = vmatpush1.bf16.msk.msra.mxu0 %vm8004_vm2, %v6801_v51  ;;  %1024 = vmatprep.mubr.f32.mxu0 %v7915_v0  ;;  %v6886_v56 = vpack.c.bf16 %v5535_v54, %v5534_v52 }
  0x5d   :  { %6885 = vmatprep.subr.bf16.mxu0 %v7917_v55 }
  0x5e   :  { %6809 = vmatpush1.bf16.msra.mxu1 %v6808_v60 }
  0x5f   :  { %5471 = vmatmul.mubr.msk.f32.vlgmr.msra.gmra.mrb[6].mxu0 %vm104_vm3, %v8097_v62  ;;  %v6889_v62 = vpack.c.bf16 %v5537_v61, %v5536_v59  ;;  %6810 = vmatprep.subr.bf16.mxu1 %v7917_v55 }
  0x60   :  { %1030 = vmatprep.mubr.f32.mxu0 %v7915_v0  ;;  %6887 = vmatpush1.bf16.msra.mxu0 %v6886_v56 }
  0x61   :  { %6888 = vmatprep.subr.bf16.mxu0 %v7917_v55 }
  0x62   :  { %6812 = vmatpush1.bf16.msra.mxu1 %v6811_v5 }
  0x63   :  { %5472 = vmatmul.mubr.msk.f32.gmra.mrb[8].mxu0 %vm104_vm3, %v8110_v8  ;;  %6813 = vmatprep.subr.bf16.mxu1 %v7917_v55  ;;  %v5480_v8 = vld [vmem:[%s10528_s5 + $0x1e0] sm:$0xff] }
  0x64   :  { %1036 = vmatprep.mubr.f32.mxu0 %v7915_v0  ;;  %6890 = vmatpush1.bf16.msra.mxu0 %v6889_v62  ;;  %v6814_v11 = vpack.c.bf16 %v5481_v9, %v5480_v8 }
  0x65   :  { %6891 = vmatprep.subr.bf16.mxu0 %v7917_v55 }
  0x66   :  { %6815 = vmatpush1.bf16.msra.mxu1 %v6814_v11 }
  0x67   :  { %5473 = vmatmul.mubr.msk.f32.gmra.mrb[10].mxu0 %vm104_vm3, %v8121_v16  ;;  %6816 = vmatprep.subr.bf16.mxu1 %v7917_v55  ;;  %v5483_v16 = vld [vmem:[%s10528_s5 + $0x1f8] sm:$0xff] }
  0x68   :  { %6893 = vmatpush1.bf16.msra.mxu0 %v6892_v7  ;;  %v6817_v18 = vpack.c.bf16 %v5483_v16, %v5482_v15  ;;  %v8317_v16 = vld [vmem:[%s10525_s2] sm:$0x3] }
  0x69   :  { %6894 = vmatprep.subr.bf16.mxu0 %v7917_v55 }
  0x6a   :  { %6818 = vmatpush1.bf16.msra.mxu1 %v6817_v18 }
  0x6b   :  { %6819 = vmatprep.subr.bf16.mxu1 %v7917_v55 }
  0x6c   :  { %6896 = vmatpush1.bf16.msra.mxu0 %v6895_v13 }
  0x6d   :  { %6897 = vmatprep.subr.bf16.mxu0 %v7917_v55 }
  0x6e   :  { %6821 = vmatpush1.bf16.msra.mxu1 %v6820_v26 }
  0x6f   :  { %6822 = vmatprep.subr.bf16.mxu1 %v7917_v55 }
  0x70   :  { %6899 = vmatpush1.bf16.msra.mxu0 %v6898_v21 }
  0x71   :  { %6900 = vmatprep.subr.bf16.mxu0 %v7917_v55 }
  0x72   :  { %6824 = vmatpush1.bf16.msra.mxu1 %v6823_v33 }
  0x73   :  { %6825 = vmatprep.subr.bf16.mxu1 %v7917_v55 }
  0x74   :  { %6902 = vmatpush1.bf16.msra.mxu0 %v6901_v29 }
  0x75   :  { %6903 = vmatprep.subr.bf16.mxu0 %v7917_v55 }
  0x76   :  { %6827 = vmatpush1.bf16.msra.mxu1 %v6826_v39 }
  0x77   :  { %6828 = vmatprep.subr.bf16.mxu1 %v7917_v55 }
  0x78   :  { %6905 = vmatpush1.bf16.msra.mxu0 %v6904_v50 }
  0x79   :  { %6906 = vmatprep.subr.bf16.mxu0 %v7917_v55 }
  0x7a   :  { %6830 = vmatpush1.bf16.msra.mxu1 %v6829_v45  ;;  %v60_v45 = vld [vmem:[%s10527_s4] sm:$0x3] }
  0x7b   :  { %6831 = vmatprep.subr.bf16.mxu1 %v7917_v55 }
  0x7c   :  { %6908 = vmatpush1.bf16.msra.mxu0 %v6907_v41 }
  0x7d   :  { %6909 = vmatprep.subr.bf16.mxu0 %v7917_v55 }
  0x80   :  { %6911 = vmatpush1.bf16.msra.mxu0 %v6910_v46 }
  0x81   :  { %6912 = vmatprep.subr.bf16.mxu0 %v7917_v55 }
 0x10e   :  { %v396_v47 = vpop.f32.mrb[0].mxu0 }
 0x10f   :  { %v708_v14 = vpop.f32.mrb[0].mxu1  ;;  %v398_v48 = vpop.f32.mrb[1].mxu0 }
 0x110   :  { %v731_v49 = vmax.f32 %v396_v47, %v708_v14  ;;  %v710_v51 = vpop.f32.mrb[1].mxu1 }
 0x111   :  { %v732_v27 = vmax.f32 %v398_v48, %v710_v51 }
 0x112   :  { %v402_v40 = vpop.f32.mrb[2].mxu0 }
 0x113   :  { %v714_v52 = vpop.f32.mrb[2].mxu1  ;;  %v404_v53 = vpop.f32.mrb[3].mxu0 }
 0x114   :  { %v733_v54 = vmax.f32 %v402_v40, %v714_v52  ;;  %v716_v56 = vpop.f32.mrb[3].mxu1 }
 0x115   :  { %v734_v57 = vmax.f32 %v404_v53, %v716_v56 }
 0x116   :  { %v408_v58 = vpop.f32.mrb[4].mxu0 }
 0x117   :  { %v720_v59 = vpop.f32.mrb[4].mxu1  ;;  %v410_v60 = vpop.f32.mrb[5].mxu0 }
 0x118   :  { %v735_v61 = vmax.f32 %v408_v58, %v720_v59  ;;  %v722_v62 = vpop.f32.mrb[5].mxu1 }
 0x119   :  { %v736_v2 = vmax.f32 %v410_v60, %v722_v62 }
 0x132   :  { %v1026_v3 = vpop.f32.mrb[6].mxu0 }
 0x133   :  { %v1049_v4 = vmax.f32 %v731_v49, %v1026_v3  ;;  %v1028_v5 = vpop.f32.mrb[7].mxu0 }
 0x134   :  { %v1050_v6 = vmax.f32 %v732_v27, %v1028_v5 }
 0x135   :  { %1055 = vst [vmem:[#allocation5] sm:$0xff] %v1049_v4 }
 0x136   :  { %1057 = vst.msk [vmem:[#allocation5 + $0x8] sm:$0xff] %vm1056_vm5, %v1050_v6  ;;  %v1032_v7 = vpop.f32.mrb[8].mxu0 }
 0x137   :  { %v1051_v8 = vmax.f32 %v733_v54, %v1032_v7  ;;  %v1034_v9 = vpop.f32.mrb[9].mxu0 }
 0x138   :  { %v1052_v10 = vmax.f32 %v734_v57, %v1034_v9 }
 0x139   :  { %1058 = vst [vmem:[#allocation5 + $0x10] sm:$0xff] %v1051_v8 }
 0x13a   :  { %1059 = vst.msk [vmem:[#allocation5 + $0x18] sm:$0xff] %vm1056_vm5, %v1052_v10  ;;  %v1038_v11 = vpop.f32.mrb[10].mxu0 }
 0x13b   :  { %v1053_v12 = vmax.f32 %v735_v61, %v1038_v11  ;;  %v1040_v13 = vpop.f32.mrb[11].mxu0 }
 0x13c   :  { %v1054_v15 = vmax.f32 %v736_v2, %v1040_v13 }
 0x13d   :  { %v1064_v17 = vld [vmem:[#allocation5] ss:$8 sm:$0x3]  ;;  %v1066_v18 = vld [vmem:[#allocation5 + $0x1] ss:$8 sm:$0x3] }
 0x13e   :  { %1060 = vst [vmem:[#allocation5 + $0x20] sm:$0x7] %v1053_v12  ;;  %v1067_v19 = vmax.f32 %v1064_v17, %v1066_v18  ;;  %v1069_v20 = vld [vmem:[#allocation5 + $0x2] ss:$8 sm:$0x3] }
 0x13f   :  { %v1078_v21 = vld [vmem:[#allocation5 + $0x2] ss:$8 sm:$0x3]  ;;  %1062 = vst.msk [vmem:[#allocation5 + $0x28] sm:$0x7] %vm1061_vm6, %v1054_v15 }
 0x140   :  { %v1080_v23 = vld [vmem:[#allocation5 + $0x3] ss:$8 sm:$0x3]  ;;  %v1083_v24 = vld [vmem:[#allocation5 + $0x4] ss:$8 sm:$0x3]  ;;  %v1070_v25 = vmax.f32 %v1067_v19, %v1069_v20 }
 0x141   :  { %v1081_v26 = vmax.f32 %v1078_v21, %v1080_v23  ;;  %v1092_v28 = vld [vmem:[#allocation5 + $0x4] ss:$8 sm:$0x3]  ;;  %v1094_v29 = vld [vmem:[#allocation5 + $0x5] ss:$8 sm:$0x3] }
 0x142   :  { %v1095_v31 = vmax.f32 %v1092_v28, %v1094_v29  ;;  %v1097_v32 = vld [vmem:[#allocation5 + $0x6] ss:$8 sm:$0x3]  ;;  %v1071_v34 = vadd.f32 %v1070_v25, %v8317_v16  ;;  %v1108_v36 = vld [vmem:[#allocation5 + $0x7] ss:$8 sm:$0x3] }
 0x143   :  { %v1106_v33 = vld [vmem:[#allocation5 + $0x6] ss:$8 sm:$0x3]  ;;  %v1084_v35 = vmax.f32 %v1081_v26, %v1083_v24  ;;  %v1111_v50 = vld [vmem:[#allocation5 + $0x10] ss:$8 sm:$0x3] }
 0x144   :  { %v1098_v37 = vmax.f32 %v1095_v31, %v1097_v32  ;;  %v1109_v38 = vmax.f32 %v1106_v33, %v1108_v36  ;;  %v1120_v39 = vld [vmem:[#allocation5 + $0x10] ss:$8 sm:$0x3]  ;;  %v1122_v41 = vld [vmem:[#allocation5 + $0x11] ss:$8 sm:$0x3] }
 0x145   :  { %v1072_v63 = vmax.f32 %v1071_v34, 0.0  ;;  %v1085_v42 = vadd.f32 %v1084_v35, %v8317_v16  ;;  %v1123_v43 = vmax.f32 %v1120_v39, %v1122_v41  ;;  %v1125_v44 = vld [vmem:[#allocation5 + $0x12] ss:$8 sm:$0x3] }
 0x146   :  { %v1099_v46 = vadd.f32 %v1098_v37, %v8317_v16  ;;  %v1112_v47 = vmax.f32 %v1109_v38, %v1111_v50  ;;  %v1134_v14 = vld [vmem:[#allocation5 + $0x12] ss:$8 sm:$0x3]  ;;  %v1136_v48 = vld [vmem:[#allocation5 + $0x13] ss:$8 sm:$0x3] }
 0x147   :  { %v1073_v49 = vmul.f32 %v1072_v63, %v8323_v30  ;;  %v1086_v51 = vmax.f32 %v1085_v42, 0.0  ;;  %v1126_v27 = vmax.f32 %v1123_v43, %v1125_v44  ;;  %v1137_v40 = vmax.f32 %v1134_v14, %v1136_v48  ;;  %v1139_v52 = vld [vmem:[#allocation5 + $0x14] ss:$8 sm:$0x3] }
 0x148   :  { %v1100_v53 = vmax.f32 %v1099_v46, 0.0  ;;  %v1113_v54 = vadd.f32 %v1112_v47, %v8317_v16  ;;  %v1148_v56 = vld [vmem:[#allocation5 + $0x14] ss:$8 sm:$0x3] }
 0x149   :  { %v1087_v57 = vmul.f32 %v1086_v51, %v8323_v30  ;;  %v1127_v58 = vadd.f32 %v1126_v27, %v8317_v16  ;;  %v1140_v59 = vmax.f32 %v1137_v40, %v1139_v52  ;;  %v1150_v60 = vld [vmem:[#allocation5 + $0x15] ss:$8 sm:$0x3]  ;;  %v1153_v61 = vld [vmem:[#allocation5 + $0x16] ss:$8 sm:$0x3]  ;;  %v1074_v62 = vadd.f32 %v1073_v49, %v60_v45 }
 0x14a   :  { %v1101_v2 = vmul.f32 %v1100_v53, %v8323_v30  ;;  %v1114_v3 = vmax.f32 %v1113_v54, 0.0  ;;  %v1151_v4 = vmax.f32 %v1148_v56, %v1150_v60  ;;  %v1162_v5 = vld [vmem:[#allocation5 + $0x16] ss:$8 sm:$0x3]  ;;  %v5517_v46 = vld [vmem:[%s10528_s5 + $0x98] sm:$0xff]  ;;  %v1204_v53 = vld [vmem:[%s10528_s5 + $0x10] sm:$0xff] }
 0x14b   :  { %v1128_v6 = vmax.f32 %v1127_v58, 0.0  ;;  %v1141_v7 = vadd.f32 %v1140_v59, %v8317_v16  ;;  %v1164_v8 = vld [vmem:[#allocation5 + $0x17] ss:$8 sm:$0x3]  ;;  %v1088_v9 = vadd.f32 %v1087_v57, %v60_v45  ;;  %v1205_v57 = vld [vmem:[%s10528_s5 + $0x18] sm:$0xff] }
 0x14c   :  { %1076 = vst.msk [vmem:[#allocation2 + $0x1] ss:$8 sm:$0x3] %vm8238_vm4, %v1074_v62  ;;  %v1115_v10 = vmul.f32 %v1114_v3, %v8323_v30  ;;  %v1154_v11 = vmax.f32 %v1151_v4, %v1153_v61  ;;  %v1165_v12 = vmax.f32 %v1162_v5, %v1164_v8  ;;  %v1167_v13 = vld [vmem:[#allocation5 + $0x20] ss:$8 sm:$0x3]  ;;  %v1102_v17 = vadd.f32 %v1101_v2, %v60_v45 }
 0x14d   :  { %v1176_v15 = vld [vmem:[#allocation5 + $0x20] ss:$8 sm:$0x3]  ;;  %v1129_v18 = vmul.f32 %v1128_v6, %v8323_v30  ;;  %v1142_v19 = vmax.f32 %v1141_v7, 0.0  ;;  %v1202_v44 = vld [vmem:[%s10528_s5] sm:$0xff]  ;;  %v6835_v60 = vpack.c.bf16 %v1205_v57, %v1204_v53  ;;  %v5521_v4 = vld [vmem:[%s10528_s5 + $0xb8] sm:$0xff] }
 0x14e   :  { %v1178_v20 = vld [vmem:[#allocation5 + $0x21] ss:$8 sm:$0x3]  ;;  %1090 = vst.msk [vmem:[#allocation2 + $0x2] ss:$8 sm:$0x3] %vm8238_vm4, %v1088_v9  ;;  %v1155_v21 = vadd.f32 %v1154_v11, %v8317_v16  ;;  %v1168_v23 = vmax.f32 %v1165_v12, %v1167_v13  ;;  %v1116_v25 = vadd.f32 %v1115_v10, %v60_v45 }
 0x14f   :  { %v1179_v24 = vmax.f32 %v1176_v15, %v1178_v20  ;;  %1104 = vst.msk [vmem:[#allocation2 + $0x3] ss:$8 sm:$0x3] %vm8238_vm4, %v1102_v17  ;;  %v1143_v26 = vmul.f32 %v1142_v19, %v8323_v30  ;;  %v1181_v28 = vld [vmem:[#allocation5 + $0x22] ss:$8 sm:$0x3]  ;;  %v1130_v29 = vadd.f32 %v1129_v18, %v60_v45 }
 0x150   :  { %v1156_v31 = vmax.f32 %v1155_v21, 0.0  ;;  %v1169_v32 = vadd.f32 %v1168_v23, %v8317_v16  ;;  %1118 = vst.msk [vmem:[#allocation2 + $0x4] ss:$8 sm:$0x3] %vm8238_vm4, %v1116_v25  ;;  %v5518_v58 = vld [vmem:[%s10528_s5 + $0xa0] sm:$0xff]  ;;  %v5519_v59 = vld [vmem:[%s10528_s5 + $0xa8] sm:$0xff] }
 0x151   :  { %v1182_v33 = vmax.f32 %v1179_v24, %v1181_v28  ;;  %1132 = vst.msk [vmem:[#allocation2 + $0x5] ss:$8 sm:$0x3] %vm8238_vm4, %v1130_v29  ;;  %v1144_v34 = vadd.f32 %v1143_v26, %v60_v45  ;;  %v6916_v61 = vpack.c.bf16 %v5519_v59, %v5518_v58  ;;  %v1206_v62 = vld [vmem:[%s10528_s5 + $0x20] sm:$0xff]  ;;  %v1207_v2 = vld [vmem:[%s10528_s5 + $0x28] sm:$0xff]  ;;  %v5520_v3 = vld [vmem:[%s10528_s5 + $0xb0] sm:$0xff] }
 0x152   :  { %v1157_v35 = vmul.f32 %v1156_v31, %v8323_v30  ;;  %v1170_v36 = vmax.f32 %v1169_v32, 0.0  ;;  %v6838_v6 = vpack.c.bf16 %v1207_v2, %v1206_v62  ;;  %v6919_v7 = vpack.c.bf16 %v5521_v4, %v5520_v3  ;;  %v1208_v8 = vld [vmem:[%s10528_s5 + $0x30] sm:$0xff]  ;;  %v1209_v9 = vld [vmem:[%s10528_s5 + $0x38] sm:$0xff]  ;;  %v5522_v10 = vld [vmem:[%s10528_s5 + $0xc0] sm:$0xff] }
 0x153   :  { %v1183_v50 = vadd.f32 %v1182_v33, %v8317_v16  ;;  %1146 = vst.msk [vmem:[#allocation2 + $0x6] ss:$8 sm:$0x3] %vm8238_vm4, %v1144_v34  ;;  %v5523_v11 = vld [vmem:[%s10528_s5 + $0xc8] sm:$0xff]  ;;  %v6841_v12 = vpack.c.bf16 %v1209_v9, %v1208_v8  ;;  %v1210_v15 = vld [vmem:[%s10528_s5 + $0x40] sm:$0xff]  ;;  %v5524_v18 = vld [vmem:[%s10528_s5 + $0xd0] sm:$0xff] }
 0x154   :  { %v1171_v37 = vmul.f32 %v1170_v36, %v8323_v30  ;;  %v1158_v39 = vadd.f32 %v1157_v35, %v60_v45  ;;  %v6922_v13 = vpack.c.bf16 %v5523_v11, %v5522_v10  ;;  %v1211_v17 = vld [vmem:[%s10528_s5 + $0x48] sm:$0xff]  ;;  %v5525_v19 = vld [vmem:[%s10528_s5 + $0xd8] sm:$0xff]  ;;  %v1212_v23 = vld [vmem:[%s10528_s5 + $0x50] sm:$0xff] }
 0x155   :  { %v1184_v38 = vmax.f32 %v1183_v50, 0.0  ;;  %v6844_v20 = vpack.c.bf16 %v1211_v17, %v1210_v15  ;;  %v6925_v21 = vpack.c.bf16 %v5525_v19, %v5524_v18  ;;  %v1213_v24 = vld [vmem:[%s10528_s5 + $0x58] sm:$0xff]  ;;  %v5526_v25 = vld [vmem:[%s10528_s5 + $0xe0] sm:$0xff]  ;;  %v5527_v26 = vld [vmem:[%s10528_s5 + $0xe8] sm:$0xff] }
 0x156   :  { %v1172_v41 = vadd.f32 %v1171_v37, %v60_v45  ;;  %1160 = vst.msk [vmem:[#allocation2 + $0x7] ss:$8 sm:$0x3] %vm8238_vm4, %v1158_v39  ;;  %v6847_v28 = vpack.c.bf16 %v1213_v24, %v1212_v23  ;;  %v6928_v29 = vpack.c.bf16 %v5527_v26, %v5526_v25  ;;  %v1214_v31 = vld [vmem:[%s10528_s5 + $0x60] sm:$0xff]  ;;  %v1215_v32 = vld [vmem:[%s10528_s5 + $0x68] sm:$0xff]  ;;  %v5528_v33 = vld [vmem:[%s10528_s5 + $0xf0] sm:$0xff] }
 0x157   :  { %v1185_v63 = vmul.f32 %v1184_v38, %v8323_v30  ;;  %v1203_v30 = vld [vmem:[%s10528_s5 + $0x8] sm:$0xff]  ;;  %v5529_v34 = vld [vmem:[%s10528_s5 + $0xf8] sm:$0xff]  ;;  %v6850_v35 = vpack.c.bf16 %v1215_v32, %v1214_v31  ;;  %v1216_v50 = vld [vmem:[%s10528_s5 + $0x70] sm:$0xff] }
 0x158   :  { %1174 = vst.msk [vmem:[#allocation2 + $0x10] ss:$8 sm:$0x3] %vm8238_vm4, %v1172_v41  ;;  %v6832_v40 = vpack.c.bf16 %v1203_v30, %v1202_v44  ;;  %v6931_v36 = vpack.c.bf16 %v5529_v34, %v5528_v33  ;;  %v1217_v37 = vld [vmem:[%s10528_s5 + $0x78] sm:$0xff]  ;;  %v5530_v38 = vld [vmem:[%s10528_s5 + $0x100] sm:$0xff]  ;;  %v5531_v39 = vld [vmem:[%s10528_s5 + $0x108] sm:$0xff] }
 0x159   :  { %v1186_v42 = vadd.f32 %v1185_v63, %v60_v45  ;;  %v5516_v45 = vld [vmem:[%s10528_s5 + $0x90] sm:$0xff]  ;;  %v6853_v41 = vpack.c.bf16 %v1217_v37, %v1216_v50  ;;  %v6934_v63 = vpack.c.bf16 %v5531_v39, %v5530_v38  ;;  %v5533_v44 = vld [vmem:[%s10528_s5 + $0x118] sm:$0xff]  ;;  %v5558_v58 = vld [vmem:[%s10528_s5 + $0x400] sm:$0xff] }
 0x15a   :  { %v6913_v52 = vpack.c.bf16 %v5517_v46, %v5516_v45  ;;  %v5496_v46 = vld [vmem:[%s10528_s5 + $0x360] sm:$0xff]  ;;  %v5498_v53 = vld [vmem:[%s10528_s5 + $0x370] sm:$0xff]  ;;  %v5499_v57 = vld [vmem:[%s10528_s5 + $0x378] sm:$0xff] }
 0x15b   :  { %1188 = vst.msk [vmem:[#allocation2 + $0x11] ss:$8 sm:$0x3] %vm8238_vm4, %v1186_v42  ;;  %v1218_v42 = vld [vmem:[%s10528_s5 + $0x80] sm:$0xff]  ;;  %v6862_v3 = vpack.c.bf16 %v5499_v57, %v5498_v53  ;;  %v5501_v8 = vld [vmem:[%s10528_s5 + $0x388] sm:$0xff]  ;;  %v5560_v10 = vld [vmem:[%s10528_s5 + $0x410] sm:$0xff] }
 0x15c   :  { %v5561_v11 = vld [vmem:[%s10528_s5 + $0x418] sm:$0xff]  ;;  %v5502_v17 = vld [vmem:[%s10528_s5 + $0x390] sm:$0xff]  ;;  %v5562_v19 = vld [vmem:[%s10528_s5 + $0x420] sm:$0xff] }
 0x15d   :  { %v1195_v16 = vld [vmem:[#allocation2 + $0x8] sm:$0xfe]  ;;  %v1194_v43 = vld [vmem:[#allocation2] sm:$0xfe]  ;;  %v6946_v15 = vpack.c.bf16 %v5561_v11, %v5560_v10  ;;  %v5503_v18 = vld [vmem:[%s10528_s5 + $0x398] sm:$0xff] }
 0x15e   :  { %v1247_v48 = vrot.slane %v1195_v16, 1  ;;  %v1244_v51 = vrot.slane %v1194_v43, 1  ;;  %v8426_v5 = vld [vmem:[#allocation2 + $0x8] sm:$0xff]  ;;  %v5532_v43 = vld [vmem:[%s10528_s5 + $0x110] sm:$0xff]  ;;  %v8541_v59 = vld [vmem:[#allocation2] sm:$0xff] }
 0x15f   :  { %v1219_v16 = vld [vmem:[%s10528_s5 + $0x88] sm:$0xff]  ;;  %v6937_v45 = vpack.c.bf16 %v5533_v44, %v5532_v43  ;;  %v8548_v62 = vld [vmem:[#allocation2 + $0x18] sm:$0x1]  ;;  %v8562_v9 = vld [vmem:[#allocation2 + $0x10] sm:$0x1] }
 0x160   :  { %v6856_v30 = vpack.c.bf16 %v1219_v16, %v1218_v42  ;;  %v5504_v24 = vld [vmem:[%s10528_s5 + $0x3a0] sm:$0xff]  ;;  %v5505_v25 = vld [vmem:[%s10528_s5 + $0x3a8] sm:$0xff]  ;;  %v5564_v26 = vld [vmem:[%s10528_s5 + $0x430] sm:$0xff] }
 0x161   :  { %v5506_v32 = vld [vmem:[%s10528_s5 + $0x3b0] sm:$0xff]  ;;  %v5507_v33 = vld [vmem:[%s10528_s5 + $0x3b8] sm:$0xff]  ;;  %v5566_v34 = vld [vmem:[%s10528_s5 + $0x440] sm:$0xff] }
 0x162   :  { %v1197_v47 = vld [vmem:[#allocation2 + $0x18] sm:$0x3]  ;;  %v1196_v14 = vld [vmem:[#allocation2 + $0x10] sm:$0x3]  ;;  %v5508_v37 = vld [vmem:[%s10528_s5 + $0x3c0] sm:$0xff] }
 0x163   :  { %v8376_v49 = vrot.slane %v1197_v47, 1  ;;  %v8378_v27 = vrot.slane %v1196_v14, 1  ;;  %v5497_v47 = vld [vmem:[%s10528_s5 + $0x368] sm:$0xff]  ;;  %v5556_v14 = vld [vmem:[%s10528_s5 + $0x3f0] sm:$0xff]  ;;  %v5511_v43 = vld [vmem:[%s10528_s5 + $0x3d8] sm:$0xff] }
 0x164   :  { %v5509_v38 = vld [vmem:[%s10528_s5 + $0x3c8] sm:$0xff]  ;;  %v5568_v39 = vld [vmem:[%s10528_s5 + $0x450] sm:$0xff]  ;;  %v5570_v44 = vld [vmem:[%s10528_s5 + $0x460] sm:$0xff] }
 0x165   :  { %v8385_v54 = vsel %vm1243_vm7, %v1247_v48, %v8376_v49  ;;  %v8389_v56 = vsel %vm1243_vm7, %v1244_v51, %v8378_v27  ;;  %v5557_v48 = vld [vmem:[%s10528_s5 + $0x3f8] sm:$0xff]  ;;  %v6859_v51 = vpack.c.bf16 %v5497_v47, %v5496_v46  ;;  %v5510_v16 = vld [vmem:[%s10528_s5 + $0x3d0] sm:$0xff]  ;;  %v5512_v47 = vld [vmem:[%s10528_s5 + $0x3e0] sm:$0xff] }
 0x166   :  { %5492 = vmatprep.mubr.msk.f32.mxu1 %vm1056_vm5, %v8385_v54  ;;  %5552 = vmatprep.mubr.msk.f32.mxu0 %vm1056_vm5, %v8385_v54  ;;  %v1198_v57 = vld [vmem:[#allocation2] sm:$0xfc]  ;;  %v5598_v11 = vld [vmem:[%s10528_s5 + $0x2f0] sm:$0xff] }
 0x167   :  { %1321 = vmatmul.mubr.f32.vlgmr.msra.gmra.mrb[6].mxu1 %v8389_v56  ;;  %1628 = vmatmul.mubr.f32.vlgmr.msra.gmra.mrb[12].mxu0 %v8389_v56 }
 0x168   :  { %6833 = vmatpush1.bf16.msra.mxu1 %v6832_v40  ;;  %6914 = vmatpush1.bf16.msra.mxu0 %v6913_v52  ;;  %v1201_v40 = vld [vmem:[#allocation2 + $0x18] sm:$0x7]  ;;  %v6940_v52 = vpack.c.bf16 %v5557_v48, %v5556_v14  ;;  %v5513_v14 = vld [vmem:[%s10528_s5 + $0x3e8] sm:$0xff]  ;;  %v5572_v48 = vld [vmem:[%s10528_s5 + $0x470] sm:$0xff] }
 0x169   :  { %5493 = vmatprep.mubr.msk.f32.mxu1 %vm1056_vm5, %v8376_v49  ;;  %5553 = vmatprep.mubr.msk.f32.mxu0 %vm1056_vm5, %v8376_v49  ;;  %v8550_v2 = vrot.slane %v1201_v40, 2  ;;  %v1200_v40 = vld [vmem:[#allocation2 + $0x10] sm:$0x7] }
 0x16a   :  { %6834 = vmatprep.subr.bf16.mxu1 %v7917_v55  ;;  %6915 = vmatprep.subr.bf16.mxu0 %v7917_v55 }
 0x16b   :  { %1326 = vmatmul.mubr.f32.gmra.mrb[8].mxu1 %v8378_v27  ;;  %1633 = vmatmul.mubr.f32.gmra.mrb[14].mxu0 %v8378_v27 }
 0x16c   :  { %6836 = vmatpush1.bf16.msra.mxu1 %v6835_v60  ;;  %6917 = vmatpush1.bf16.msra.mxu0 %v6916_v61  ;;  %v1199_v60 = vld [vmem:[#allocation2 + $0x8] sm:$0xfc] }
 0x16d   :  { %5494 = vmatprep.mubr.msk.f32.mxu1 %vm1056_vm5, %v8426_v5  ;;  %5554 = vmatprep.mubr.msk.f32.mxu0 %vm1056_vm5, %v8426_v5  ;;  %v5559_v61 = vld [vmem:[%s10528_s5 + $0x408] sm:$0xff]  ;;  %v1439_v4 = vrot.slane %v1199_v60, 2  ;;  %v5594_v60 = vld [vmem:[%s10528_s5 + $0x2d0] sm:$0xff] }
 0x16e   :  { %6837 = vmatprep.subr.bf16.mxu1 %v7917_v55  ;;  %6918 = vmatprep.subr.bf16.mxu0 %v7917_v55 }
 0x170   :  { %6839 = vmatpush1.bf16.msra.mxu1 %v6838_v6  ;;  %6920 = vmatpush1.bf16.msra.mxu0 %v6919_v7  ;;  %v6943_v6 = vpack.c.bf16 %v5559_v61, %v5558_v58  ;;  %v5500_v7 = vld [vmem:[%s10528_s5 + $0x380] sm:$0xff]  ;;  %v8668_v58 = vrot.slane %v1200_v40, 2  ;;  %v5595_v61 = vld [vmem:[%s10528_s5 + $0x2d8] sm:$0xff]  ;;  %v5590_v40 = vld [vmem:[%s10528_s5 + $0x190] sm:$0xff] }
 0x171   :  { %6840 = vmatprep.subr.bf16.mxu1 %v7917_v55  ;;  %6921 = vmatprep.subr.bf16.mxu0 %v7917_v55 }
 0x174   :  { %6842 = vmatpush1.bf16.msra.mxu1 %v6841_v12  ;;  %6923 = vmatpush1.bf16.msra.mxu0 %v6922_v13  ;;  %v8576_v12 = vsel %vm1435_vm8, %v1439_v4, %v8550_v2  ;;  %v6865_v13 = vpack.c.bf16 %v5501_v8, %v5500_v7  ;;  %v6967_v4 = vpack.c.bf16 %v5595_v61, %v5594_v60  ;;  %v5596_v7 = vld [vmem:[%s10528_s5 + $0x2e0] sm:$0xff]  ;;  %v5597_v8 = vld [vmem:[%s10528_s5 + $0x2e8] sm:$0xff] }
 0x175   :  { %6843 = vmatprep.subr.bf16.mxu1 %v7917_v55  ;;  %6924 = vmatprep.subr.bf16.mxu0 %v7917_v55  ;;  %v6970_v10 = vpack.c.bf16 %v5597_v8, %v5596_v7  ;;  %v5593_v60 = vld [vmem:[%s10528_s5 + $0x1a8] sm:$0xff]  ;;  %v5618_v8 = vld [vmem:[%s10528_s5 + $0x490] sm:$0xff] }
 0x178   :  { %6845 = vmatpush1.bf16.msra.mxu1 %v6844_v20  ;;  %6926 = vmatpush1.bf16.msra.mxu0 %v6925_v21  ;;  %v5563_v20 = vld [vmem:[%s10528_s5 + $0x428] sm:$0xff]  ;;  %v6868_v21 = vpack.c.bf16 %v5503_v18, %v5502_v17  ;;  %v5600_v17 = vld [vmem:[%s10528_s5 + $0x300] sm:$0xff] }
 0x179   :  { %6846 = vmatprep.subr.bf16.mxu1 %v7917_v55  ;;  %6927 = vmatprep.subr.bf16.mxu0 %v7917_v55  ;;  %v6949_v23 = vpack.c.bf16 %v5563_v20, %v5562_v19  ;;  %v5601_v18 = vld [vmem:[%s10528_s5 + $0x308] sm:$0xff]  ;;  %v5603_v20 = vld [vmem:[%s10528_s5 + $0x318] sm:$0xff] }
 0x17a   :  { %v6976_v19 = vpack.c.bf16 %v5601_v18, %v5600_v17  ;;  %v5623_v17 = vld [vmem:[%s10528_s5 + $0x4b8] sm:$0xff] }
 0x17c   :  { %6848 = vmatpush1.bf16.msra.mxu1 %v6847_v28  ;;  %6929 = vmatpush1.bf16.msra.mxu0 %v6928_v29  ;;  %v5565_v28 = vld [vmem:[%s10528_s5 + $0x438] sm:$0xff]  ;;  %v6871_v29 = vpack.c.bf16 %v5505_v25, %v5504_v24  ;;  %v5605_v24 = vld [vmem:[%s10528_s5 + $0x328] sm:$0xff] }
 0x17d   :  { %6849 = vmatprep.subr.bf16.mxu1 %v7917_v55  ;;  %6930 = vmatprep.subr.bf16.mxu0 %v7917_v55  ;;  %v6952_v31 = vpack.c.bf16 %v5565_v28, %v5564_v26  ;;  %v5606_v26 = vld [vmem:[%s10528_s5 + $0x330] sm:$0xff]  ;;  %v5607_v28 = vld [vmem:[%s10528_s5 + $0x338] sm:$0xff] }
 0x180   :  { %6851 = vmatpush1.bf16.msra.mxu1 %v6850_v35  ;;  %6932 = vmatpush1.bf16.msra.mxu0 %v6931_v36  ;;  %v5567_v35 = vld [vmem:[%s10528_s5 + $0x448] sm:$0xff]  ;;  %v6874_v36 = vpack.c.bf16 %v5507_v33, %v5506_v32 }
 0x181   :  { %6852 = vmatprep.subr.bf16.mxu1 %v7917_v55  ;;  %6933 = vmatprep.subr.bf16.mxu0 %v7917_v55  ;;  %v6955_v50 = vpack.c.bf16 %v5567_v35, %v5566_v34  ;;  %v5609_v32 = vld [vmem:[%s10528_s5 + $0x348] sm:$0xff]  ;;  %v5610_v34 = vld [vmem:[%s10528_s5 + $0x350] sm:$0xff]  ;;  %v5611_v35 = vld [vmem:[%s10528_s5 + $0x358] sm:$0xff] }
 0x184   :  { %6854 = vmatpush1.bf16.msra.mxu1 %v6853_v41  ;;  %6935 = vmatpush1.bf16.msra.mxu0 %v6934_v63  ;;  %v5569_v41 = vld [vmem:[%s10528_s5 + $0x458] sm:$0xff]  ;;  %v6877_v63 = vpack.c.bf16 %v5509_v38, %v5508_v37  ;;  %v5577_v37 = vld [vmem:[%s10528_s5 + $0x128] sm:$0xff] }
 0x185   :  { %6855 = vmatprep.subr.bf16.mxu1 %v7917_v55  ;;  %6936 = vmatprep.subr.bf16.mxu0 %v7917_v55  ;;  %v6958_v42 = vpack.c.bf16 %v5569_v41, %v5568_v39  ;;  %v5578_v39 = vld [vmem:[%s10528_s5 + $0x130] sm:$0xff]  ;;  %v5579_v41 = vld [vmem:[%s10528_s5 + $0x138] sm:$0xff] }
 0x188   :  { %6857 = vmatpush1.bf16.msra.mxu1 %v6856_v30  ;;  %6938 = vmatpush1.bf16.msra.mxu0 %v6937_v45  ;;  %v5571_v30 = vld [vmem:[%s10528_s5 + $0x468] sm:$0xff]  ;;  %v6880_v45 = vpack.c.bf16 %v5511_v43, %v5510_v16  ;;  %v5583_v43 = vld [vmem:[%s10528_s5 + $0x158] sm:$0xff] }
 0x189   :  { %6858 = vmatprep.subr.bf16.mxu1 %v7917_v55  ;;  %6939 = vmatprep.subr.bf16.mxu0 %v7917_v55  ;;  %v6961_v46 = vpack.c.bf16 %v5571_v30, %v5570_v44  ;;  %v5581_v16 = vld [vmem:[%s10528_s5 + $0x148] sm:$0xff] }
 0x18b   :  { %1402 = vmatmul.mubr.f32.vlgmr.msra.gmra.mrb[6].mxu1 %v8541_v59  ;;  %1703 = vmatmul.mubr.f32.vlgmr.msra.gmra.mrb[12].mxu0 %v8541_v59 }
 0x18c   :  { %5495 = vmatprep.mubr.msk.f32.mxu1 %vm1056_vm5, %v8548_v62  ;;  %6860 = vmatpush1.bf16.msra.mxu1 %v6859_v51  ;;  %v5573_v51 = vld [vmem:[%s10528_s5 + $0x478] sm:$0xff] }
 0x18d   :  { %5555 = vmatprep.mubr.msk.f32.mxu0 %vm1056_vm5, %v8548_v62  ;;  %6941 = vmatpush1.bf16.msra.mxu0 %v6940_v52  ;;  %v6883_v52 = vpack.c.bf16 %v5513_v14, %v5512_v47  ;;  %v6964_v53 = vpack.c.bf16 %v5573_v51, %v5572_v48  ;;  %v5588_v14 = vld [vmem:[%s10528_s5 + $0x180] sm:$0xff]  ;;  %v5589_v48 = vld [vmem:[%s10528_s5 + $0x188] sm:$0xff] }
 0x18e   :  { %6861 = vmatprep.subr.bf16.mxu1 %v7917_v55  ;;  %6942 = vmatprep.subr.bf16.mxu0 %v7917_v55  ;;  %v7012_v51 = vpack.c.bf16 %v5589_v48, %v5588_v14  ;;  %v5644_v14 = vld [vmem:[%s10530_s7 + $0x140] sm:$0xff]  ;;  %v5645_v48 = vld [vmem:[%s10530_s7 + $0x148] sm:$0xff] }
 0x18f   :  { %1407 = vmatmul.mubr.f32.gmra.mrb[8].mxu1 %v8562_v9  ;;  %1708 = vmatmul.mubr.f32.gmra.mrb[14].mxu0 %v8562_v9 }
 0x190   :  { %6863 = vmatpush1.bf16.msra.mxu1 %v6862_v3  ;;  %5514 = vmatprep.mubr.msk.f32.mxu1 %vm1056_vm5, %v8576_v12  ;;  %v1436_v3 = vrot.slane %v1198_v57, 2  ;;  %v5592_v57 = vld [vmem:[%s10528_s5 + $0x1a0] sm:$0xff] }
 0x191   :  { %6944 = vmatpush1.bf16.msra.mxu0 %v6943_v6  ;;  %5574 = vmatprep.mubr.msk.f32.mxu0 %vm1056_vm5, %v8576_v12  ;;  %v7018_v61 = vpack.c.bf16 %v5593_v60, %v5592_v57  ;;  %v5646_v57 = vld [vmem:[%s10530_s7 + $0x150] sm:$0xff]  ;;  %v5647_v60 = vld [vmem:[%s10530_s7 + $0x158] sm:$0xff] }
 0x192   :  { %6864 = vmatprep.subr.bf16.mxu1 %v7917_v55  ;;  %6945 = vmatprep.subr.bf16.mxu0 %v7917_v55  ;;  %v8679_v6 = vsel %vm1435_vm8, %v1436_v3, %v8668_v58  ;;  %v5616_v3 = vld [vmem:[%s10528_s5 + $0x480] sm:$0xff] }
 0x194   :  { %6866 = vmatpush1.bf16.msra.mxu1 %v6865_v13  ;;  %v5599_v13 = vld [vmem:[%s10528_s5 + $0x2f8] sm:$0xff] }
 0x195   :  { %6947 = vmatpush1.bf16.msra.mxu0 %v6946_v15  ;;  %6867 = vmatprep.subr.bf16.mxu1 %v7917_v55  ;;  %v6973_v15 = vpack.c.bf16 %v5599_v13, %v5598_v11  ;;  %v5620_v13 = vld [vmem:[%s10528_s5 + $0x4a0] sm:$0xff] }
 0x196   :  { %6948 = vmatprep.subr.bf16.mxu0 %v7917_v55 }
 0x198   :  { %6869 = vmatpush1.bf16.msra.mxu1 %v6868_v21 }
 0x199   :  { %6950 = vmatpush1.bf16.msra.mxu0 %v6949_v23  ;;  %6870 = vmatprep.subr.bf16.mxu1 %v7917_v55  ;;  %v5604_v23 = vld [vmem:[%s10528_s5 + $0x320] sm:$0xff] }
 0x19a   :  { %6951 = vmatprep.subr.bf16.mxu0 %v7917_v55  ;;  %v6982_v25 = vpack.c.bf16 %v5605_v24, %v5604_v23  ;;  %v5637_v23 = vld [vmem:[%s10530_s7 + $0x108] sm:$0xff] }
 0x19c   :  { %6872 = vmatpush1.bf16.msra.mxu1 %v6871_v29  ;;  %v6985_v29 = vpack.c.bf16 %v5607_v28, %v5606_v26  ;;  %v5638_v26 = vld [vmem:[%s10530_s7 + $0x110] sm:$0xff]  ;;  %v5639_v28 = vld [vmem:[%s10530_s7 + $0x118] sm:$0xff] }
 0x19d   :  { %6953 = vmatpush1.bf16.msra.mxu0 %v6952_v31  ;;  %6873 = vmatprep.subr.bf16.mxu1 %v7917_v55  ;;  %v5608_v31 = vld [vmem:[%s10528_s5 + $0x340] sm:$0xff] }
 0x19e   :  { %6954 = vmatprep.subr.bf16.mxu0 %v7917_v55  ;;  %v6988_v33 = vpack.c.bf16 %v5609_v32, %v5608_v31  ;;  %v5629_v31 = vld [vmem:[%s10528_s5 + $0x4e8] sm:$0xff]  ;;  %v7051_v32 = vpack.c.bf16 %v5639_v28, %v5638_v26 }
 0x1a0   :  { %6875 = vmatpush1.bf16.msra.mxu1 %v6874_v36  ;;  %v6991_v36 = vpack.c.bf16 %v5611_v35, %v5610_v34  ;;  %v5630_v34 = vld [vmem:[%s10528_s5 + $0x4f0] sm:$0xff]  ;;  %v5631_v35 = vld [vmem:[%s10528_s5 + $0x4f8] sm:$0xff] }
 0x1a1   :  { %6956 = vmatpush1.bf16.msra.mxu0 %v6955_v50  ;;  %6876 = vmatprep.subr.bf16.mxu1 %v7917_v55  ;;  %v5576_v50 = vld [vmem:[%s10528_s5 + $0x120] sm:$0xff] }
 0x1a2   :  { %6957 = vmatprep.subr.bf16.mxu0 %v7917_v55  ;;  %v6994_v38 = vpack.c.bf16 %v5577_v37, %v5576_v50  ;;  %v5632_v50 = vld [vmem:[%s10528_s5 + $0x500] sm:$0xff]  ;;  %v5633_v37 = vld [vmem:[%s10528_s5 + $0x508] sm:$0xff] }
 0x1a4   :  { %6878 = vmatpush1.bf16.msra.mxu1 %v6877_v63  ;;  %v6997_v63 = vpack.c.bf16 %v5579_v41, %v5578_v39  ;;  %v5668_v39 = vld [vmem:[%s10530_s7 + $0x80] sm:$0xff]  ;;  %v5669_v41 = vld [vmem:[%s10530_s7 + $0x88] sm:$0xff] }
 0x1a5   :  { %6959 = vmatpush1.bf16.msra.mxu0 %v6958_v42  ;;  %6879 = vmatprep.subr.bf16.mxu1 %v7917_v55  ;;  %v5580_v42 = vld [vmem:[%s10528_s5 + $0x140] sm:$0xff] }
 0x1a6   :  { %6960 = vmatprep.subr.bf16.mxu0 %v7917_v55 }
 0x1a8   :  { %6881 = vmatpush1.bf16.msra.mxu1 %v6880_v45  ;;  %v5586_v45 = vld [vmem:[%s10528_s5 + $0x170] sm:$0xff] }
 0x1a9   :  { %6962 = vmatpush1.bf16.msra.mxu0 %v6961_v46  ;;  %6882 = vmatprep.subr.bf16.mxu1 %v7917_v55  ;;  %v5587_v46 = vld [vmem:[%s10528_s5 + $0x178] sm:$0xff] }
 0x1aa   :  { %6963 = vmatprep.subr.bf16.mxu0 %v7917_v55  ;;  %v7009_v47 = vpack.c.bf16 %v5587_v46, %v5586_v45  ;;  %v5675_v46 = vld [vmem:[%s10530_s7 + $0xb8] sm:$0xff] }
 0x1ac   :  { %6884 = vmatpush1.bf16.msra.mxu1 %v6883_v52  ;;  %v5591_v52 = vld [vmem:[%s10528_s5 + $0x198] sm:$0xff] }
 0x1ad   :  { %6965 = vmatpush1.bf16.msra.mxu0 %v6964_v53  ;;  %6966 = vmatprep.subr.bf16.mxu1 %v7917_v55  ;;  %v7015_v53 = vpack.c.bf16 %v5591_v52, %v5590_v40  ;;  %v7060_v40 = vpack.c.bf16 %v5645_v48, %v5644_v14  ;;  %v5677_v52 = vld [vmem:[%s10530_s7 + $0xc8] sm:$0xff] }
 0x1ae   :  { %7047 = vmatprep.subr.bf16.mxu0 %v7917_v55 }
 0x1af   :  { %1513 = vmatmul.mubr.f32.vlgmr.msra.gmra.mrb[6].mxu1 %v8679_v6 }
 0x1b0   :  { %1797 = vmatmul.mubr.f32.vlgmr.msra.gmra.mrb[12].mxu0 %v8679_v6  ;;  %5515 = vmatprep.mubr.msk.f32.mxu1 %vm1056_vm5, %v8550_v2 }
 0x1b1   :  { %5575 = vmatprep.mubr.msk.f32.mxu0 %vm1056_vm5, %v8550_v2  ;;  %6968 = vmatpush1.bf16.msra.mxu1 %v6967_v4  ;;  %v5617_v4 = vld [vmem:[%s10528_s5 + $0x488] sm:$0xff] }
 0x1b2   :  { %6969 = vmatprep.subr.bf16.mxu1 %v7917_v55  ;;  %v7021_v7 = vpack.c.bf16 %v5617_v4, %v5616_v3  ;;  %v7063_v3 = vpack.c.bf16 %v5647_v60, %v5646_v57  ;;  %v5679_v4 = vld [vmem:[%s10530_s7 + $0xd8] sm:$0xff] }
 0x1b3   :  { %1518 = vmatmul.mubr.f32.gmra.mrb[8].mxu1 %v8668_v58 }
 0x1b4   :  { %1802 = vmatmul.mubr.f32.gmra.mrb[14].mxu0 %v8668_v58  ;;  %5612 = vmatprep.mubr.msk.f32.mxu1 %vm1056_vm5, %v8385_v54  ;;  %v5602_v54 = vld [vmem:[%s10528_s5 + $0x310] sm:$0xff] }
 0x1b5   :  { %6971 = vmatpush1.bf16.msra.mxu1 %v6970_v10  ;;  %v6979_v21 = vpack.c.bf16 %v5603_v20, %v5602_v54  ;;  %v5619_v10 = vld [vmem:[%s10528_s5 + $0x498] sm:$0xff]  ;;  %v5626_v54 = vld [vmem:[%s10528_s5 + $0x4d0] sm:$0xff]  ;;  %6264 = vmatprep.mubr.msk.f32.mxu0 %vm7918_vm9, %v7915_v0 }
 0x1b6   :  { %6972 = vmatprep.subr.bf16.mxu1 %v7917_v55  ;;  %v7024_v11 = vpack.c.bf16 %v5619_v10, %v5618_v8  ;;  %v5627_v20 = vld [vmem:[%s10528_s5 + $0x4d8] sm:$0xff]  ;;  %v5648_v10 = vld [vmem:[%s10530_s7 + $0x160] sm:$0xff] }
 0x1b7   :  { %v7036_v24 = vpack.c.bf16 %v5627_v20, %v5626_v54  ;;  %v5651_v54 = vld [vmem:[%s10530_s7 + $0x178] sm:$0xff]  ;;  %v5682_v20 = vld [vmem:[%s10530_s7 + $0xf0] sm:$0xff] }
 0x1b9   :  { %6974 = vmatpush1.bf16.msra.mxu1 %v6973_v15  ;;  %v5621_v15 = vld [vmem:[%s10528_s5 + $0x4a8] sm:$0xff] }
 0x1ba   :  { %6975 = vmatprep.subr.bf16.mxu1 %v7917_v55 }
 0x1bd   :  { %6977 = vmatpush1.bf16.msra.mxu1 %v6976_v19 }
 0x1be   :  { %6978 = vmatprep.subr.bf16.mxu1 %v7917_v55 }
 0x1c1   :  { %6980 = vmatpush1.bf16.msra.mxu1 %v6979_v21  ;;  %v5636_v21 = vld [vmem:[%s10530_s7 + $0x100] sm:$0xff] }
 0x1c2   :  { %6981 = vmatprep.subr.bf16.mxu1 %v7917_v55 }
 0x1c5   :  { %6983 = vmatpush1.bf16.msra.mxu1 %v6982_v25  ;;  %v7048_v25 = vpack.c.bf16 %v5637_v23, %v5636_v21  ;;  %v5683_v23 = vld [vmem:[%s10530_s7 + $0xf8] sm:$0xff] }
 0x1c6   :  { %6984 = vmatprep.subr.bf16.mxu1 %v7917_v55 }
 0x1c7   :  { %7049 = vmatpush3.bf16.msra.mxu0 %v7048_v25  ;;  %v7165_v25 = vpack.c.bf16 %v5683_v23, %v5682_v20  ;;  %v2139_v20 = vld [vmem:[%s10530_s7 + $0x20] sm:$0xff] }
 0x1c8   :  { %7050 = vmatprep.subr.bf16.mxu0 %v7917_v55 }
 0x1c9   :  { %6986 = vmatpush1.bf16.msra.mxu1 %v6985_v29  ;;  %v5628_v29 = vld [vmem:[%s10528_s5 + $0x4e0] sm:$0xff] }
 0x1ca   :  { %6987 = vmatprep.subr.bf16.mxu1 %v7917_v55 }
 0x1cb   :  { %7052 = vmatpush3.bf16.msra.mxu0 %v7051_v32 }
 0x1cc   :  { %7053 = vmatprep.subr.bf16.mxu0 %v7917_v55 }
 0x1cd   :  { %6989 = vmatpush1.bf16.msra.mxu1 %v6988_v33  ;;  %v7039_v33 = vpack.c.bf16 %v5629_v31, %v5628_v29 }
 0x1ce   :  { %6990 = vmatprep.subr.bf16.mxu1 %v7917_v55 }
 0x1d1   :  { %6992 = vmatpush1.bf16.msra.mxu1 %v6991_v36  ;;  %v7042_v36 = vpack.c.bf16 %v5631_v35, %v5630_v34 }
 0x1d2   :  { %6993 = vmatprep.subr.bf16.mxu1 %v7917_v55 }
 0x1d4   :  { %1914 = vmatmul.mubr.f32.vlgmr.msra.gmra.mrb[10].mxu1 %v8389_v56  ;;  %v7000_v56 = vpack.c.bf16 %v5581_v16, %v5580_v42  ;;  %v5670_v42 = vld [vmem:[%s10530_s7 + $0x90] sm:$0xff]  ;;  %v5671_v16 = vld [vmem:[%s10530_s7 + $0x98] sm:$0xff] }
 0x1d5   :  { %5613 = vmatprep.mubr.msk.f32.mxu1 %vm1056_vm5, %v8376_v49  ;;  %6995 = vmatpush1.bf16.msra.mxu1 %v6994_v38  ;;  %v5582_v49 = vld [vmem:[%s10528_s5 + $0x150] sm:$0xff]  ;;  %v7045_v38 = vpack.c.bf16 %v5633_v37, %v5632_v50 }
 0x1d6   :  { %6996 = vmatprep.subr.bf16.mxu1 %v7917_v55  ;;  %v7003_v44 = vpack.c.bf16 %v5583_v43, %v5582_v49  ;;  %v5640_v49 = vld [vmem:[%s10530_s7 + $0x120] sm:$0xff] }
 0x1d8   :  { %1919 = vmatmul.mubr.f32.gmra.mrb[12].mxu1 %v8378_v27  ;;  %v5584_v27 = vld [vmem:[%s10528_s5 + $0x160] sm:$0xff] }
 0x1d9   :  { %6998 = vmatpush1.bf16.msra.mxu1 %v6997_v63  ;;  %5614 = vmatprep.mubr.msk.f32.mxu1 %vm1056_vm5, %v8426_v5  ;;  %v5585_v5 = vld [vmem:[%s10528_s5 + $0x168] sm:$0xff]  ;;  %v7144_v63 = vpack.c.bf16 %v5669_v41, %v5668_v39  ;;  %v2099_v39 = vld [vmem:[%s10529_s6] sm:$0x1] }
 0x1da   :  { %6999 = vmatprep.subr.bf16.mxu1 %v7917_v55  ;;  %v7006_v30 = vpack.c.bf16 %v5585_v5, %v5584_v27  ;;  %v5642_v27 = vld [vmem:[%s10530_s7 + $0x130] sm:$0xff]  ;;  %v5643_v5 = vld [vmem:[%s10530_s7 + $0x138] sm:$0xff] }
 0x1db   :  { %v7057_v45 = vpack.c.bf16 %v5643_v5, %v5642_v27 }
 0x1dd   :  { %7001 = vmatpush1.bf16.msra.mxu1 %v7000_v56  ;;  %v7147_v56 = vpack.c.bf16 %v5671_v16, %v5670_v42 }
 0x1de   :  { %7002 = vmatprep.subr.bf16.mxu1 %v7917_v55 }
 0x1e1   :  { %7004 = vmatpush1.bf16.msra.mxu1 %v7003_v44 }
 0x1e2   :  { %7005 = vmatprep.subr.bf16.mxu1 %v7917_v55 }
 0x1e5   :  { %7007 = vmatpush1.bf16.msra.mxu1 %v7006_v30  ;;  %v5674_v30 = vld [vmem:[%s10530_s7 + $0xb0] sm:$0xff] }
 0x1e6   :  { %7008 = vmatprep.subr.bf16.mxu1 %v7917_v55 }
 0x1e9   :  { %7010 = vmatpush1.bf16.msra.mxu1 %v7009_v47  ;;  %v7153_v47 = vpack.c.bf16 %v5675_v46, %v5674_v30 }
 0x1ea   :  { %7011 = vmatprep.subr.bf16.mxu1 %v7917_v55 }
 0x1ed   :  { %7013 = vmatpush1.bf16.msra.mxu1 %v7012_v51  ;;  %v5676_v51 = vld [vmem:[%s10530_s7 + $0xc0] sm:$0xff] }
 0x1ee   :  { %7014 = vmatprep.subr.bf16.mxu1 %v7917_v55 }
 0x1f1   :  { %7016 = vmatpush1.bf16.msra.mxu1 %v7015_v53  ;;  %v7156_v53 = vpack.c.bf16 %v5677_v52, %v5676_v51 }
 0x1f2   :  { %7017 = vmatprep.subr.bf16.mxu1 %v7917_v55 }
 0x1f5   :  { %7019 = vmatpush1.bf16.msra.mxu1 %v7018_v61  ;;  %v5678_v61 = vld [vmem:[%s10530_s7 + $0xd0] sm:$0xff] }
 0x1f6   :  { %7020 = vmatprep.subr.bf16.mxu1 %v7917_v55 }
 0x1f8   :  { %1989 = vmatmul.mubr.f32.vlgmr.msra.gmra.mrb[10].mxu1 %v8541_v59  ;;  %v7027_v59 = vpack.c.bf16 %v5621_v15, %v5620_v13  ;;  %v5680_v13 = vld [vmem:[%s10530_s7 + $0xe0] sm:$0xff] }
 0x1f9   :  { %5615 = vmatprep.mubr.msk.f32.mxu1 %vm1056_vm5, %v8548_v62  ;;  %7022 = vmatpush1.bf16.msra.mxu1 %v7021_v7  ;;  %v5622_v62 = vld [vmem:[%s10528_s5 + $0x4b0] sm:$0xff]  ;;  %v7159_v7 = vpack.c.bf16 %v5679_v4, %v5678_v61  ;;  %v5701_v4 = vld [vmem:[%s10530_s7 + $0x288] sm:$0xff] }
 0x1fa   :  { %7023 = vmatprep.subr.bf16.mxu1 %v7917_v55  ;;  %v7030_v18 = vpack.c.bf16 %v5623_v17, %v5622_v62  ;;  %v5681_v17 = vld [vmem:[%s10530_s7 + $0xe8] sm:$0xff] }
 0x1fc   :  { %1994 = vmatmul.mubr.f32.gmra.mrb[12].mxu1 %v8562_v9  ;;  %v5624_v9 = vld [vmem:[%s10528_s5 + $0x4c0] sm:$0xff] }
 0x1fd   :  { %7025 = vmatpush1.bf16.msra.mxu1 %v7024_v11  ;;  %5634 = vmatprep.mubr.msk.f32.mxu1 %vm1056_vm5, %v8576_v12  ;;  %v5625_v12 = vld [vmem:[%s10528_s5 + $0x4c8] sm:$0xff] }
 0x1fe   :  { %7026 = vmatprep.subr.bf16.mxu1 %v7917_v55  ;;  %v7033_v19 = vpack.c.bf16 %v5625_v12, %v5624_v9  ;;  %v5649_v11 = vld [vmem:[%s10530_s7 + $0x168] sm:$0xff]  ;;  %v7162_v12 = vpack.c.bf16 %v5681_v17, %v5680_v13  ;;  %v5702_v13 = vld [vmem:[%s10530_s7 + $0x290] sm:$0xff]  ;;  %v2138_v17 = vld [vmem:[%s10530_s7 + $0x18] sm:$0xff] }
 0x1ff   :  { %v7066_v62 = vpack.c.bf16 %v5649_v11, %v5648_v10 }
 0x201   :  { %7028 = vmatpush1.bf16.msra.mxu1 %v7027_v59 }
 0x202   :  { %7029 = vmatprep.subr.bf16.mxu1 %v7917_v55 }
 0x205   :  { %7031 = vmatpush1.bf16.msra.mxu1 %v7030_v18 }
 0x206   :  { %7032 = vmatprep.subr.bf16.mxu1 %v7917_v55 }
 0x209   :  { %7034 = vmatpush1.bf16.msra.mxu1 %v7033_v19  ;;  %v5650_v19 = vld [vmem:[%s10530_s7 + $0x170] sm:$0xff] }
 0x20a   :  { %7035 = vmatprep.subr.bf16.mxu1 %v7917_v55  ;;  %v7069_v21 = vpack.c.bf16 %v5651_v54, %v5650_v19  ;;  %v5704_v19 = vld [vmem:[%s10530_s7 + $0x2a0] sm:$0xff]  ;;  %v5705_v54 = vld [vmem:[%s10530_s7 + $0x2a8] sm:$0xff] }
 0x20b   :  { %v7174_v23 = vpack.c.bf16 %v5705_v54, %v5704_v19  ;;  %v5667_v19 = vld [vmem:[%s10530_s7 + $0x278] sm:$0xff] }
 0x20d   :  { %7037 = vmatpush1.bf16.msra.mxu1 %v7036_v24 }
 0x20e   :  { %7038 = vmatprep.subr.bf16.mxu1 %v7917_v55 }
 0x211   :  { %7040 = vmatpush1.bf16.msra.mxu1 %v7039_v33 }
 0x212   :  { %7041 = vmatprep.subr.bf16.mxu1 %v7917_v55 }
 0x215   :  { %7043 = vmatpush1.bf16.msra.mxu1 %v7042_v36 }
 0x216   :  { %7044 = vmatprep.subr.bf16.mxu1 %v7917_v55 }
 0x219   :  { %7046 = vmatpush1.bf16.msra.mxu1 %v7045_v38 }
 0x21a   :  { %7143 = vmatprep.subr.bf16.mxu1 %v7917_v55 }
 0x21c   :  { %2083 = vmatmul.mubr.f32.vlgmr.msra.gmra.mrb[10].mxu1 %v8679_v6  ;;  %v5641_v6 = vld [vmem:[%s10530_s7 + $0x128] sm:$0xff] }
 0x21d   :  { %5635 = vmatprep.mubr.msk.f32.mxu1 %vm1056_vm5, %v8550_v2  ;;  %7145 = vmatpush3.bf16.msra.mxu1 %v7144_v63  ;;  %v7054_v43 = vpack.c.bf16 %v5641_v6, %v5640_v49  ;;  %v5672_v2 = vld [vmem:[%s10530_s7 + $0xa0] sm:$0xff] }
 0x21e   :  { %7146 = vmatprep.subr.bf16.mxu1 %v7917_v55 }
 0x21f   :  { %7055 = vmatpush3.bf16.msra.mxu0 %v7054_v43 }
 0x220   :  { %2088 = vmatmul.mubr.f32.gmra.mrb[12].mxu1 %v8668_v58  ;;  %v5673_v58 = vld [vmem:[%s10530_s7 + $0xa8] sm:$0xff]  ;;  %7056 = vmatprep.subr.bf16.mxu0 %v7917_v55 }
 0x221   :  { %7148 = vmatpush3.bf16.msra.mxu1 %v7147_v56  ;;  %v7150_v44 = vpack.c.bf16 %v5673_v58, %v5672_v2  ;;  %6404 = vmatprep.mubr.msk.f32.mxu1 %vm7918_vm9, %v7915_v0 }
 0x222   :  { %7149 = vmatprep.subr.bf16.mxu1 %v7917_v55 }
 0x223   :  { %7058 = vmatpush3.bf16.msra.mxu0 %v7057_v45 }
 0x224   :  { %7059 = vmatprep.subr.bf16.mxu0 %v7917_v55 }
 0x225   :  { %7151 = vmatpush3.bf16.msra.mxu1 %v7150_v44 }
 0x226   :  { %7152 = vmatprep.subr.bf16.mxu1 %v7917_v55 }
 0x227   :  { %7061 = vmatpush3.bf16.msra.mxu0 %v7060_v40 }
 0x228   :  { %7062 = vmatprep.subr.bf16.mxu0 %v7917_v55 }
 0x229   :  { %7154 = vmatpush3.bf16.msra.mxu1 %v7153_v47 }
 0x22a   :  { %7155 = vmatprep.subr.bf16.mxu1 %v7917_v55 }
 0x22b   :  { %7064 = vmatpush3.bf16.msra.mxu0 %v7063_v3  ;;  %v5700_v3 = vld [vmem:[%s10530_s7 + $0x280] sm:$0xff] }
 0x22c   :  { %7065 = vmatprep.subr.bf16.mxu0 %v7917_v55  ;;  %v7168_v10 = vpack.c.bf16 %v5701_v4, %v5700_v3  ;;  %v5658_v3 = vld [vmem:[%s10530_s7 + $0x230] sm:$0xff]  ;;  %v5659_v4 = vld [vmem:[%s10530_s7 + $0x238] sm:$0xff] }
 0x22d   :  { %7157 = vmatpush3.bf16.msra.mxu1 %v7156_v53 }
 0x22e   :  { %7158 = vmatprep.subr.bf16.mxu1 %v7917_v55 }
 0x22f   :  { %7067 = vmatpush3.bf16.msra.mxu0 %v7066_v62  ;;  %v2137_v62 = vld [vmem:[%s10530_s7 + $0x10] sm:$0xff] }
 0x230   :  { %7068 = vmatprep.subr.bf16.mxu0 %v7917_v55 }
 0x231   :  { %7160 = vmatpush3.bf16.msra.mxu1 %v7159_v7  ;;  %v2135_v7 = vld [vmem:[%s10530_s7] sm:$0xff] }
 0x232   :  { %7161 = vmatprep.subr.bf16.mxu1 %v7917_v55 }
 0x233   :  { %7070 = vmatpush3.bf16.msra.mxu0 %v7069_v21  ;;  %v2140_v21 = vld [vmem:[%s10530_s7 + $0x28] sm:$0xff] }
 0x234   :  { %7071 = vmatprep.subr.bf16.mxu0 %v7917_v55 }
 0x235   :  { %7163 = vmatpush3.bf16.msra.mxu1 %v7162_v12  ;;  %v7075_v12 = vpack.c.bf16 %v2138_v17, %v2137_v62  ;;  %v5664_v62 = vld [vmem:[%s10530_s7 + $0x260] sm:$0xff]  ;;  %v5665_v17 = vld [vmem:[%s10530_s7 + $0x268] sm:$0xff] }
 0x236   :  { %7164 = vmatprep.subr.bf16.mxu1 %v7917_v55 }
 0x239   :  { %7166 = vmatpush3.bf16.msra.mxu1 %v7165_v25  ;;  %v5706_v25 = vld [vmem:[%s10530_s7 + $0x2b0] sm:$0xff] }
 0x23a   :  { %7167 = vmatprep.subr.bf16.mxu1 %v7917_v55 }
 0x282   :  { %v1514_v8 = vpop.f32.mrb[6].mxu1 }
 0x283   :  { %v1798_v15 = vpop.f32.mrb[12].mxu0  ;;  %v1516_v59 = vpop.f32.mrb[7].mxu1 }
 0x284   :  { %v1809_v18 = vmax.f32 %v1514_v8, %v1798_v15  ;;  %v1800_v9 = vpop.f32.mrb[13].mxu0  ;;  %v2136_v8 = vld [vmem:[%s10530_s7 + $0x8] sm:$0xff]  ;;  %v5703_v15 = vld [vmem:[%s10530_s7 + $0x298] sm:$0xff] }
 0x285   :  { %v7072_v11 = vpack.c.bf16 %v2136_v8, %v2135_v7  ;;  %v7171_v9 = vpack.c.bf16 %v5703_v15, %v5702_v13  ;;  %v7105_v7 = vpack.c.bf16 %v5659_v4, %v5658_v3  ;;  %v5660_v8 = vld [vmem:[%s10530_s7 + $0x240] sm:$0xff]  ;;  %v5662_v13 = vld [vmem:[%s10530_s7 + $0x250] sm:$0xff]  ;;  %v5663_v15 = vld [vmem:[%s10530_s7 + $0x258] sm:$0xff] }
 0x286   :  { %v1519_v24 = vpop.f32.mrb[8].mxu1  ;;  %v2685_v4 = vld [vmem:[#allocation8] sm:$0xff] }
 0x287   :  { %v1803_v26 = vpop.f32.mrb[14].mxu0  ;;  %v1521_v28 = vpop.f32.mrb[9].mxu1 }
 0x288   :  { %v1810_v29 = vmax.f32 %v1519_v24, %v1803_v26  ;;  %v1805_v31 = vpop.f32.mrb[15].mxu0  ;;  %v7078_v24 = vpack.c.bf16 %v2140_v21, %v2139_v20  ;;  %v5707_v26 = vld [vmem:[%s10530_s7 + $0x2b8] sm:$0xff]  ;;  %v2141_v28 = vld [vmem:[%s10530_s7 + $0x30] sm:$0xff]  ;;  %v5684_v20 = vld [vmem:[%s10530_s7 + $0x180] sm:$0xff] }
 0x289   :  { %v7177_v31 = vpack.c.bf16 %v5707_v26, %v5706_v25  ;;  %v5685_v21 = vld [vmem:[%s10530_s7 + $0x188] sm:$0xff]  ;;  %v5687_v25 = vld [vmem:[%s10530_s7 + $0x198] sm:$0xff] }
 0x2ef   :  { %v2084_v32 = vpop.f32.mrb[10].mxu1 }
 0x2f0   :  { %v2095_v33 = vmax.f32 %v1809_v18, %v2084_v32  ;;  %v2086_v34 = vpop.f32.mrb[11].mxu1 }
 0x2f1   :  { %v5709_v34 = vld [vmem:[%s10530_s7 + $0x2c8] sm:$0xff] }
 0x2f2   :  { %2097 = vst [vmem:[#allocation6] sm:$0xff] %v2095_v33  ;;  %v5708_v33 = vld [vmem:[%s10530_s7 + $0x2c0] sm:$0xff] }
 0x2f3   :  { %v2089_v35 = vpop.f32.mrb[12].mxu1 }
 0x2f4   :  { %v2096_v36 = vmax.f32 %v1810_v29, %v2089_v35  ;;  %v2091_v50 = vpop.f32.mrb[13].mxu1  ;;  %v2142_v29 = vld [vmem:[%s10530_s7 + $0x38] sm:$0xff]  ;;  %v2143_v35 = vld [vmem:[%s10530_s7 + $0x40] sm:$0xff] }
 0x2f5   :  { %v7081_v32 = vpack.c.bf16 %v2142_v29, %v2141_v28  ;;  %v7180_v50 = vpack.c.bf16 %v5709_v34, %v5708_v33  ;;  %v5688_v28 = vld [vmem:[%s10530_s7 + $0x1a0] sm:$0xff]  ;;  %v5689_v29 = vld [vmem:[%s10530_s7 + $0x1a8] sm:$0xff]  ;;  %v5691_v33 = vld [vmem:[%s10530_s7 + $0x1b8] sm:$0xff] }
 0x2f6   :  { %2098 = vst [vmem:[#allocation6 + $0x8] sm:$0x1] %v2096_v36  ;;  %v2144_v36 = vld [vmem:[%s10530_s7 + $0x48] sm:$0xff] }
 0x2f9   :  { %v2100_v37 = vld [vmem:[#allocation6] sm:$0x1]  ;;  %v2101_v38 = vld [vmem:[#allocation6 + $0x1] sm:$0x1]  ;;  %v2108_v63 = vld [vmem:[#allocation6 + $0x2] sm:$0x1] }
 0x2fa   :  { %v2102_v41 = vmax.f32 %v2100_v37, %v2101_v38  ;;  %v2109_v42 = vld [vmem:[#allocation6 + $0x3] sm:$0x1]  ;;  %v2103_v16 = vld [vmem:[#allocation6 + $0x2] sm:$0x1]  ;;  %v2116_v49 = vld [vmem:[#allocation6 + $0x4] sm:$0x1]  ;;  %v7084_v37 = vpack.c.bf16 %v2144_v36, %v2143_v35 }
 0x2fb   :  { %v2110_v56 = vmax.f32 %v2108_v63, %v2109_v42  ;;  %v2117_v6 = vld [vmem:[#allocation6 + $0x5] sm:$0x1]  ;;  %v2111_v2 = vld [vmem:[#allocation6 + $0x4] sm:$0x1]  ;;  %v2124_v44 = vld [vmem:[#allocation6 + $0x6] sm:$0x1] }
 0x2fc   :  { %v2104_v43 = vmax.f32 %v2102_v41, %v2103_v16  ;;  %v2118_v58 = vmax.f32 %v2116_v49, %v2117_v6  ;;  %v2125_v27 = vld [vmem:[#allocation6 + $0x7] sm:$0x1]  ;;  %v2119_v30 = vld [vmem:[#allocation6 + $0x6] sm:$0x1]  ;;  %v5710_v38 = vld [vmem:[%s10530_s7 + $0x2d0] sm:$0xff] }
 0x2fd   :  { %v2112_v5 = vmax.f32 %v2110_v56, %v2111_v2  ;;  %v2126_v45 = vmax.f32 %v2124_v44, %v2125_v27  ;;  %v2127_v46 = vld [vmem:[#allocation6 + $0x8] sm:$0x1]  ;;  %v2145_v41 = vld [vmem:[%s10530_s7 + $0x50] sm:$0xff]  ;;  %v2146_v63 = vld [vmem:[%s10530_s7 + $0x58] sm:$0xff] }
 0x2fe   :  { %v2105_v47 = vadd.f32 %v2104_v43, %v2099_v39  ;;  %v2120_v14 = vmax.f32 %v2118_v58, %v2119_v30  ;;  %v7087_v16 = vpack.c.bf16 %v2146_v63, %v2145_v41  ;;  %v5712_v56 = vld [vmem:[%s10530_s7 + $0x2e0] sm:$0xff]  ;;  %v5713_v49 = vld [vmem:[%s10530_s7 + $0x2e8] sm:$0xff]  ;;  %v5714_v44 = vld [vmem:[%s10530_s7 + $0x2f0] sm:$0xff] }
 0x2ff   :  { %v2113_v48 = vadd.f32 %v2112_v5, %v2099_v39  ;;  %v2128_v51 = vmax.f32 %v2126_v45, %v2127_v46  ;;  %v2147_v6 = vld [vmem:[%s10530_s7 + $0x60] sm:$0xff]  ;;  %v2148_v43 = vld [vmem:[%s10530_s7 + $0x68] sm:$0xff]  ;;  %v7186_v2 = vpack.c.bf16 %v5713_v49, %v5712_v56  ;;  %v5715_v27 = vld [vmem:[%s10530_s7 + $0x2f8] sm:$0xff] }
 0x300   :  { %v2106_v40 = vmax.f32 %v2105_v47, 0.0  ;;  %v2121_v52 = vadd.f32 %v2120_v14, %v2099_v39  ;;  %v7090_v58 = vpack.c.bf16 %v2148_v43, %v2147_v6  ;;  %v2149_v5 = vld [vmem:[%s10530_s7 + $0x70] sm:$0xff]  ;;  %v2150_v30 = vld [vmem:[%s10530_s7 + $0x78] sm:$0xff]  ;;  %v7189_v45 = vpack.c.bf16 %v5715_v27, %v5714_v44  ;;  %v5652_v47 = vld [vmem:[%s10530_s7 + $0x200] sm:$0xff] }
 0x301   :  { %v2114_v53 = vmax.f32 %v2113_v48, 0.0  ;;  %v2129_v57 = vadd.f32 %v2128_v51, %v2099_v39  ;;  %v5711_v39 = vld [vmem:[%s10530_s7 + $0x2d8] sm:$0xff]  ;;  %v7093_v46 = vpack.c.bf16 %v2150_v30, %v2149_v5  ;;  %v5653_v14 = vld [vmem:[%s10530_s7 + $0x208] sm:$0xff]  ;;  %v5692_v35 = vld [vmem:[%s10530_s7 + $0x1c0] sm:$0xff] }
 0x302   :  { %v2122_v60 = vmax.f32 %v2121_v52, 0.0  ;;  %2107 = vst [vmem:[#allocation3] sm:$0x1] %v2106_v40  ;;  %v7183_v42 = vpack.c.bf16 %v5711_v39, %v5710_v38  ;;  %v7096_v48 = vpack.c.bf16 %v5653_v14, %v5652_v47  ;;  %v5654_v40 = vld [vmem:[%s10530_s7 + $0x210] sm:$0xff]  ;;  %v5655_v52 = vld [vmem:[%s10530_s7 + $0x218] sm:$0xff]  ;;  %v5693_v36 = vld [vmem:[%s10530_s7 + $0x1c8] sm:$0xff] }
 0x303   :  { %2115 = vst [vmem:[#allocation3 + $0x1] sm:$0x1] %v2114_v53  ;;  %v2130_v61 = vmax.f32 %v2129_v57, 0.0  ;;  %v7099_v53 = vpack.c.bf16 %v5655_v52, %v5654_v40  ;;  %v5656_v57 = vld [vmem:[%s10530_s7 + $0x220] sm:$0xff]  ;;  %v5695_v38 = vld [vmem:[%s10530_s7 + $0x1d8] sm:$0xff]  ;;  %v5697_v63 = vld [vmem:[%s10530_s7 + $0x1e8] sm:$0xff] }
 0x304   :  { %2123 = vst [vmem:[#allocation3 + $0x2] sm:$0x1] %v2122_v60  ;;  %v5657_v60 = vld [vmem:[%s10530_s7 + $0x228] sm:$0xff]  ;;  %v5696_v41 = vld [vmem:[%s10530_s7 + $0x1e0] sm:$0xff]  ;;  %v5699_v56 = vld [vmem:[%s10530_s7 + $0x1f8] sm:$0xff] }
 0x305   :  { %2131 = vst [vmem:[#allocation3 + $0x3] sm:$0x1] %v2130_v61  ;;  %v7102_v61 = vpack.c.bf16 %v5657_v60, %v5656_v57  ;;  %v2698_v49 = vld [vmem:[#allocation8 + $0x128] sm:$0xff]  ;;  %v2700_v6 = vld [vmem:[#allocation8 + $0x138] sm:$0xff]  ;;  %v2699_v44 = vld [vmem:[#allocation8 + $0x130] sm:$0xff] }
 0x306   :  { %v2702_v27 = vld [vmem:[#allocation8 + $0x148] sm:$0xff]  ;;  %v2704_v5 = vld [vmem:[#allocation8 + $0x158] sm:$0xff]  ;;  %v2703_v47 = vld [vmem:[#allocation8 + $0x150] sm:$0xff] }
 0x307   :  { %v2706_v14 = vld [vmem:[#allocation8 + $0x168] sm:$0xff]  ;;  %v2705_v52 = vld [vmem:[#allocation8 + $0x160] sm:$0xff]  ;;  %v2688_v60 = vld [vmem:[#allocation8 + $0x18] sm:$0xff] }
 0x308   :  { %v2686_v57 = vld [vmem:[#allocation8 + $0x8] sm:$0xff] }
 0x309   :  { %v7205_v3 = vpack.c.bf16 %v2688_v60, %v2686_v57  ;;  %v3041_v57 = vld [vmem:[#allocation8 + $0x1c0] sm:$0xff]  ;;  %v3043_v60 = vld [vmem:[#allocation8 + $0x1d0] sm:$0xf] }
 0x30a   :  { %v9028_v59 = vld [vmem:[#allocation3] sm:$0x3] }
 0x30b   :  { %v9036_v18 = vld [vmem:[#allocation3 + $0x1] sm:$0x3]  ;;  %6405 = vmatmul.mubr.f32.vlgmr.msra.gmra.mrb[14].mxu1 %v9028_v59 }
 0x30c   :  { %6265 = vmatmul.mubr.f32.vlgmr.msra.gmra.mrb[16].mxu0 %v9036_v18  ;;  %7169 = vmatpush3.bf16.msra.mxu1 %v7168_v10  ;;  %v2134_v51 = vld [vmem:[#allocation3 + $0x2] sm:$0x3]  ;;  %v5661_v10 = vld [vmem:[%s10530_s7 + $0x248] sm:$0xff] }
 0x30d   :  { %7073 = vmatpush3.bf16.msra.mxu0 %v7072_v11  ;;  %7170 = vmatprep.subr.bf16.mxu1 %v7917_v55  ;;  %v7108_v11 = vpack.c.bf16 %v5661_v10, %v5660_v8  ;;  %v2690_v8 = vld [vmem:[#allocation8 + $0x28] sm:$0xff] }
 0x30e   :  { %7074 = vmatprep.subr.bf16.mxu0 %v7917_v55  ;;  %6299 = vmatprep.mubr.msk.f32.mxu0 %vm7918_vm9, %v7915_v0  ;;  %v9257_v10 = vld [vmem:[%s10523_s0 + $0x19] sm:$0xff] }
 0x30f   :  { %6439 = vmatprep.mubr.msk.f32.mxu1 %vm7918_vm9, %v7915_v0 }
 0x310   :  { %7172 = vmatpush3.bf16.msra.mxu1 %v7171_v9  ;;  %v7114_v9 = vpack.c.bf16 %v5665_v17, %v5664_v62  ;;  %v2694_v62 = vld [vmem:[#allocation8 + $0x48] sm:$0xff]  ;;  %v2696_v17 = vld [vmem:[#allocation8 + $0x58] sm:$0xf] }
 0x311   :  { %7076 = vmatpush3.bf16.msra.mxu0 %v7075_v12  ;;  %7173 = vmatprep.subr.bf16.mxu1 %v7917_v55  ;;  %v5666_v12 = vld [vmem:[%s10530_s7 + $0x270] sm:$0xff] }
 0x312   :  { %7077 = vmatprep.subr.bf16.mxu0 %v7917_v55  ;;  %v7117_v54 = vpack.c.bf16 %v5667_v19, %v5666_v12  ;;  %v7213_v19 = vpack.c.bf16 %v2696_v17, %v2694_v62  ;;  %v3025_v17 = vld [vmem:[#allocation8 + $0x80] sm:$0xff] }
 0x314   :  { %7175 = vmatpush3.bf16.msra.mxu1 %v7174_v23  ;;  %v7120_v23 = vpack.c.bf16 %v5685_v21, %v5684_v20  ;;  %v2695_v20 = vld [vmem:[#allocation8 + $0x50] sm:$0xf]  ;;  %v2906_v21 = vld [vmem:[#allocation8 + $0x248] sm:$0xff] }
 0x315   :  { %7079 = vmatpush3.bf16.msra.mxu0 %v7078_v24  ;;  %7176 = vmatprep.subr.bf16.mxu1 %v7917_v55  ;;  %v5686_v24 = vld [vmem:[%s10530_s7 + $0x190] sm:$0xff] }
 0x316   :  { %7080 = vmatprep.subr.bf16.mxu0 %v7917_v55  ;;  %v7123_v26 = vpack.c.bf16 %v5687_v25, %v5686_v24  ;;  %v9273_v24 = vld [vmem:[%s10523_s0 + $0x29] sm:$0x7] }
 0x318   :  { %7178 = vmatpush3.bf16.msra.mxu1 %v7177_v31  ;;  %v7126_v31 = vpack.c.bf16 %v5689_v29, %v5688_v28  ;;  %v2905_v28 = vld [vmem:[#allocation8 + $0x240] sm:$0xff]  ;;  %v2907_v29 = vld [vmem:[#allocation8 + $0x250] sm:$0xff] }
 0x319   :  { %7082 = vmatpush3.bf16.msra.mxu0 %v7081_v32  ;;  %7179 = vmatprep.subr.bf16.mxu1 %v7917_v55  ;;  %v5690_v32 = vld [vmem:[%s10530_s7 + $0x1b0] sm:$0xff] }
 0x31a   :  { %7083 = vmatprep.subr.bf16.mxu0 %v7917_v55  ;;  %v7129_v34 = vpack.c.bf16 %v5691_v33, %v5690_v32  ;;  %v2912_v32 = vld [vmem:[#allocation8 + $0x278] sm:$0xff]  ;;  %v9285_v33 = vld [vmem:[%s10523_s0 + $0x18] sm:$0xff] }
 0x31c   :  { %7181 = vmatpush3.bf16.msra.mxu1 %v7180_v50  ;;  %v7132_v50 = vpack.c.bf16 %v5693_v36, %v5692_v35  ;;  %v2909_v36 = vld [vmem:[#allocation8 + $0x260] sm:$0xff] }
 0x31d   :  { %7085 = vmatpush3.bf16.msra.mxu0 %v7084_v37  ;;  %7182 = vmatprep.subr.bf16.mxu1 %v7917_v55  ;;  %v5694_v37 = vld [vmem:[%s10530_s7 + $0x1d0] sm:$0xff] }
 0x31e   :  { %7086 = vmatprep.subr.bf16.mxu0 %v7917_v55  ;;  %v7135_v39 = vpack.c.bf16 %v5695_v38, %v5694_v37  ;;  %v2914_v37 = vld [vmem:[#allocation8 + $0x288] sm:$0xff]  ;;  %v2916_v38 = vld [vmem:[#allocation8 + $0x298] sm:$0xf] }
 0x320   :  { %7184 = vmatpush3.bf16.msra.mxu1 %v7183_v42  ;;  %v7138_v42 = vpack.c.bf16 %v5697_v63, %v5696_v41  ;;  %v7227_v63 = vpack.c.bf16 %v2916_v38, %v2914_v37  ;;  %v3227_v38 = vld [vmem:[#allocation8 + $0x2c0] sm:$0xff] }
 0x321   :  { %7088 = vmatpush3.bf16.msra.mxu0 %v7087_v16  ;;  %7185 = vmatprep.subr.bf16.mxu1 %v7917_v55  ;;  %v5698_v16 = vld [vmem:[%s10530_s7 + $0x1f0] sm:$0xff] }
 0x322   :  { %7089 = vmatprep.subr.bf16.mxu0 %v7917_v55  ;;  %v7141_v43 = vpack.c.bf16 %v5699_v56, %v5698_v16  ;;  %v2915_v16 = vld [vmem:[#allocation8 + $0x290] sm:$0xf]  ;;  %v3034_v56 = vld [vmem:[#allocation8 + $0x188] sm:$0xff] }
 0x324   :  { %7187 = vmatpush3.bf16.msra.mxu1 %v7186_v2  ;;  %v7191_v2 = vpack.c.bf16 %v2700_v6, %v2698_v49  ;;  %v3036_v49 = vld [vmem:[#allocation8 + $0x198] sm:$0xff] }
 0x325   :  { %7091 = vmatpush3.bf16.msra.mxu0 %v7090_v58  ;;  %7188 = vmatprep.subr.bf16.mxu1 %v7917_v55  ;;  %v2697_v58 = vld [vmem:[#allocation8 + $0x120] sm:$0xff]  ;;  %v9301_v6 = vld [vmem:[%s10523_s0 + $0x28] sm:$0x7] }
 0x326   :  { %7092 = vmatprep.subr.bf16.mxu0 %v7917_v55  ;;  %v7193_v30 = vpack.c.bf16 %v2699_v44, %v2697_v58  ;;  %v3033_v58 = vld [vmem:[#allocation8 + $0x180] sm:$0xff]  ;;  %v3035_v44 = vld [vmem:[#allocation8 + $0x190] sm:$0xff] }
 0x328   :  { %7190 = vmatpush3.bf16.msra.mxu1 %v7189_v45  ;;  %v7195_v45 = vpack.c.bf16 %v2704_v5, %v2702_v27  ;;  %v3038_v27 = vld [vmem:[#allocation8 + $0x1a8] sm:$0xff]  ;;  %v3040_v5 = vld [vmem:[#allocation8 + $0x1b8] sm:$0xff] }
 0x329   :  { %7094 = vmatpush3.bf16.msra.mxu0 %v7093_v46  ;;  %7317 = vmatprep.subr.bf16.mxu1 %v7917_v55  ;;  %v2701_v46 = vld [vmem:[#allocation8 + $0x140] sm:$0xff] }
 0x32a   :  { %7095 = vmatprep.subr.bf16.mxu0 %v7917_v55 }
 0x32b   :  { %6440 = vmatmul.mubr.f32.vlgmr.msra.gmra.mrb[14].mxu1 %v2134_v51 }
 0x32c   :  { %6300 = vmatmul.mubr.f32.vlgmr.msra.gmra.mrb[16].mxu0 %v9028_v59  ;;  %v7111_v59 = vpack.c.bf16 %v5663_v15, %v5662_v13  ;;  %v2689_v15 = vld [vmem:[#allocation8 + $0x20] sm:$0xff] }
 0x32d   :  { %7097 = vmatpush3.bf16.msra.mxu0 %v7096_v48  ;;  %6334 = vmatprep.mubr.msk.f32.mxu0 %vm7918_vm9, %v7915_v0  ;;  %v2708_v48 = vld [vmem:[#allocation8 + $0x178] sm:$0xf] }
 0x32e   :  { %7098 = vmatprep.subr.bf16.mxu0 %v7917_v55  ;;  %v7199_v40 = vpack.c.bf16 %v2708_v48, %v2706_v14  ;;  %v3039_v14 = vld [vmem:[#allocation8 + $0x1b0] sm:$0xff]  ;;  %v3042_v48 = vld [vmem:[#allocation8 + $0x1c8] sm:$0xff] }
 0x331   :  { %7100 = vmatpush3.bf16.msra.mxu0 %v7099_v53  ;;  %v2707_v53 = vld [vmem:[#allocation8 + $0x170] sm:$0xf] }
 0x332   :  { %7101 = vmatprep.subr.bf16.mxu0 %v7917_v55 }
 0x335   :  { %7103 = vmatpush3.bf16.msra.mxu0 %v7102_v61  ;;  %v7202_v61 = vpack.c.bf16 %v2707_v53, %v2705_v52 }
 0x336   :  { %7104 = vmatprep.subr.bf16.mxu0 %v7917_v55 }
 0x339   :  { %7106 = vmatpush3.bf16.msra.mxu0 %v7105_v7  ;;  %v2687_v7 = vld [vmem:[#allocation8 + $0x10] sm:$0xff] }
 0x33a   :  { %7107 = vmatprep.subr.bf16.mxu0 %v7917_v55 }
 0x33d   :  { %7109 = vmatpush3.bf16.msra.mxu0 %v7108_v11  ;;  %v7207_v11 = vpack.c.bf16 %v2687_v7, %v2685_v4  ;;  %v9329_v4 = vld [vmem:[%s10523_s0 + $0x2a] sm:$0x7]  ;;  %v7244_v7 = vpack.c.bf16 %v3043_v60, %v3041_v57  ;;  %v3359_v57 = vld [vmem:[#allocation8 + $0x238] sm:$0xf] }
 0x33e   :  { %7110 = vmatprep.subr.bf16.mxu0 %v7917_v55 }
 0x341   :  { %7112 = vmatpush3.bf16.msra.mxu0 %v7111_v59  ;;  %v2691_v59 = vld [vmem:[#allocation8 + $0x30] sm:$0xff] }
 0x342   :  { %7113 = vmatprep.subr.bf16.mxu0 %v7917_v55  ;;  %v7211_v12 = vpack.c.bf16 %v2691_v59, %v2689_v15  ;;  %v3028_v15 = vld [vmem:[#allocation8 + $0x98] sm:$0xff] }
 0x345   :  { %7115 = vmatpush3.bf16.msra.mxu0 %v7114_v9  ;;  %v9265_v9 = vld [vmem:[%s10523_s0 + $0x21] sm:$0xff] }
 0x346   :  { %7116 = vmatprep.subr.bf16.mxu0 %v7917_v55 }
 0x349   :  { %7118 = vmatpush3.bf16.msra.mxu0 %v7117_v54  ;;  %v2693_v54 = vld [vmem:[#allocation8 + $0x40] sm:$0xff] }
 0x34a   :  { %7119 = vmatprep.subr.bf16.mxu0 %v7917_v55  ;;  %v7216_v25 = vpack.c.bf16 %v2695_v20, %v2693_v54  ;;  %v3032_v54 = vld [vmem:[#allocation8 + $0xb8] sm:$0xf] }
 0x34c   :  { %6335 = vmatmul.mubr.f32.vlgmr.msra.gmra.mrb[16].mxu0 %v2134_v51  ;;  %v7197_v51 = vpack.c.bf16 %v2703_v47, %v2701_v46  ;;  %v7237_v46 = vpack.c.bf16 %v3040_v5, %v3038_v27  ;;  %v3037_v47 = vld [vmem:[#allocation8 + $0x1a0] sm:$0xff] }
 0x34d   :  { %7121 = vmatpush3.bf16.msra.mxu0 %v7120_v23  ;;  %6369 = vmatprep.mubr.msk.f32.mxu0 %vm7918_vm9, %v7915_v0  ;;  %v2908_v23 = vld [vmem:[#allocation8 + $0x258] sm:$0xff]  ;;  %v7239_v52 = vpack.c.bf16 %v3039_v14, %v3037_v47  ;;  %v3348_v5 = vld [vmem:[#allocation8 + $0x1e0] sm:$0xff] }
 0x34e   :  { %7122 = vmatprep.subr.bf16.mxu0 %v7917_v55  ;;  %v3355_v47 = vld [vmem:[#allocation8 + $0x218] sm:$0xff] }
 0x351   :  { %7124 = vmatpush3.bf16.msra.mxu0 %v7123_v26  ;;  %v7219_v26 = vpack.c.bf16 %v2908_v23, %v2906_v21  ;;  %v3029_v23 = vld [vmem:[#allocation8 + $0xa0] sm:$0xff] }
 0x352   :  { %7125 = vmatprep.subr.bf16.mxu0 %v7917_v55 }
 0x355   :  { %7127 = vmatpush3.bf16.msra.mxu0 %v7126_v31  ;;  %v2910_v31 = vld [vmem:[#allocation8 + $0x268] sm:$0xff] }
 0x356   :  { %7128 = vmatprep.subr.bf16.mxu0 %v7917_v55  ;;  %v7223_v35 = vpack.c.bf16 %v2912_v32, %v2910_v31  ;;  %v3223_v32 = vld [vmem:[#allocation8 + $0x2a0] sm:$0xff] }
 0x359   :  { %7130 = vmatpush3.bf16.msra.mxu0 %v7129_v34  ;;  %v7221_v34 = vpack.c.bf16 %v2907_v29, %v2905_v28  ;;  %v3226_v28 = vld [vmem:[#allocation8 + $0x2b8] sm:$0xff] }
 0x35a   :  { %7131 = vmatprep.subr.bf16.mxu0 %v7917_v55 }
 0x35d   :  { %7133 = vmatpush3.bf16.msra.mxu0 %v7132_v50  ;;  %v2911_v50 = vld [vmem:[#allocation8 + $0x270] sm:$0xff] }
 0x35e   :  { %7134 = vmatprep.subr.bf16.mxu0 %v7917_v55  ;;  %v7225_v41 = vpack.c.bf16 %v2911_v50, %v2909_v36  ;;  %v3230_v36 = vld [vmem:[#allocation8 + $0x2d8] sm:$0xff] }
 0x361   :  { %7136 = vmatpush3.bf16.msra.mxu0 %v7135_v39  ;;  %v9293_v39 = vld [vmem:[%s10523_s0 + $0x20] sm:$0xff] }
 0x362   :  { %7137 = vmatprep.subr.bf16.mxu0 %v7917_v55 }
 0x365   :  { %7139 = vmatpush3.bf16.msra.mxu0 %v7138_v42  ;;  %v2913_v42 = vld [vmem:[#allocation8 + $0x280] sm:$0xff] }
 0x366   :  { %7140 = vmatprep.subr.bf16.mxu0 %v7917_v55 }
 0x369   :  { %7142 = vmatpush3.bf16.msra.mxu0 %v7141_v43  ;;  %v7230_v43 = vpack.c.bf16 %v2915_v16, %v2913_v42  ;;  %v3234_v42 = vld [vmem:[#allocation8 + $0x2f8] sm:$0xf] }
 0x36a   :  { %7192 = vmatprep.subr.bf16.mxu0 %v7191_v2  ;;  %v7233_v2 = vpack.c.bf16 %v3036_v49, %v3034_v56  ;;  %v3231_v49 = vld [vmem:[#allocation8 + $0x2e0] sm:$0xff] }
 0x36c   :  { %6370 = vmatmul.mubr.f32.vlgmr.msra.gmra.mrb[18].mxu0 %v9036_v18  ;;  %v2692_v18 = vld [vmem:[#allocation8 + $0x38] sm:$0xff] }
 0x36d   :  { %7194 = vmatpush1.bf16.msra.mxu0 %v7193_v30  ;;  %2788 = vmatprep.mubr.f32.mxu0 %v7915_v0  ;;  %v7209_v13 = vpack.c.bf16 %v2692_v18, %v2690_v8  ;;  %v9313_v30 = vld [vmem:[%s10523_s0 + $0x1a] sm:$0xff]  ;;  %v3021_v18 = vld [vmem:[#allocation8 + $0x60] sm:$0xff] }
 0x36e   :  { %7196 = vmatprep.subr.bf16.mxu0 %v7195_v45  ;;  %v7235_v45 = vpack.c.bf16 %v3035_v44, %v3033_v58  ;;  %v3351_v58 = vld [vmem:[#allocation8 + $0x1f8] sm:$0xff] }
 0x371   :  { %7198 = vmatpush1.bf16.msra.mxu0 %v7197_v51  ;;  %v3044_v51 = vld [vmem:[#allocation8 + $0x1d8] sm:$0xf] }
 0x372   :  { %7201 = vmatprep.subr.msk.bf16.mxu0 %vm8004_vm2, %v7199_v40  ;;  %v9321_v40 = vld [vmem:[%s10523_s0 + $0x22] sm:$0xff]  ;;  %v7241_v53 = vpack.c.bf16 %v3044_v51, %v3042_v48  ;;  %v3352_v51 = vld [vmem:[#allocation8 + $0x200] sm:$0xff] }
 0x375   :  { %7204 = vmatpush1.bf16.msk.msra.mxu0 %vm8004_vm2, %v7202_v61  ;;  %v3022_v61 = vld [vmem:[#allocation8 + $0x68] sm:$0xff] }
 0x376   :  { %7206 = vmatprep.subr.bf16.mxu0 %v7205_v3  ;;  %v3024_v3 = vld [vmem:[#allocation8 + $0x78] sm:$0xff] }
 0x377   :  { %v7247_v8 = vpack.c.bf16 %v3024_v3, %v3022_v61  ;;  %v3356_v3 = vld [vmem:[#allocation8 + $0x220] sm:$0xff] }
 0x378   :  { %5727 = vmatmul.mubr.msk.f32.vlgmr.msra.gmra.mrb[20].mxu0 %vm104_vm3, %v9257_v10 }
 0x379   :  { %7208 = vmatpush1.bf16.msra.mxu0 %v7207_v11  ;;  %2794 = vmatprep.mubr.f32.mxu0 %v7915_v0  ;;  %v3023_v11 = vld [vmem:[#allocation8 + $0x70] sm:$0xff] }
 0x37a   :  { %7210 = vmatprep.subr.bf16.mxu0 %v7209_v13  ;;  %v3026_v13 = vld [vmem:[#allocation8 + $0x88] sm:$0xff]  ;;  %v7249_v59 = vpack.c.bf16 %v3023_v11, %v3021_v18  ;;  %v3339_v18 = vld [vmem:[#allocation8 + $0xd8] sm:$0xff] }
 0x37b   :  { %v7251_v62 = vpack.c.bf16 %v3028_v15, %v3026_v13  ;;  %v3336_v15 = vld [vmem:[#allocation8 + $0xc0] sm:$0xff] }
 0x37c   :  { %5728 = vmatmul.mubr.msk.f32.gmra.mrb[22].mxu0 %vm104_vm3, %v9265_v9 }
 0x37d   :  { %7212 = vmatpush1.bf16.msra.mxu0 %v7211_v12  ;;  %2800 = vmatprep.mubr.f32.mxu0 %v7915_v0  ;;  %v3027_v12 = vld [vmem:[#allocation8 + $0x90] sm:$0xff] }
 0x37e   :  { %7215 = vmatprep.subr.msk.bf16.mxu0 %vm8004_vm2, %v7213_v19  ;;  %v3030_v19 = vld [vmem:[#allocation8 + $0xa8] sm:$0xff]  ;;  %v7253_v20 = vpack.c.bf16 %v3027_v12, %v3025_v17  ;;  %v3343_v17 = vld [vmem:[#allocation8 + $0xf8] sm:$0xff] }
 0x37f   :  { %v7255_v21 = vpack.c.bf16 %v3032_v54, %v3030_v19  ;;  %v3340_v54 = vld [vmem:[#allocation8 + $0xe0] sm:$0xff] }
 0x380   :  { %5729 = vmatmul.mubr.msk.f32.gmra.mrb[24].mxu0 %vm104_vm3, %v9273_v24 }
 0x381   :  { %7218 = vmatpush1.bf16.msk.msra.mxu0 %vm8004_vm2, %v7216_v25  ;;  %2886 = vmatprep.mubr.f32.mxu0 %v7915_v0  ;;  %v3031_v25 = vld [vmem:[#allocation8 + $0xb0] sm:$0xf] }
 0x382   :  { %7220 = vmatprep.subr.bf16.mxu0 %v7219_v26  ;;  %v3224_v26 = vld [vmem:[#allocation8 + $0x2a8] sm:$0xff]  ;;  %v7258_v29 = vpack.c.bf16 %v3031_v25, %v3029_v23  ;;  %v3347_v23 = vld [vmem:[#allocation8 + $0x118] sm:$0xf] }
 0x383   :  { %v7261_v31 = vpack.c.bf16 %v3226_v28, %v3224_v26  ;;  %v3344_v28 = vld [vmem:[#allocation8 + $0x100] sm:$0xff] }
 0x384   :  { %5732 = vmatmul.mubr.msk.f32.vlgmr.msra.gmra.mrb[20].mxu0 %vm104_vm3, %v9285_v33 }
 0x385   :  { %7222 = vmatpush1.bf16.msra.mxu0 %v7221_v34  ;;  %2892 = vmatprep.mubr.f32.mxu0 %v7915_v0  ;;  %v3225_v34 = vld [vmem:[#allocation8 + $0x2b0] sm:$0xff] }
 0x386   :  { %7224 = vmatprep.subr.bf16.mxu0 %v7223_v35  ;;  %v3228_v35 = vld [vmem:[#allocation8 + $0x2c8] sm:$0xff]  ;;  %v7263_v50 = vpack.c.bf16 %v3225_v34, %v3223_v32  ;;  %v3541_v32 = vld [vmem:[#allocation8 + $0x318] sm:$0xff] }
 0x387   :  { %v7265_v37 = vpack.c.bf16 %v3230_v36, %v3228_v35  ;;  %v3538_v35 = vld [vmem:[#allocation8 + $0x300] sm:$0xff]  ;;  %v3540_v36 = vld [vmem:[#allocation8 + $0x310] sm:$0xff] }
 0x388   :  { %5733 = vmatmul.mubr.msk.f32.gmra.mrb[22].mxu0 %vm104_vm3, %v9293_v39 }
 0x389   :  { %7226 = vmatpush1.bf16.msra.mxu0 %v7225_v41  ;;  %2898 = vmatprep.mubr.f32.mxu0 %v7915_v0  ;;  %v3229_v41 = vld [vmem:[#allocation8 + $0x2d0] sm:$0xff] }
 0x38a   :  { %7229 = vmatprep.subr.msk.bf16.mxu0 %vm8004_vm2, %v7227_v63  ;;  %v3232_v63 = vld [vmem:[#allocation8 + $0x2e8] sm:$0xff]  ;;  %v7267_v16 = vpack.c.bf16 %v3229_v41, %v3227_v38  ;;  %v3542_v41 = vld [vmem:[#allocation8 + $0x320] sm:$0xff] }
 0x38b   :  { %v7269_v56 = vpack.c.bf16 %v3234_v42, %v3232_v63  ;;  %v3544_v63 = vld [vmem:[#allocation8 + $0x330] sm:$0xff]  ;;  %v3547_v42 = vld [vmem:[#allocation8 + $0x348] sm:$0xff] }
 0x38c   :  { %5734 = vmatmul.mubr.msk.f32.gmra.mrb[24].mxu0 %vm104_vm3, %v9301_v6 }
 0x38d   :  { %7232 = vmatpush1.bf16.msk.msra.mxu0 %vm8004_vm2, %v7230_v43  ;;  %2996 = vmatprep.mubr.f32.mxu0 %v7915_v0  ;;  %v3233_v43 = vld [vmem:[#allocation8 + $0x2f0] sm:$0xf] }
 0x38e   :  { %7234 = vmatprep.subr.bf16.mxu0 %v7233_v2  ;;  %v3349_v2 = vld [vmem:[#allocation8 + $0x1e8] sm:$0xff]  ;;  %v7272_v44 = vpack.c.bf16 %v3233_v43, %v3231_v49  ;;  %v3546_v49 = vld [vmem:[#allocation8 + $0x340] sm:$0xff]  ;;  %v3548_v43 = vld [vmem:[#allocation8 + $0x350] sm:$0xf] }
 0x38f   :  { %v7275_v27 = vpack.c.bf16 %v3351_v58, %v3349_v2  ;;  %v7314_v2 = vpack.c.bf16 %v3548_v43, %v3546_v49  ;;  %v5770_v58 = vld [vmem:[%s10528_s5 + $0x1b0] sm:$0xff] }
 0x390   :  { %5737 = vmatmul.mubr.msk.f32.vlgmr.msra.gmra.mrb[20].mxu0 %vm104_vm3, %v9313_v30  ;;  %v5786_v43 = vld [vmem:[%s10528_s5 + $0x230] sm:$0xff] }
 0x391   :  { %7236 = vmatpush1.bf16.msra.mxu0 %v7235_v45  ;;  %3002 = vmatprep.mubr.f32.mxu0 %v7915_v0  ;;  %v3350_v45 = vld [vmem:[#allocation8 + $0x1f0] sm:$0xff] }
 0x392   :  { %7238 = vmatprep.subr.bf16.mxu0 %v7237_v46  ;;  %v3353_v46 = vld [vmem:[#allocation8 + $0x208] sm:$0xff]  ;;  %v7277_v14 = vpack.c.bf16 %v3350_v45, %v3348_v5  ;;  %v5772_v5 = vld [vmem:[%s10528_s5 + $0x1c0] sm:$0xff]  ;;  %v5773_v45 = vld [vmem:[%s10528_s5 + $0x1c8] sm:$0xff] }
 0x393   :  { %v7279_v48 = vpack.c.bf16 %v3355_v47, %v3353_v46  ;;  %v5832_v46 = vld [vmem:[%s10528_s5 + $0x250] sm:$0xff]  ;;  %v7321_v47 = vpack.c.bf16 %v5773_v45, %v5772_v5 }
 0x394   :  { %5738 = vmatmul.mubr.msk.f32.gmra.mrb[22].mxu0 %vm104_vm3, %v9321_v40 }
 0x395   :  { %7240 = vmatpush1.bf16.msra.mxu0 %v7239_v52  ;;  %3008 = vmatprep.mubr.f32.mxu0 %v7915_v0  ;;  %v3354_v52 = vld [vmem:[#allocation8 + $0x210] sm:$0xff] }
 0x396   :  { %7243 = vmatprep.subr.msk.bf16.mxu0 %vm8004_vm2, %v7241_v53  ;;  %v3357_v53 = vld [vmem:[#allocation8 + $0x228] sm:$0xff]  ;;  %v7281_v60 = vpack.c.bf16 %v3354_v52, %v3352_v51 }
 0x397   :  { %v7283_v61 = vpack.c.bf16 %v3359_v57, %v3357_v53  ;;  %v5774_v51 = vld [vmem:[%s10528_s5 + $0x1d0] sm:$0xff]  ;;  %v5775_v52 = vld [vmem:[%s10528_s5 + $0x1d8] sm:$0xff]  ;;  %v5834_v53 = vld [vmem:[%s10528_s5 + $0x260] sm:$0xff] }
 0x398   :  { %5739 = vmatmul.mubr.msk.f32.gmra.mrb[24].mxu0 %vm104_vm3, %v9329_v4  ;;  %v7324_v57 = vpack.c.bf16 %v5775_v52, %v5774_v51 }
 0x399   :  { %7246 = vmatpush1.bf16.msk.msra.mxu0 %vm8004_vm2, %v7244_v7  ;;  %3115 = vmatprep.mubr.f32.mxu0 %v7915_v0  ;;  %v3358_v7 = vld [vmem:[#allocation8 + $0x230] sm:$0xf] }
 0x39a   :  { %7248 = vmatprep.subr.bf16.mxu0 %v7247_v8  ;;  %v3337_v8 = vld [vmem:[#allocation8 + $0xc8] sm:$0xff]  ;;  %v7286_v11 = vpack.c.bf16 %v3358_v7, %v3356_v3  ;;  %v5777_v3 = vld [vmem:[%s10528_s5 + $0x1e8] sm:$0xff] }
 0x39b   :  { %v7289_v13 = vpack.c.bf16 %v3339_v18, %v3337_v8  ;;  %v5836_v8 = vld [vmem:[%s10528_s5 + $0x270] sm:$0xff]  ;;  %v5837_v18 = vld [vmem:[%s10528_s5 + $0x278] sm:$0xff] }
 0x39c   :  { %5742 = vmatmul.mubr.msk.f32.vlgmr.msra.gmra.mrb[26].mxu0 %vm104_vm3, %v9257_v10 }
 0x39d   :  { %7250 = vmatpush1.bf16.msra.mxu0 %v7249_v59  ;;  %3121 = vmatprep.mubr.f32.mxu0 %v7915_v0  ;;  %v3338_v59 = vld [vmem:[#allocation8 + $0xd0] sm:$0xff] }
 0x39e   :  { %7252 = vmatprep.subr.bf16.mxu0 %v7251_v62  ;;  %v3341_v62 = vld [vmem:[#allocation8 + $0xe8] sm:$0xff]  ;;  %v7291_v12 = vpack.c.bf16 %v3338_v59, %v3336_v15 }
 0x39f   :  { %v7293_v19 = vpack.c.bf16 %v3343_v17, %v3341_v62  ;;  %v5778_v15 = vld [vmem:[%s10528_s5 + $0x1f0] sm:$0xff]  ;;  %v5779_v59 = vld [vmem:[%s10528_s5 + $0x1f8] sm:$0xff]  ;;  %v5838_v62 = vld [vmem:[%s10528_s5 + $0x280] sm:$0xff] }
 0x3a0   :  { %5743 = vmatmul.mubr.msk.f32.gmra.mrb[28].mxu0 %vm104_vm3, %v9265_v9  ;;  %v5839_v17 = vld [vmem:[%s10528_s5 + $0x288] sm:$0xff] }
 0x3a1   :  { %7254 = vmatpush1.bf16.msra.mxu0 %v7253_v20  ;;  %3127 = vmatprep.mubr.f32.mxu0 %v7915_v0  ;;  %v3342_v20 = vld [vmem:[#allocation8 + $0xf0] sm:$0xff] }
 0x3a2   :  { %7257 = vmatprep.subr.msk.bf16.mxu0 %vm8004_vm2, %v7255_v21  ;;  %v3345_v21 = vld [vmem:[#allocation8 + $0x108] sm:$0xff]  ;;  %v7295_v25 = vpack.c.bf16 %v3342_v20, %v3340_v54 }
 0x3a3   :  { %v7297_v26 = vpack.c.bf16 %v3347_v23, %v3345_v21  ;;  %v7411_v21 = vpack.c.bf16 %v5839_v17, %v5838_v62  ;;  %v5780_v23 = vld [vmem:[%s10528_s5 + $0x200] sm:$0xff] }
 0x3a4   :  { %5744 = vmatmul.mubr.msk.f32.gmra.mrb[30].mxu0 %vm104_vm3, %v9273_v24 }
 0x3a5   :  { %7260 = vmatpush1.bf16.msk.msra.mxu0 %vm8004_vm2, %v7258_v29  ;;  %3204 = vmatprep.mubr.f32.mxu0 %v7915_v0  ;;  %v3346_v29 = vld [vmem:[#allocation8 + $0x110] sm:$0xf] }
 0x3a6   :  { %7262 = vmatprep.subr.bf16.mxu0 %v7261_v31  ;;  %v3539_v31 = vld [vmem:[#allocation8 + $0x308] sm:$0xff]  ;;  %v7300_v34 = vpack.c.bf16 %v3346_v29, %v3344_v28 }
 0x3a7   :  { %v5841_v28 = vld [vmem:[%s10528_s5 + $0x298] sm:$0xff] }
 0x3a8   :  { %5747 = vmatmul.mubr.msk.f32.vlgmr.msra.gmra.mrb[26].mxu0 %vm104_vm3, %v9285_v33 }
 0x3a9   :  { %7264 = vmatpush1.bf16.msra.mxu0 %v7263_v50  ;;  %3210 = vmatprep.mubr.f32.mxu0 %v7915_v0  ;;  %v3543_v50 = vld [vmem:[#allocation8 + $0x328] sm:$0xff] }
 0x3aa   :  { %7266 = vmatprep.subr.bf16.mxu0 %v7265_v37  ;;  %v3545_v37 = vld [vmem:[#allocation8 + $0x338] sm:$0xff] }
 0x3ab   :  { %v7307_v38 = vpack.c.bf16 %v3545_v37, %v3543_v50 }
 0x3ac   :  { %5748 = vmatmul.mubr.msk.f32.gmra.mrb[28].mxu0 %vm104_vm3, %v9293_v39 }
 0x3ad   :  { %7268 = vmatpush1.bf16.msra.mxu0 %v7267_v16  ;;  %3216 = vmatprep.mubr.f32.mxu0 %v7915_v0  ;;  %v3549_v16 = vld [vmem:[#allocation8 + $0x358] sm:$0xf] }
 0x3ae   :  { %7271 = vmatprep.subr.msk.bf16.mxu0 %vm8004_vm2, %v7269_v56  ;;  %v7309_v56 = vpack.c.bf16 %v3544_v63, %v3542_v41  ;;  %v5844_v41 = vld [vmem:[%s10528_s5 + $0x2b0] sm:$0xff]  ;;  %v5845_v63 = vld [vmem:[%s10528_s5 + $0x2b8] sm:$0xff] }
 0x3af   :  { %v7420_v49 = vpack.c.bf16 %v5845_v63, %v5844_v41 }
 0x3b0   :  { %5749 = vmatmul.mubr.msk.f32.gmra.mrb[30].mxu0 %vm104_vm3, %v9301_v6 }
 0x3b1   :  { %7274 = vmatpush1.bf16.msk.msra.mxu0 %vm8004_vm2, %v7272_v44  ;;  %3305 = vmatprep.mubr.f32.mxu0 %v7915_v0 }
 0x3b2   :  { %7276 = vmatprep.subr.bf16.mxu0 %v7275_v27 }
 0x3b4   :  { %5752 = vmatmul.mubr.msk.f32.vlgmr.msra.gmra.mrb[26].mxu0 %vm104_vm3, %v9313_v30 }
 0x3b5   :  { %7278 = vmatpush1.bf16.msra.mxu0 %v7277_v14  ;;  %3311 = vmatprep.mubr.f32.mxu0 %v7915_v0  ;;  %v5833_v14 = vld [vmem:[%s10528_s5 + $0x258] sm:$0xff] }
 0x3b6   :  { %7280 = vmatprep.subr.bf16.mxu0 %v7279_v48  ;;  %v7402_v48 = vpack.c.bf16 %v5833_v14, %v5832_v46 }
 0x3b8   :  { %5753 = vmatmul.mubr.msk.f32.gmra.mrb[28].mxu0 %vm104_vm3, %v9321_v40 }
 0x3b9   :  { %7282 = vmatpush1.bf16.msra.mxu0 %v7281_v60  ;;  %3317 = vmatprep.mubr.f32.mxu0 %v7915_v0  ;;  %v5835_v60 = vld [vmem:[%s10528_s5 + $0x268] sm:$0xff] }
 0x3ba   :  { %7285 = vmatprep.subr.msk.bf16.mxu0 %vm8004_vm2, %v7283_v61  ;;  %v5776_v61 = vld [vmem:[%s10528_s5 + $0x1e0] sm:$0xff]  ;;  %v7405_v7 = vpack.c.bf16 %v5835_v60, %v5834_v53 }
 0x3bc   :  { %5754 = vmatmul.mubr.msk.f32.gmra.mrb[30].mxu0 %vm104_vm3, %v9329_v4 }
 0x3bd   :  { %7288 = vmatpush1.bf16.msk.msra.mxu0 %vm8004_vm2, %v7286_v11  ;;  %3430 = vmatprep.mubr.f32.mxu0 %v7915_v0  ;;  %v7327_v11 = vpack.c.bf16 %v5777_v3, %v5776_v61 }
 0x3be   :  { %7290 = vmatprep.subr.bf16.mxu0 %v7289_v13  ;;  %v7408_v13 = vpack.c.bf16 %v5837_v18, %v5836_v8 }
 0x3c0   :  { %5757 = vmatmul.mubr.msk.f32.vlgmr.msra.gmra.mrb[32].mxu0 %vm104_vm3, %v9257_v10  ;;  %v7303_v10 = vpack.c.bf16 %v3541_v32, %v3539_v31 }
 0x3c1   :  { %7292 = vmatpush1.bf16.msra.mxu0 %v7291_v12  ;;  %3436 = vmatprep.mubr.f32.mxu0 %v7915_v0 }
 0x3c2   :  { %7294 = vmatprep.subr.bf16.mxu0 %v7293_v19  ;;  %v7330_v19 = vpack.c.bf16 %v5779_v59, %v5778_v15 }
 0x3c4   :  { %5758 = vmatmul.mubr.msk.f32.gmra.mrb[34].mxu0 %vm104_vm3, %v9265_v9  ;;  %v7305_v9 = vpack.c.bf16 %v3540_v36, %v3538_v35  ;;  %v5842_v35 = vld [vmem:[%s10528_s5 + $0x2a0] sm:$0xff]  ;;  %v5843_v36 = vld [vmem:[%s10528_s5 + $0x2a8] sm:$0xff] }
 0x3c5   :  { %7296 = vmatpush1.bf16.msra.mxu0 %v7295_v25  ;;  %3442 = vmatprep.mubr.f32.mxu0 %v7915_v0  ;;  %v5781_v25 = vld [vmem:[%s10528_s5 + $0x208] sm:$0xff]  ;;  %v7417_v37 = vpack.c.bf16 %v5843_v36, %v5842_v35 }
 0x3c6   :  { %7299 = vmatprep.subr.msk.bf16.mxu0 %vm8004_vm2, %v7297_v26  ;;  %v5840_v26 = vld [vmem:[%s10528_s5 + $0x290] sm:$0xff]  ;;  %v7333_v31 = vpack.c.bf16 %v5781_v25, %v5780_v23  ;;  %v9548_v23 = vld [vmem:[%s10525_s2] sm:$0x3] }
 0x3c7   :  { %v7414_v32 = vpack.c.bf16 %v5841_v28, %v5840_v26 }
 0x3c8   :  { %5759 = vmatmul.mubr.msk.f32.gmra.mrb[36].mxu0 %vm104_vm3, %v9273_v24  ;;  %v7311_v24 = vpack.c.bf16 %v3549_v16, %v3547_v42  ;;  %v2661_v16 = vld [vmem:[%s10531_s8] sm:$0x1] }
 0x3c9   :  { %7302 = vmatpush1.bf16.msk.msra.mxu0 %vm8004_vm2, %v7300_v34  ;;  %3519 = vmatprep.mubr.f32.mxu0 %v7915_v0  ;;  %v5782_v34 = vld [vmem:[%s10528_s5 + $0x210] sm:$0xff] }
 0x3ca   :  { %7304 = vmatprep.subr.bf16.mxu0 %v7303_v10  ;;  %v5783_v10 = vld [vmem:[%s10528_s5 + $0x218] sm:$0xff] }
 0x3cb   :  { %v7336_v50 = vpack.c.bf16 %v5783_v10, %v5782_v34 }
 0x3cc   :  { %5762 = vmatmul.mubr.msk.f32.vlgmr.msra.gmra.mrb[32].mxu0 %vm104_vm3, %v9285_v33 }
 0x3cd   :  { %7306 = vmatpush1.bf16.msra.mxu0 %v7305_v9  ;;  %3525 = vmatprep.mubr.f32.mxu0 %v7915_v0  ;;  %v5784_v9 = vld [vmem:[%s10528_s5 + $0x220] sm:$0xff] }
 0x3ce   :  { %7308 = vmatprep.subr.bf16.mxu0 %v7307_v38  ;;  %v5785_v38 = vld [vmem:[%s10528_s5 + $0x228] sm:$0xff] }
 0x3cf   :  { %v7339_v42 = vpack.c.bf16 %v5785_v38, %v5784_v9 }
 0x3d0   :  { %5763 = vmatmul.mubr.msk.f32.gmra.mrb[34].mxu0 %vm104_vm3, %v9293_v39 }
 0x3d1   :  { %7310 = vmatpush1.bf16.msra.mxu0 %v7309_v56  ;;  %3531 = vmatprep.mubr.f32.mxu0 %v7915_v0 }
 0x3d2   :  { %7313 = vmatprep.subr.msk.bf16.mxu0 %vm8004_vm2, %v7311_v24 }
 0x3d4   :  { %5764 = vmatmul.mubr.msk.f32.gmra.mrb[36].mxu0 %vm104_vm3, %v9301_v6 }
 0x3d5   :  { %7316 = vmatpush1.bf16.msk.msra.mxu0 %vm8004_vm2, %v7314_v2  ;;  %3620 = vmatprep.mubr.f32.mxu0 %v7915_v0  ;;  %v5787_v2 = vld [vmem:[%s10528_s5 + $0x238] sm:$0xff] }
 0x3d6   :  { %7398 = vmatprep.subr.bf16.mxu0 %v7917_v55 }
 0x3d8   :  { %5767 = vmatmul.mubr.msk.f32.vlgmr.msra.gmra.mrb[32].mxu0 %vm104_vm3, %v9313_v30  ;;  %v5771_v30 = vld [vmem:[%s10528_s5 + $0x1b8] sm:$0xff] }
 0x3d9   :  { %3626 = vmatprep.mubr.f32.mxu0 %v7915_v0  ;;  %v7318_v44 = vpack.c.bf16 %v5771_v30, %v5770_v58  ;;  %v7342_v58 = vpack.c.bf16 %v5787_v2, %v5786_v43 }
 0x3db   :  { %7319 = vmatpush1.bf16.msra.mxu1 %v7318_v44 }
 0x3dc   :  { %5768 = vmatmul.mubr.msk.f32.gmra.mrb[34].mxu0 %vm104_vm3, %v9321_v40  ;;  %v5830_v40 = vld [vmem:[%s10528_s5 + $0x240] sm:$0xff]  ;;  %7320 = vmatprep.subr.bf16.mxu1 %v7917_v55 }
 0x3dd   :  { %3632 = vmatprep.mubr.f32.mxu0 %v7915_v0 }
 0x3df   :  { %7322 = vmatpush1.bf16.msra.mxu1 %v7321_v47 }
 0x3e0   :  { %5769 = vmatmul.mubr.msk.f32.gmra.mrb[36].mxu0 %vm104_vm3, %v9329_v4  ;;  %v5831_v4 = vld [vmem:[%s10528_s5 + $0x248] sm:$0xff]  ;;  %7323 = vmatprep.subr.bf16.mxu1 %v7917_v55 }
 0x3e1   :  { %v7399_v27 = vpack.c.bf16 %v5831_v4, %v5830_v40 }
 0x3e3   :  { %7400 = vmatpush1.bf16.msra.mxu0 %v7399_v27  ;;  %7325 = vmatpush1.bf16.msra.mxu1 %v7324_v57 }
 0x3e4   :  { %7401 = vmatprep.subr.bf16.mxu0 %v7917_v55  ;;  %7326 = vmatprep.subr.bf16.mxu1 %v7917_v55 }
 0x3e7   :  { %7403 = vmatpush1.bf16.msra.mxu0 %v7402_v48  ;;  %7328 = vmatpush1.bf16.msra.mxu1 %v7327_v11 }
 0x3e8   :  { %7404 = vmatprep.subr.bf16.mxu0 %v7917_v55  ;;  %7329 = vmatprep.subr.bf16.mxu1 %v7917_v55 }
 0x3eb   :  { %7406 = vmatpush1.bf16.msra.mxu0 %v7405_v7  ;;  %7331 = vmatpush1.bf16.msra.mxu1 %v7330_v19 }
 0x3ec   :  { %7407 = vmatprep.subr.bf16.mxu0 %v7917_v55  ;;  %7332 = vmatprep.subr.bf16.mxu1 %v7917_v55 }
 0x3ef   :  { %7409 = vmatpush1.bf16.msra.mxu0 %v7408_v13  ;;  %7334 = vmatpush1.bf16.msra.mxu1 %v7333_v31 }
 0x3f0   :  { %7410 = vmatprep.subr.bf16.mxu0 %v7917_v55  ;;  %7335 = vmatprep.subr.bf16.mxu1 %v7917_v55 }
 0x3f3   :  { %7412 = vmatpush1.bf16.msra.mxu0 %v7411_v21  ;;  %7337 = vmatpush1.bf16.msra.mxu1 %v7336_v50 }
 0x3f4   :  { %7413 = vmatprep.subr.bf16.mxu0 %v7917_v55  ;;  %7338 = vmatprep.subr.bf16.mxu1 %v7917_v55 }
 0x3f7   :  { %7415 = vmatpush1.bf16.msra.mxu0 %v7414_v32  ;;  %7340 = vmatpush1.bf16.msra.mxu1 %v7339_v42 }
 0x3f8   :  { %7416 = vmatprep.subr.bf16.mxu0 %v7917_v55  ;;  %7341 = vmatprep.subr.bf16.mxu1 %v7917_v55 }
 0x3fb   :  { %7418 = vmatpush1.bf16.msra.mxu0 %v7417_v37  ;;  %7343 = vmatpush1.bf16.msra.mxu1 %v7342_v58 }
 0x3fc   :  { %7419 = vmatprep.subr.bf16.mxu0 %v7917_v55  ;;  %7344 = vmatprep.subr.bf16.mxu1 %v7917_v55 }
 0x3fe   :  { %v2653_v33 = vpop.f32.mrb[14].mxu1 }
 0x3ff   :  { %v6441_v1 = vpop.f32.mrb[15].mxu1  ;;  %7421 = vmatpush1.bf16.msra.mxu0 %v7420_v49 }
 0x400   :  { %v5846_v1 = vld [vmem:[%s10528_s5 + $0x2c0] sm:$0xff]  ;;  %7422 = vmatprep.subr.bf16.mxu0 %v7917_v55 }
 0x41f   :  { %v2391_v39 = vpop.f32.mrb[16].mxu0 }
 0x420   :  { %v6336_v6 = vpop.f32.mrb[17].mxu0 }
 0x43f   :  { %v2496_v12 = vpop.f32.mrb[18].mxu0 }
 0x440   :  { %v7719_v54 = vadd.f32 %v2653_v33, %v2496_v12  ;;  %v6371_v20 = vpop.f32.mrb[19].mxu0 }
 0x442   :  { %v2658_v29 = vmax.f32 %v2391_v39, %v7719_v54  ;;  %v5847_v39 = vld [vmem:[%s10528_s5 + $0x2c8] sm:$0xff] }
 0x443   :  { %v7423_v30 = vpack.c.bf16 %v5847_v39, %v5846_v1 }
 0x444   :  { %2660 = vst.msk [vmem:[#allocation7] sm:$0x3] %vm2659_vm10, %v2658_v29 }
 0x445   :  { %7424 = vmatpush1.bf16.msra.mxu0 %v7423_v30 }
 0x446   :  { %7425 = vmatprep.subr.bf16.mxu0 %v7917_v55 }
 0x44b   :  { %v2662_v56 = vld [vmem:[#allocation7] sm:$0x1]  ;;  %v2663_v24 = vld [vmem:[#allocation7 + $0x1] sm:$0x1] }
 0x44c   :  { %v2664_v33 = vmax.f32 %v2662_v56, %v2663_v24 }
 0x44e   :  { %v2665_v6 = vadd.f32 %v2664_v33, %v2661_v16 }
 0x450   :  { %v2666_v40 = vmax.f32 %v2665_v6, 0.0 }
 0x452   :  { %2668 = vst.msk [vmem:[#allocation4] sm:$0x1] %vm2667_vm11, %v2666_v40 }
 0x463   :  { %v2998_v44 = vpop.f32.mrb[20].mxu0 }
 0x464   :  { %v3000_v4 = vpop.f32.mrb[21].mxu0 }
 0x467   :  { %v3004_v27 = vpop.f32.mrb[22].mxu0 }
 0x468   :  { %v3006_v5 = vpop.f32.mrb[23].mxu0 }
 0x46b   :  { %v3010_v45 = vpop.f32.mrb[24].mxu0 }
 0x46c   :  { %v3012_v46 = vpop.f32.mrb[25].mxu0 }
 0x487   :  { %v3307_v47 = vpop.f32.mrb[26].mxu0 }
 0x488   :  { %v3330_v14 = vmax.f32 %v2998_v44, %v3307_v47  ;;  %v3309_v48 = vpop.f32.mrb[27].mxu0  ;;  %v7862_v44 = vld [vmem:[%s10526_s3] sm:$0x3] }
 0x489   :  { %v3331_v51 = vmax.f32 %v3000_v4, %v3309_v48 }
 0x48b   :  { %v3313_v52 = vpop.f32.mrb[28].mxu0 }
 0x48c   :  { %v3332_v53 = vmax.f32 %v3004_v27, %v3313_v52  ;;  %v3315_v57 = vpop.f32.mrb[29].mxu0 }
 0x48d   :  { %v3333_v60 = vmax.f32 %v3006_v5, %v3315_v57 }
 0x48f   :  { %v3319_v61 = vpop.f32.mrb[30].mxu0 }
 0x490   :  { %v3334_v3 = vmax.f32 %v3010_v45, %v3319_v61  ;;  %v3321_v7 = vpop.f32.mrb[31].mxu0 }
 0x491   :  { %v3335_v8 = vmax.f32 %v3012_v46, %v3321_v7 }
 0x4ab   :  { %v3622_v18 = vpop.f32.mrb[32].mxu0 }
 0x4ac   :  { %v3645_v11 = vmax.f32 %v3330_v14, %v3622_v18  ;;  %v3624_v13 = vpop.f32.mrb[33].mxu0 }
 0x4ad   :  { %v3646_v15 = vmax.f32 %v3331_v51, %v3624_v13  ;;  %v7863_v51 = vld [vmem:[%s10527_s4] sm:$0x3] }
 0x4ae   :  { %3651 = vst [vmem:[#allocation5] sm:$0xff] %v3645_v11 }
 0x4af   :  { %3652 = vst.msk [vmem:[#allocation5 + $0x8] sm:$0xff] %vm1056_vm5, %v3646_v15  ;;  %v3628_v59 = vpop.f32.mrb[34].mxu0 }
 0x4b0   :  { %v3647_v62 = vmax.f32 %v3332_v53, %v3628_v59  ;;  %v3630_v17 = vpop.f32.mrb[35].mxu0 }
 0x4b1   :  { %v3648_v12 = vmax.f32 %v3333_v60, %v3630_v17 }
 0x4b2   :  { %3653 = vst [vmem:[#allocation5 + $0x10] sm:$0xff] %v3647_v62 }
 0x4b3   :  { %3654 = vst.msk [vmem:[#allocation5 + $0x18] sm:$0xff] %vm1056_vm5, %v3648_v12  ;;  %v3634_v19 = vpop.f32.mrb[36].mxu0 }
 0x4b4   :  { %v3649_v54 = vmax.f32 %v3334_v3, %v3634_v19  ;;  %v3636_v20 = vpop.f32.mrb[37].mxu0 }
 0x4b5   :  { %v3650_v21 = vmax.f32 %v3335_v8, %v3636_v20 }
 0x4b6   :  { %3655 = vst [vmem:[#allocation5 + $0x20] sm:$0x7] %v3649_v54  ;;  %v3658_v25 = vld [vmem:[#allocation5] ss:$8 sm:$0x3] }
 0x4b7   :  { %v3659_v26 = vld [vmem:[#allocation5 + $0x1] ss:$8 sm:$0x3]  ;;  %3656 = vst.msk [vmem:[#allocation5 + $0x28] sm:$0x7] %vm1061_vm6, %v3650_v21 }
 0x4b8   :  { %v3660_v28 = vmax.f32 %v3658_v25, %v3659_v26  ;;  %v3661_v29 = vld [vmem:[#allocation5 + $0x2] ss:$8 sm:$0x3]  ;;  %v3671_v32 = vld [vmem:[#allocation5 + $0x3] ss:$8 sm:$0x3] }
 0x4b9   :  { %v3670_v31 = vld [vmem:[#allocation5 + $0x2] ss:$8 sm:$0x3]  ;;  %v3673_v34 = vld [vmem:[#allocation5 + $0x4] ss:$8 sm:$0x3] }
 0x4ba   :  { %v3662_v10 = vmax.f32 %v3660_v28, %v3661_v29  ;;  %v3672_v35 = vmax.f32 %v3670_v31, %v3671_v32  ;;  %v3682_v36 = vld [vmem:[#allocation5 + $0x4] ss:$8 sm:$0x3]  ;;  %v3683_v50 = vld [vmem:[#allocation5 + $0x5] ss:$8 sm:$0x3] }
 0x4bb   :  { %v3684_v37 = vmax.f32 %v3682_v36, %v3683_v50  ;;  %v3685_v9 = vld [vmem:[#allocation5 + $0x6] ss:$8 sm:$0x3]  ;;  %v3695_v42 = vld [vmem:[#allocation5 + $0x7] ss:$8 sm:$0x3] }
 0x4bc   :  { %v3694_v38 = vld [vmem:[#allocation5 + $0x6] ss:$8 sm:$0x3]  ;;  %v3663_v41 = vadd.f32 %v3662_v10, %v9548_v23  ;;  %v3674_v63 = vmax.f32 %v3672_v35, %v3673_v34  ;;  %v3697_v16 = vld [vmem:[#allocation5 + $0x10] ss:$8 sm:$0x3] }
 0x4bd   :  { %v3686_v56 = vmax.f32 %v3684_v37, %v3685_v9  ;;  %v3696_v24 = vmax.f32 %v3694_v38, %v3695_v42  ;;  %v3706_v49 = vld [vmem:[#allocation5 + $0x10] ss:$8 sm:$0x3]  ;;  %v3707_v43 = vld [vmem:[#allocation5 + $0x11] ss:$8 sm:$0x3] }
 0x4be   :  { %v3664_v2 = vmax.f32 %v3663_v41, 0.0  ;;  %v3675_v33 = vadd.f32 %v3674_v63, %v9548_v23  ;;  %v3708_v1 = vmax.f32 %v3706_v49, %v3707_v43  ;;  %v3709_v39 = vld [vmem:[#allocation5 + $0x12] ss:$8 sm:$0x3] }
 0x4bf   :  { %v3687_v6 = vadd.f32 %v3686_v56, %v9548_v23  ;;  %v3698_v58 = vmax.f32 %v3696_v24, %v3697_v16  ;;  %v3718_v30 = vld [vmem:[#allocation5 + $0x12] ss:$8 sm:$0x3]  ;;  %v3719_v40 = vld [vmem:[#allocation5 + $0x13] ss:$8 sm:$0x3] }
 0x4c0   :  { %v3665_v4 = vmul.f32 %v7862_v44, %v3664_v2  ;;  %v3676_v27 = vmax.f32 %v3675_v33, 0.0  ;;  %v3710_v5 = vmax.f32 %v3708_v1, %v3709_v39  ;;  %v3720_v45 = vmax.f32 %v3718_v30, %v3719_v40  ;;  %v3721_v46 = vld [vmem:[#allocation5 + $0x14] ss:$8 sm:$0x3]  ;;  %v3779_v39 = vld [vmem:[%s10528_s5 + $0x8] sm:$0xff] }
 0x4c1   :  { %v3688_v47 = vmax.f32 %v3687_v6, 0.0  ;;  %v3699_v14 = vadd.f32 %v3698_v58, %v9548_v23  ;;  %v3730_v48 = vld [vmem:[#allocation5 + $0x14] ss:$8 sm:$0x3]  ;;  %v5812_v6 = vld [vmem:[%s10528_s5 + $0x90] sm:$0xff] }
 0x4c2   :  { %v3666_v52 = vadd.f32 %v7863_v51, %v3665_v4  ;;  %v3677_v53 = vmul.f32 %v7862_v44, %v3676_v27  ;;  %v3711_v57 = vadd.f32 %v3710_v5, %v9548_v23  ;;  %v3722_v60 = vmax.f32 %v3720_v45, %v3721_v46  ;;  %v3731_v61 = vld [vmem:[#allocation5 + $0x15] ss:$8 sm:$0x3]  ;;  %v3733_v3 = vld [vmem:[#allocation5 + $0x16] ss:$8 sm:$0x3] }
 0x4c3   :  { %v3689_v7 = vmul.f32 %v7862_v44, %v3688_v47  ;;  %v3700_v8 = vmax.f32 %v3699_v14, 0.0  ;;  %v3732_v18 = vmax.f32 %v3730_v48, %v3731_v61  ;;  %v3742_v11 = vld [vmem:[#allocation5 + $0x16] ss:$8 sm:$0x3]  ;;  %v5813_v58 = vld [vmem:[%s10528_s5 + $0x98] sm:$0xff]  ;;  %v3780_v46 = vld [vmem:[%s10528_s5 + $0x10] sm:$0xff] }
 0x4c4   :  { %3668 = vst.msk [vmem:[#allocation2 + $0x21] ss:$8 sm:$0x3] %vm8238_vm4, %v3666_v52  ;;  %v3678_v13 = vadd.f32 %v7863_v51, %v3677_v53  ;;  %v3712_v15 = vmax.f32 %v3711_v57, 0.0  ;;  %v3723_v59 = vadd.f32 %v3722_v60, %v9548_v23  ;;  %v3778_v1 = vld [vmem:[%s10528_s5] sm:$0xff]  ;;  %v7426_v45 = vpack.c.bf16 %v5813_v58, %v5812_v6  ;;  %v3781_v48 = vld [vmem:[%s10528_s5 + $0x18] sm:$0xff] }
 0x4c5   :  { %v3743_v62 = vld [vmem:[#allocation5 + $0x17] ss:$8 sm:$0x3]  ;;  %v3690_v17 = vadd.f32 %v7863_v51, %v3689_v7  ;;  %v3701_v12 = vmul.f32 %v7862_v44, %v3700_v8  ;;  %v3734_v19 = vmax.f32 %v3732_v18, %v3733_v3  ;;  %v3745_v20 = vld [vmem:[#allocation5 + $0x20] ss:$8 sm:$0x3]  ;;  %v7345_v5 = vpack.c.bf16 %v3779_v39, %v3778_v1 }
 0x4c6   :  { %v3744_v54 = vmax.f32 %v3742_v11, %v3743_v62  ;;  %v3754_v21 = vld [vmem:[#allocation5 + $0x20] ss:$8 sm:$0x3]  ;;  %3680 = vst.msk [vmem:[#allocation2 + $0x22] ss:$8 sm:$0x3] %vm8238_vm4, %v3678_v13  ;;  %v3713_v25 = vmul.f32 %v7862_v44, %v3712_v15  ;;  %v7348_v53 = vpack.c.bf16 %v3781_v48, %v3780_v46 }
 0x4c7   :  { %v3724_v26 = vmax.f32 %v3723_v59, 0.0  ;;  %v3755_v28 = vld [vmem:[#allocation5 + $0x21] ss:$8 sm:$0x3]  ;;  %v3702_v29 = vadd.f32 %v7863_v51, %v3701_v12  ;;  %v3735_v31 = vadd.f32 %v3734_v19, %v9548_v23  ;;  %v3782_v60 = vld [vmem:[%s10528_s5 + $0x20] sm:$0xff]  ;;  %v5817_v7 = vld [vmem:[%s10528_s5 + $0xb8] sm:$0xff] }
 0x4c8   :  { %3692 = vst.msk [vmem:[#allocation2 + $0x23] ss:$8 sm:$0x3] %vm8238_vm4, %v3690_v17  ;;  %v3746_v32 = vmax.f32 %v3744_v54, %v3745_v20  ;;  %v3756_v34 = vmax.f32 %v3754_v21, %v3755_v28  ;;  %v3714_v10 = vadd.f32 %v7863_v51, %v3713_v25  ;;  %v3757_v36 = vld [vmem:[#allocation5 + $0x22] ss:$8 sm:$0x3] }
 0x4c9   :  { %v3725_v35 = vmul.f32 %v7862_v44, %v3724_v26  ;;  %3704 = vst.msk [vmem:[#allocation2 + $0x24] ss:$8 sm:$0x3] %vm8238_vm4, %v3702_v29  ;;  %v3736_v50 = vmax.f32 %v3735_v31, 0.0  ;;  %v5815_v52 = vld [vmem:[%s10528_s5 + $0xa8] sm:$0xff]  ;;  %v5816_v3 = vld [vmem:[%s10528_s5 + $0xb0] sm:$0xff] }
 0x4ca   :  { %v3747_v37 = vadd.f32 %v3746_v32, %v9548_v23  ;;  %v3758_v9 = vmax.f32 %v3756_v34, %v3757_v36  ;;  %3716 = vst.msk [vmem:[#allocation2 + $0x25] ss:$8 sm:$0x3] %vm8238_vm4, %v3714_v10  ;;  %v3783_v61 = vld [vmem:[%s10528_s5 + $0x28] sm:$0xff]  ;;  %v7432_v11 = vpack.c.bf16 %v5817_v7, %v5816_v3  ;;  %v3784_v13 = vld [vmem:[%s10528_s5 + $0x30] sm:$0xff]  ;;  %v3785_v15 = vld [vmem:[%s10528_s5 + $0x38] sm:$0xff] }
 0x4cb   :  { %v3726_v38 = vadd.f32 %v7863_v51, %v3725_v35  ;;  %v3737_v41 = vmul.f32 %v7862_v44, %v3736_v50  ;;  %v7351_v18 = vpack.c.bf16 %v3783_v61, %v3782_v60  ;;  %v5818_v59 = vld [vmem:[%s10528_s5 + $0xc0] sm:$0xff]  ;;  %v5819_v62 = vld [vmem:[%s10528_s5 + $0xc8] sm:$0xff]  ;;  %v7354_v17 = vpack.c.bf16 %v3785_v15, %v3784_v13  ;;  %v5820_v20 = vld [vmem:[%s10528_s5 + $0xd0] sm:$0xff] }
 0x4cc   :  { %v3748_v63 = vmax.f32 %v3747_v37, 0.0  ;;  %v3759_v42 = vadd.f32 %v3758_v9, %v9548_v23  ;;  %v7435_v12 = vpack.c.bf16 %v5819_v62, %v5818_v59  ;;  %v3786_v19 = vld [vmem:[%s10528_s5 + $0x40] sm:$0xff]  ;;  %v3787_v54 = vld [vmem:[%s10528_s5 + $0x48] sm:$0xff]  ;;  %v5821_v21 = vld [vmem:[%s10528_s5 + $0xd8] sm:$0xff] }
 0x4cd   :  { %3728 = vst.msk [vmem:[#allocation2 + $0x26] ss:$8 sm:$0x3] %vm8238_vm4, %v3726_v38  ;;  %v3738_v16 = vadd.f32 %v7863_v51, %v3737_v41  ;;  %v7357_v25 = vpack.c.bf16 %v3787_v54, %v3786_v19  ;;  %v7438_v26 = vpack.c.bf16 %v5821_v21, %v5820_v20  ;;  %v3788_v28 = vld [vmem:[%s10528_s5 + $0x50] sm:$0xff]  ;;  %v3789_v29 = vld [vmem:[%s10528_s5 + $0x58] sm:$0xff]  ;;  %v5822_v31 = vld [vmem:[%s10528_s5 + $0xe0] sm:$0xff] }
 0x4ce   :  { %v3749_v56 = vmul.f32 %v7862_v44, %v3748_v63  ;;  %v3760_v24 = vmax.f32 %v3759_v42, 0.0  ;;  %v5823_v32 = vld [vmem:[%s10528_s5 + $0xe8] sm:$0xff]  ;;  %v7360_v34 = vpack.c.bf16 %v3789_v29, %v3788_v28  ;;  %v3790_v35 = vld [vmem:[%s10528_s5 + $0x60] sm:$0xff]  ;;  %v5824_v50 = vld [vmem:[%s10528_s5 + $0xf0] sm:$0xff] }
 0x4cf   :  { %3740 = vst.msk [vmem:[#allocation2 + $0x27] ss:$8 sm:$0x3] %vm8238_vm4, %v3738_v16  ;;  %v7441_v10 = vpack.c.bf16 %v5823_v32, %v5822_v31  ;;  %v3791_v36 = vld [vmem:[%s10528_s5 + $0x68] sm:$0xff]  ;;  %v5825_v37 = vld [vmem:[%s10528_s5 + $0xf8] sm:$0xff]  ;;  %v3792_v41 = vld [vmem:[%s10528_s5 + $0x70] sm:$0xff] }
 0x4d0   :  { %v3750_v49 = vadd.f32 %v7863_v51, %v3749_v56  ;;  %v3761_v43 = vmul.f32 %v7862_v44, %v3760_v24  ;;  %v7363_v9 = vpack.c.bf16 %v3791_v36, %v3790_v35  ;;  %v7444_v38 = vpack.c.bf16 %v5825_v37, %v5824_v50  ;;  %v3793_v63 = vld [vmem:[%s10528_s5 + $0x78] sm:$0xff]  ;;  %v5826_v42 = vld [vmem:[%s10528_s5 + $0x100] sm:$0xff]  ;;  %v5827_v16 = vld [vmem:[%s10528_s5 + $0x108] sm:$0xff] }
 0x4d1   :  { %v7366_v56 = vpack.c.bf16 %v3793_v63, %v3792_v41  ;;  %v7447_v24 = vpack.c.bf16 %v5827_v16, %v5826_v42  ;;  %v5792_v39 = vld [vmem:[%s10528_s5 + $0x360] sm:$0xff]  ;;  %v5793_v6 = vld [vmem:[%s10528_s5 + $0x368] sm:$0xff]  ;;  %v5852_v58 = vld [vmem:[%s10528_s5 + $0x3f0] sm:$0xff] }
 0x4d2   :  { %3752 = vst.msk [vmem:[#allocation2 + $0x30] ss:$8 sm:$0x3] %vm8238_vm4, %v3750_v49  ;;  %v3762_v2 = vadd.f32 %v7863_v51, %v3761_v43  ;;  %v5814_v51 = vld [vmem:[%s10528_s5 + $0xa0] sm:$0xff]  ;;  %v3795_v43 = vld [vmem:[%s10528_s5 + $0x88] sm:$0xff]  ;;  %v5856_v13 = vld [vmem:[%s10528_s5 + $0x410] sm:$0xff] }
 0x4d3   :  { %v7429_v57 = vpack.c.bf16 %v5815_v52, %v5814_v51  ;;  %v3794_v49 = vld [vmem:[%s10528_s5 + $0x80] sm:$0xff]  ;;  %v5855_v52 = vld [vmem:[%s10528_s5 + $0x408] sm:$0xff]  ;;  %v5857_v15 = vld [vmem:[%s10528_s5 + $0x418] sm:$0xff] }
 0x4d4   :  { %3764 = vst.msk [vmem:[#allocation2 + $0x31] ss:$8 sm:$0x3] %vm8238_vm4, %v3762_v2  ;;  %v5828_v2 = vld [vmem:[%s10528_s5 + $0x110] sm:$0xff]  ;;  %v5854_v46 = vld [vmem:[%s10528_s5 + $0x400] sm:$0xff]  ;;  %v5799_v19 = vld [vmem:[%s10528_s5 + $0x398] sm:$0xff] }
 0x4d5   :  { %v7456_v3 = vpack.c.bf16 %v5855_v52, %v5854_v46  ;;  %v5796_v7 = vld [vmem:[%s10528_s5 + $0x380] sm:$0xff]  ;;  %v5859_v20 = vld [vmem:[%s10528_s5 + $0x428] sm:$0xff]  ;;  %v5860_v29 = vld [vmem:[%s10528_s5 + $0x430] sm:$0xff] }
 0x4d6   :  { %v3771_v33 = vld [vmem:[#allocation2 + $0x28] sm:$0xfe]  ;;  %v3770_v23 = vld [vmem:[#allocation2 + $0x20] sm:$0xfe]  ;;  %v5861_v31 = vld [vmem:[%s10528_s5 + $0x438] sm:$0xff] }
 0x4d7   :  { %v3821_v40 = vrot.slane %v3771_v33, 1  ;;  %v3818_v4 = vrot.slane %v3770_v23, 1  ;;  %v9646_v8 = vld [vmem:[#allocation2 + $0x28] sm:$0xff]  ;;  %v5829_v33 = vld [vmem:[%s10528_s5 + $0x118] sm:$0xff]  ;;  %v7369_v23 = vpack.c.bf16 %v3795_v43, %v3794_v49  ;;  %v9761_v48 = vld [vmem:[#allocation2 + $0x20] sm:$0xff] }
 0x4d8   :  { %v7450_v1 = vpack.c.bf16 %v5829_v33, %v5828_v2  ;;  %v3775_v51 = vld [vmem:[#allocation2 + $0x28] sm:$0xfc]  ;;  %v5858_v54 = vld [vmem:[%s10528_s5 + $0x420] sm:$0xff]  ;;  %v5803_v35 = vld [vmem:[%s10528_s5 + $0x3b8] sm:$0xff] }
 0x4d9   :  { %v4011_v61 = vrot.slane %v3775_v51, 2  ;;  %v5801_v28 = vld [vmem:[%s10528_s5 + $0x3a8] sm:$0xff]  ;;  %v5862_v36 = vld [vmem:[%s10528_s5 + $0x440] sm:$0xff]  ;;  %v5864_v63 = vld [vmem:[%s10528_s5 + $0x450] sm:$0xff] }
 0x4da   :  { %v5863_v50 = vld [vmem:[%s10528_s5 + $0x448] sm:$0xff]  ;;  %v5865_v42 = vld [vmem:[%s10528_s5 + $0x458] sm:$0xff]  ;;  %v5866_v43 = vld [vmem:[%s10528_s5 + $0x460] sm:$0xff] }
 0x4db   :  { %v3773_v22 = vld [vmem:[#allocation2 + $0x38] sm:$0x3]  ;;  %v3772_v30 = vld [vmem:[#allocation2 + $0x30] sm:$0x3]  ;;  %v5805_v41 = vld [vmem:[%s10528_s5 + $0x3c8] sm:$0xff] }
 0x4dc   :  { %v9596_v44 = vrot.slane %v3773_v22, 1  ;;  %v9598_v27 = vrot.slane %v3772_v30, 1  ;;  %v5853_v22 = vld [vmem:[%s10528_s5 + $0x3f8] sm:$0xff]  ;;  %v7372_v30 = vpack.c.bf16 %v5793_v6, %v5792_v39  ;;  %v5867_v2 = vld [vmem:[%s10528_s5 + $0x468] sm:$0xff]  ;;  %v5868_v6 = vld [vmem:[%s10528_s5 + $0x470] sm:$0xff] }
 0x4dd   :  { %v5807_v49 = vld [vmem:[%s10528_s5 + $0x3d8] sm:$0xff]  ;;  %v5809_v39 = vld [vmem:[%s10528_s5 + $0x3e8] sm:$0xff] }
 0x4de   :  { %v9605_v47 = vsel %vm1243_vm7, %v3821_v40, %v9596_v44  ;;  %v9609_v14 = vsel %vm1243_vm7, %v3818_v4, %v9598_v27  ;;  %v3777_v40 = vld [vmem:[#allocation2 + $0x38] sm:$0x7]  ;;  %v7453_v4 = vpack.c.bf16 %v5853_v22, %v5852_v58  ;;  %v3776_v22 = vld [vmem:[#allocation2 + $0x30] sm:$0x7] }
 0x4df   :  { %5788 = vmatprep.mubr.msk.f32.mxu1 %vm1056_vm5, %v9605_v47  ;;  %5848 = vmatprep.mubr.msk.f32.mxu0 %vm1056_vm5, %v9605_v47  ;;  %v5869_v58 = vld [vmem:[%s10528_s5 + $0x478] sm:$0xff] }
 0x4e0   :  { %3895 = vmatmul.mubr.f32.vlgmr.msra.gmra.mrb[16].mxu1 %v9609_v14  ;;  %4198 = vmatmul.mubr.f32.vlgmr.msra.gmra.mrb[38].mxu0 %v9609_v14  ;;  %v5891_v46 = vld [vmem:[%s10528_s5 + $0x2d8] sm:$0xff] }
 0x4e1   :  { %7346 = vmatpush1.bf16.msra.mxu1 %v7345_v5  ;;  %7427 = vmatpush1.bf16.msra.mxu0 %v7426_v45  ;;  %v5794_v5 = vld [vmem:[%s10528_s5 + $0x370] sm:$0xff]  ;;  %v5795_v45 = vld [vmem:[%s10528_s5 + $0x378] sm:$0xff] }
 0x4e2   :  { %5789 = vmatprep.mubr.msk.f32.mxu1 %vm1056_vm5, %v9596_v44  ;;  %5849 = vmatprep.mubr.msk.f32.mxu0 %vm1056_vm5, %v9596_v44  ;;  %v7375_v60 = vpack.c.bf16 %v5795_v45, %v5794_v5  ;;  %v9888_v5 = vrot.slane %v3776_v22, 2  ;;  %v5890_v45 = vld [vmem:[%s10528_s5 + $0x2d0] sm:$0xff] }
 0x4e3   :  { %7347 = vmatprep.subr.bf16.mxu1 %v7917_v55  ;;  %7428 = vmatprep.subr.bf16.mxu0 %v7917_v55  ;;  %v7480_v52 = vpack.c.bf16 %v5891_v46, %v5890_v45  ;;  %v5912_v45 = vld [vmem:[%s10528_s5 + $0x480] sm:$0xff]  ;;  %v5913_v46 = vld [vmem:[%s10528_s5 + $0x488] sm:$0xff] }
 0x4e4   :  { %3900 = vmatmul.mubr.f32.gmra.mrb[18].mxu1 %v9598_v27  ;;  %4203 = vmatmul.mubr.f32.gmra.mrb[40].mxu0 %v9598_v27 }
 0x4e5   :  { %7349 = vmatpush1.bf16.msra.mxu1 %v7348_v53  ;;  %7430 = vmatpush1.bf16.msra.mxu0 %v7429_v57  ;;  %v9768_v53 = vld [vmem:[#allocation2 + $0x38] sm:$0x1]  ;;  %v9770_v57 = vrot.slane %v3777_v40, 2  ;;  %v7477_v40 = vpack.c.bf16 %v5869_v58, %v5868_v6  ;;  %v5886_v6 = vld [vmem:[%s10528_s5 + $0x190] sm:$0xff] }
 0x4e6   :  { %5790 = vmatprep.mubr.msk.f32.mxu1 %vm1056_vm5, %v9646_v8  ;;  %5850 = vmatprep.mubr.msk.f32.mxu0 %vm1056_vm5, %v9646_v8  ;;  %v5887_v58 = vld [vmem:[%s10528_s5 + $0x198] sm:$0xff] }
 0x4e7   :  { %7350 = vmatprep.subr.bf16.mxu1 %v7917_v55  ;;  %7431 = vmatprep.subr.bf16.mxu0 %v7917_v55  ;;  %v9796_v59 = vsel %vm1435_vm8, %v4011_v61, %v9770_v57  ;;  %v5892_v61 = vld [vmem:[%s10528_s5 + $0x2e0] sm:$0xff]  ;;  %v7528_v22 = vpack.c.bf16 %v5887_v58, %v5886_v6  ;;  %v5942_v58 = vld [vmem:[%s10530_s7 + $0x150] sm:$0xff] }
 0x4e9   :  { %7352 = vmatpush1.bf16.msra.mxu1 %v7351_v18  ;;  %7433 = vmatpush1.bf16.msra.mxu0 %v7432_v11  ;;  %v5797_v18 = vld [vmem:[%s10528_s5 + $0x388] sm:$0xff]  ;;  %v9782_v11 = vld [vmem:[#allocation2 + $0x30] sm:$0x1] }
 0x4ea   :  { %7353 = vmatprep.subr.bf16.mxu1 %v7917_v55  ;;  %7434 = vmatprep.subr.bf16.mxu0 %v7917_v55  ;;  %v7378_v62 = vpack.c.bf16 %v5797_v18, %v5796_v7  ;;  %v5894_v18 = vld [vmem:[%s10528_s5 + $0x2f0] sm:$0xff] }
 0x4ed   :  { %7355 = vmatpush1.bf16.msra.mxu1 %v7354_v17  ;;  %7436 = vmatpush1.bf16.msra.mxu0 %v7435_v12  ;;  %v7459_v17 = vpack.c.bf16 %v5857_v15, %v5856_v13  ;;  %v5798_v12 = vld [vmem:[%s10528_s5 + $0x390] sm:$0xff]  ;;  %v5895_v13 = vld [vmem:[%s10528_s5 + $0x2f8] sm:$0xff] }
 0x4ee   :  { %7356 = vmatprep.subr.bf16.mxu1 %v7917_v55  ;;  %7437 = vmatprep.subr.bf16.mxu0 %v7917_v55  ;;  %v7381_v21 = vpack.c.bf16 %v5799_v19, %v5798_v12  ;;  %v7486_v15 = vpack.c.bf16 %v5895_v13, %v5894_v18  ;;  %v5899_v19 = vld [vmem:[%s10528_s5 + $0x318] sm:$0xff]  ;;  %v5917_v18 = vld [vmem:[%s10528_s5 + $0x4a8] sm:$0xff] }
 0x4ef   :  { %v5919_v13 = vld [vmem:[%s10528_s5 + $0x4b8] sm:$0xff] }
 0x4f1   :  { %7358 = vmatpush1.bf16.msra.mxu1 %v7357_v25  ;;  %7439 = vmatpush1.bf16.msra.mxu0 %v7438_v26  ;;  %v7462_v25 = vpack.c.bf16 %v5859_v20, %v5858_v54  ;;  %v5800_v26 = vld [vmem:[%s10528_s5 + $0x3a0] sm:$0xff] }
 0x4f2   :  { %7359 = vmatprep.subr.bf16.mxu1 %v7917_v55  ;;  %7440 = vmatprep.subr.bf16.mxu0 %v7917_v55  ;;  %v7384_v32 = vpack.c.bf16 %v5801_v28, %v5800_v26  ;;  %v5900_v20 = vld [vmem:[%s10528_s5 + $0x320] sm:$0xff]  ;;  %v5902_v26 = vld [vmem:[%s10528_s5 + $0x330] sm:$0xff]  ;;  %v5903_v28 = vld [vmem:[%s10528_s5 + $0x338] sm:$0xff] }
 0x4f5   :  { %7361 = vmatpush1.bf16.msra.mxu1 %v7360_v34  ;;  %7442 = vmatpush1.bf16.msra.mxu0 %v7441_v10  ;;  %v7465_v34 = vpack.c.bf16 %v5861_v31, %v5860_v29  ;;  %v5802_v10 = vld [vmem:[%s10528_s5 + $0x3b0] sm:$0xff]  ;;  %v7498_v29 = vpack.c.bf16 %v5903_v28, %v5902_v26  ;;  %v5904_v31 = vld [vmem:[%s10528_s5 + $0x340] sm:$0xff]  ;;  %v5925_v28 = vld [vmem:[%s10528_s5 + $0x4e8] sm:$0xff] }
 0x4f6   :  { %7362 = vmatprep.subr.bf16.mxu1 %v7917_v55  ;;  %7443 = vmatprep.subr.bf16.mxu0 %v7917_v55  ;;  %v7387_v37 = vpack.c.bf16 %v5803_v35, %v5802_v10  ;;  %v5906_v10 = vld [vmem:[%s10528_s5 + $0x350] sm:$0xff]  ;;  %v5907_v35 = vld [vmem:[%s10528_s5 + $0x358] sm:$0xff]  ;;  %v5924_v26 = vld [vmem:[%s10528_s5 + $0x4e0] sm:$0xff] }
 0x4f9   :  { %7364 = vmatpush1.bf16.msra.mxu1 %v7363_v9  ;;  %7445 = vmatpush1.bf16.msra.mxu0 %v7444_v38  ;;  %v7468_v9 = vpack.c.bf16 %v5863_v50, %v5862_v36  ;;  %v5804_v38 = vld [vmem:[%s10528_s5 + $0x3c0] sm:$0xff]  ;;  %v7504_v36 = vpack.c.bf16 %v5907_v35, %v5906_v10 }
 0x4fa   :  { %7365 = vmatprep.subr.bf16.mxu1 %v7917_v55  ;;  %7446 = vmatprep.subr.bf16.mxu0 %v7917_v55  ;;  %v7390_v16 = vpack.c.bf16 %v5805_v41, %v5804_v38  ;;  %v5872_v50 = vld [vmem:[%s10528_s5 + $0x120] sm:$0xff]  ;;  %v5874_v38 = vld [vmem:[%s10528_s5 + $0x130] sm:$0xff]  ;;  %v5875_v41 = vld [vmem:[%s10528_s5 + $0x138] sm:$0xff] }
 0x4fb   :  { %v5928_v35 = vld [vmem:[%s10528_s5 + $0x500] sm:$0xff] }
 0x4fd   :  { %7367 = vmatpush1.bf16.msra.mxu1 %v7366_v56  ;;  %7448 = vmatpush1.bf16.msra.mxu0 %v7447_v24  ;;  %v7471_v56 = vpack.c.bf16 %v5865_v42, %v5864_v63  ;;  %v5806_v24 = vld [vmem:[%s10528_s5 + $0x3d0] sm:$0xff]  ;;  %v7510_v63 = vpack.c.bf16 %v5875_v41, %v5874_v38  ;;  %v5876_v42 = vld [vmem:[%s10528_s5 + $0x140] sm:$0xff] }
 0x4fe   :  { %7368 = vmatprep.subr.bf16.mxu1 %v7917_v55  ;;  %7449 = vmatprep.subr.bf16.mxu0 %v7917_v55  ;;  %v7393_v33 = vpack.c.bf16 %v5807_v49, %v5806_v24  ;;  %v5982_v41 = vld [vmem:[%s10530_s7 + $0x190] sm:$0xff] }
 0x501   :  { %7370 = vmatpush1.bf16.msra.mxu1 %v7369_v23  ;;  %7451 = vmatpush1.bf16.msra.mxu0 %v7450_v1  ;;  %v7474_v23 = vpack.c.bf16 %v5867_v2, %v5866_v43  ;;  %v5808_v1 = vld [vmem:[%s10528_s5 + $0x3e0] sm:$0xff]  ;;  %v5882_v43 = vld [vmem:[%s10528_s5 + $0x170] sm:$0xff]  ;;  %v5883_v2 = vld [vmem:[%s10528_s5 + $0x178] sm:$0xff] }
 0x502   :  { %7371 = vmatprep.subr.bf16.mxu1 %v7917_v55  ;;  %7452 = vmatprep.subr.bf16.mxu0 %v7917_v55 }
 0x504   :  { %3976 = vmatmul.mubr.f32.vlgmr.msra.gmra.mrb[16].mxu1 %v9761_v48  ;;  %4273 = vmatmul.mubr.f32.vlgmr.msra.gmra.mrb[38].mxu0 %v9761_v48 }
 0x505   :  { %5791 = vmatprep.mubr.msk.f32.mxu1 %vm1056_vm5, %v9768_v53  ;;  %7373 = vmatpush1.bf16.msra.mxu1 %v7372_v30  ;;  %v7396_v30 = vpack.c.bf16 %v5809_v39, %v5808_v1  ;;  %v5885_v1 = vld [vmem:[%s10528_s5 + $0x188] sm:$0xff] }
 0x506   :  { %5851 = vmatprep.mubr.msk.f32.mxu0 %vm1056_vm5, %v9768_v53  ;;  %7454 = vmatpush1.bf16.msra.mxu0 %v7453_v4  ;;  %v3774_v4 = vld [vmem:[#allocation2 + $0x20] sm:$0xfc] }
 0x507   :  { %7374 = vmatprep.subr.bf16.mxu1 %v7917_v55  ;;  %7455 = vmatprep.subr.bf16.mxu0 %v7917_v55  ;;  %v4008_v51 = vrot.slane %v3774_v4, 2 }
 0x508   :  { %3981 = vmatmul.mubr.f32.gmra.mrb[18].mxu1 %v9782_v11  ;;  %4278 = vmatmul.mubr.f32.gmra.mrb[40].mxu0 %v9782_v11 }
 0x509   :  { %7376 = vmatpush1.bf16.msra.mxu1 %v7375_v60  ;;  %5810 = vmatprep.mubr.msk.f32.mxu1 %vm1056_vm5, %v9796_v59  ;;  %v9899_v60 = vsel %vm1435_vm8, %v4008_v51, %v9888_v5  ;;  %v7534_v51 = vpack.c.bf16 %v5913_v46, %v5912_v45  ;;  %v5944_v45 = vld [vmem:[%s10530_s7 + $0x160] sm:$0xff]  ;;  %v5945_v46 = vld [vmem:[%s10530_s7 + $0x168] sm:$0xff] }
 0x50a   :  { %7457 = vmatpush1.bf16.msra.mxu0 %v7456_v3  ;;  %5870 = vmatprep.mubr.msk.f32.mxu0 %vm1056_vm5, %v9796_v59  ;;  %v5893_v3 = vld [vmem:[%s10528_s5 + $0x2e8] sm:$0xff] }
 0x50b   :  { %7377 = vmatprep.subr.bf16.mxu1 %v7917_v55  ;;  %7458 = vmatprep.subr.bf16.mxu0 %v7917_v55  ;;  %v7483_v7 = vpack.c.bf16 %v5893_v3, %v5892_v61  ;;  %v5915_v61 = vld [vmem:[%s10528_s5 + $0x498] sm:$0xff] }
 0x50d   :  { %7379 = vmatpush1.bf16.msra.mxu1 %v7378_v62  ;;  %v5896_v62 = vld [vmem:[%s10528_s5 + $0x300] sm:$0xff] }
 0x50e   :  { %7460 = vmatpush1.bf16.msra.mxu0 %v7459_v17  ;;  %7380 = vmatprep.subr.bf16.mxu1 %v7917_v55  ;;  %v5897_v17 = vld [vmem:[%s10528_s5 + $0x308] sm:$0xff] }
 0x50f   :  { %7461 = vmatprep.subr.bf16.mxu0 %v7917_v55  ;;  %v7489_v12 = vpack.c.bf16 %v5897_v17, %v5896_v62  ;;  %v5922_v17 = vld [vmem:[%s10528_s5 + $0x4d0] sm:$0xff] }
 0x511   :  { %7382 = vmatpush1.bf16.msra.mxu1 %v7381_v21  ;;  %v5901_v21 = vld [vmem:[%s10528_s5 + $0x328] sm:$0xff] }
 0x512   :  { %7463 = vmatpush1.bf16.msra.mxu0 %v7462_v25  ;;  %7383 = vmatprep.subr.bf16.mxu1 %v7917_v55  ;;  %v7495_v25 = vpack.c.bf16 %v5901_v21, %v5900_v20  ;;  %v5934_v21 = vld [vmem:[%s10530_s7 + $0x110] sm:$0xff] }
 0x513   :  { %7464 = vmatprep.subr.bf16.mxu0 %v7917_v55 }
 0x515   :  { %7385 = vmatpush1.bf16.msra.mxu1 %v7384_v32  ;;  %v5905_v32 = vld [vmem:[%s10528_s5 + $0x348] sm:$0xff] }
 0x516   :  { %7466 = vmatpush1.bf16.msra.mxu0 %v7465_v34  ;;  %7386 = vmatprep.subr.bf16.mxu1 %v7917_v55  ;;  %v7501_v34 = vpack.c.bf16 %v5905_v32, %v5904_v31  ;;  %v7552_v31 = vpack.c.bf16 %v5925_v28, %v5924_v26  ;;  %v5926_v32 = vld [vmem:[%s10528_s5 + $0x4f0] sm:$0xff] }
 0x517   :  { %7467 = vmatprep.subr.bf16.mxu0 %v7917_v55 }
 0x519   :  { %7388 = vmatpush1.bf16.msra.mxu1 %v7387_v37  ;;  %v5873_v37 = vld [vmem:[%s10528_s5 + $0x128] sm:$0xff] }
 0x51a   :  { %7469 = vmatpush1.bf16.msra.mxu0 %v7468_v9  ;;  %7389 = vmatprep.subr.bf16.mxu1 %v7917_v55  ;;  %v7507_v9 = vpack.c.bf16 %v5873_v37, %v5872_v50  ;;  %v5980_v37 = vld [vmem:[%s10530_s7 + $0x180] sm:$0xff] }
 0x51b   :  { %7470 = vmatprep.subr.bf16.mxu0 %v7917_v55 }
 0x51d   :  { %7391 = vmatpush1.bf16.msra.mxu1 %v7390_v16  ;;  %v5877_v16 = vld [vmem:[%s10528_s5 + $0x148] sm:$0xff] }
 0x51e   :  { %7472 = vmatpush1.bf16.msra.mxu0 %v7471_v56  ;;  %7392 = vmatprep.subr.bf16.mxu1 %v7917_v55  ;;  %v5879_v56 = vld [vmem:[%s10528_s5 + $0x158] sm:$0xff] }
 0x51f   :  { %7473 = vmatprep.subr.bf16.mxu0 %v7917_v55 }
 0x521   :  { %7394 = vmatpush1.bf16.msra.mxu1 %v7393_v33  ;;  %v7522_v33 = vpack.c.bf16 %v5883_v2, %v5882_v43  ;;  %v5940_v2 = vld [vmem:[%s10530_s7 + $0x140] sm:$0xff] }
 0x522   :  { %7475 = vmatpush1.bf16.msra.mxu0 %v7474_v23  ;;  %7395 = vmatprep.subr.bf16.mxu1 %v7917_v55  ;;  %v5884_v23 = vld [vmem:[%s10528_s5 + $0x180] sm:$0xff] }
 0x523   :  { %7476 = vmatprep.subr.bf16.mxu0 %v7917_v55  ;;  %v7525_v39 = vpack.c.bf16 %v5885_v1, %v5884_v23  ;;  %v5988_v23 = vld [vmem:[%s10530_s7 + $0x1c0] sm:$0xff] }
 0x525   :  { %7397 = vmatpush1.bf16.msra.mxu1 %v7396_v30  ;;  %v5888_v30 = vld [vmem:[%s10528_s5 + $0x1a0] sm:$0xff] }
 0x526   :  { %7478 = vmatpush1.bf16.msra.mxu0 %v7477_v40  ;;  %7479 = vmatprep.subr.bf16.mxu1 %v7917_v55  ;;  %v5889_v40 = vld [vmem:[%s10528_s5 + $0x1a8] sm:$0xff] }
 0x527   :  { %7560 = vmatprep.subr.bf16.mxu0 %v7917_v55  ;;  %v7531_v4 = vpack.c.bf16 %v5889_v40, %v5888_v30  ;;  %v5990_v30 = vld [vmem:[%s10530_s7 + $0x1d0] sm:$0xff] }
 0x528   :  { %4085 = vmatmul.mubr.f32.vlgmr.msra.gmra.mrb[16].mxu1 %v9899_v60 }
 0x529   :  { %4366 = vmatmul.mubr.f32.vlgmr.msra.gmra.mrb[38].mxu0 %v9899_v60  ;;  %5811 = vmatprep.mubr.msk.f32.mxu1 %vm1056_vm5, %v9770_v57 }
 0x52a   :  { %5871 = vmatprep.mubr.msk.f32.mxu0 %vm1056_vm5, %v9770_v57  ;;  %7481 = vmatpush1.bf16.msra.mxu1 %v7480_v52  ;;  %v5914_v52 = vld [vmem:[%s10528_s5 + $0x490] sm:$0xff] }
 0x52b   :  { %7482 = vmatprep.subr.bf16.mxu1 %v7917_v55  ;;  %v7537_v3 = vpack.c.bf16 %v5915_v61, %v5914_v52  ;;  %v5992_v52 = vld [vmem:[%s10530_s7 + $0x1e0] sm:$0xff]  ;;  %v5993_v61 = vld [vmem:[%s10530_s7 + $0x1e8] sm:$0xff] }
 0x52c   :  { %4090 = vmatmul.mubr.f32.gmra.mrb[18].mxu1 %v9888_v5 }
 0x52d   :  { %4371 = vmatmul.mubr.f32.gmra.mrb[40].mxu0 %v9888_v5  ;;  %5908 = vmatprep.mubr.msk.f32.mxu1 %vm1056_vm5, %v9605_v47  ;;  %v5898_v47 = vld [vmem:[%s10528_s5 + $0x310] sm:$0xff] }
 0x52e   :  { %7484 = vmatpush1.bf16.msra.mxu1 %v7483_v7  ;;  %6474 = vmatprep.mubr.msk.f32.mxu0 %vm7918_vm9, %v7915_v0  ;;  %v7492_v54 = vpack.c.bf16 %v5899_v19, %v5898_v47  ;;  %v5916_v7 = vld [vmem:[%s10528_s5 + $0x4a0] sm:$0xff]  ;;  %v5933_v19 = vld [vmem:[%s10530_s7 + $0x108] sm:$0xff] }
 0x52f   :  { %7485 = vmatprep.subr.bf16.mxu1 %v7917_v55  ;;  %v5932_v47 = vld [vmem:[%s10530_s7 + $0x100] sm:$0xff] }
 0x530   :  { %v7561_v20 = vpack.c.bf16 %v5933_v19, %v5932_v47 }
 0x532   :  { %7487 = vmatpush1.bf16.msra.mxu1 %v7486_v15  ;;  %7562 = vmatpush3.bf16.msra.mxu0 %v7561_v20 }
 0x533   :  { %7488 = vmatprep.subr.bf16.mxu1 %v7917_v55  ;;  %7563 = vmatprep.subr.bf16.mxu0 %v7917_v55 }
 0x536   :  { %7490 = vmatpush1.bf16.msra.mxu1 %v7489_v12  ;;  %v5923_v12 = vld [vmem:[%s10528_s5 + $0x4d8] sm:$0xff] }
 0x537   :  { %7491 = vmatprep.subr.bf16.mxu1 %v7917_v55 }
 0x53a   :  { %7493 = vmatpush1.bf16.msra.mxu1 %v7492_v54  ;;  %v7549_v54 = vpack.c.bf16 %v5923_v12, %v5922_v17 }
 0x53b   :  { %7494 = vmatprep.subr.bf16.mxu1 %v7917_v55 }
 0x53e   :  { %7496 = vmatpush1.bf16.msra.mxu1 %v7495_v25  ;;  %v5935_v25 = vld [vmem:[%s10530_s7 + $0x118] sm:$0xff] }
 0x53f   :  { %7497 = vmatprep.subr.bf16.mxu1 %v7917_v55 }
 0x542   :  { %7499 = vmatpush1.bf16.msra.mxu1 %v7498_v29  ;;  %v7564_v29 = vpack.c.bf16 %v5935_v25, %v5934_v21 }
 0x543   :  { %7500 = vmatprep.subr.bf16.mxu1 %v7917_v55 }
 0x544   :  { %7565 = vmatpush3.bf16.msra.mxu0 %v7564_v29 }
 0x545   :  { %7566 = vmatprep.subr.bf16.mxu0 %v7917_v55 }
 0x546   :  { %7502 = vmatpush1.bf16.msra.mxu1 %v7501_v34  ;;  %v5927_v34 = vld [vmem:[%s10528_s5 + $0x4f8] sm:$0xff] }
 0x547   :  { %7503 = vmatprep.subr.bf16.mxu1 %v7917_v55  ;;  %v7555_v10 = vpack.c.bf16 %v5927_v34, %v5926_v32 }
 0x54a   :  { %7505 = vmatpush1.bf16.msra.mxu1 %v7504_v36  ;;  %v5929_v36 = vld [vmem:[%s10528_s5 + $0x508] sm:$0xff] }
 0x54b   :  { %7506 = vmatprep.subr.bf16.mxu1 %v7917_v55  ;;  %v7558_v50 = vpack.c.bf16 %v5929_v36, %v5928_v35  ;;  %v4665_v36 = vld [vmem:[%s10529_s6] sm:$0x1] }
 0x54d   :  { %4481 = vmatmul.mubr.f32.vlgmr.msra.gmra.mrb[20].mxu1 %v9609_v14  ;;  %v7513_v14 = vpack.c.bf16 %v5877_v16, %v5876_v42  ;;  %v5936_v16 = vld [vmem:[%s10530_s7 + $0x120] sm:$0xff] }
 0x54e   :  { %5909 = vmatprep.mubr.msk.f32.mxu1 %vm1056_vm5, %v9596_v44  ;;  %7508 = vmatpush1.bf16.msra.mxu1 %v7507_v9  ;;  %v5878_v44 = vld [vmem:[%s10528_s5 + $0x150] sm:$0xff]  ;;  %v5981_v9 = vld [vmem:[%s10530_s7 + $0x188] sm:$0xff] }
 0x54f   :  { %7509 = vmatprep.subr.bf16.mxu1 %v7917_v55  ;;  %v7516_v24 = vpack.c.bf16 %v5879_v56, %v5878_v44  ;;  %v7633_v38 = vpack.c.bf16 %v5981_v9, %v5980_v37  ;;  %v5938_v56 = vld [vmem:[%s10530_s7 + $0x130] sm:$0xff] }
 0x551   :  { %4486 = vmatmul.mubr.f32.gmra.mrb[22].mxu1 %v9598_v27  ;;  %v5880_v27 = vld [vmem:[%s10528_s5 + $0x160] sm:$0xff] }
 0x552   :  { %7511 = vmatpush1.bf16.msra.mxu1 %v7510_v63  ;;  %5910 = vmatprep.mubr.msk.f32.mxu1 %vm1056_vm5, %v9646_v8  ;;  %v5881_v8 = vld [vmem:[%s10528_s5 + $0x168] sm:$0xff]  ;;  %v5983_v63 = vld [vmem:[%s10530_s7 + $0x198] sm:$0xff] }
 0x553   :  { %7512 = vmatprep.subr.bf16.mxu1 %v7917_v55  ;;  %v7519_v49 = vpack.c.bf16 %v5881_v8, %v5880_v27  ;;  %v7636_v42 = vpack.c.bf16 %v5983_v63, %v5982_v41  ;;  %v5986_v27 = vld [vmem:[%s10530_s7 + $0x1b0] sm:$0xff] }
 0x556   :  { %7514 = vmatpush1.bf16.msra.mxu1 %v7513_v14 }
 0x557   :  { %7515 = vmatprep.subr.bf16.mxu1 %v7917_v55 }
 0x55a   :  { %7517 = vmatpush1.bf16.msra.mxu1 %v7516_v24  ;;  %v5939_v24 = vld [vmem:[%s10530_s7 + $0x138] sm:$0xff] }
 0x55b   :  { %7518 = vmatprep.subr.bf16.mxu1 %v7917_v55  ;;  %v7570_v8 = vpack.c.bf16 %v5939_v24, %v5938_v56 }
 0x55e   :  { %7520 = vmatpush1.bf16.msra.mxu1 %v7519_v49  ;;  %v5987_v49 = vld [vmem:[%s10530_s7 + $0x1b8] sm:$0xff] }
 0x55f   :  { %7521 = vmatprep.subr.bf16.mxu1 %v7917_v55  ;;  %v7642_v43 = vpack.c.bf16 %v5987_v49, %v5986_v27 }
 0x562   :  { %7523 = vmatpush1.bf16.msra.mxu1 %v7522_v33  ;;  %v5941_v33 = vld [vmem:[%s10530_s7 + $0x148] sm:$0xff] }
 0x563   :  { %7524 = vmatprep.subr.bf16.mxu1 %v7917_v55  ;;  %v7573_v1 = vpack.c.bf16 %v5941_v33, %v5940_v2 }
 0x566   :  { %7526 = vmatpush1.bf16.msra.mxu1 %v7525_v39  ;;  %v5989_v39 = vld [vmem:[%s10530_s7 + $0x1c8] sm:$0xff] }
 0x567   :  { %7527 = vmatprep.subr.bf16.mxu1 %v7917_v55  ;;  %v7645_v6 = vpack.c.bf16 %v5989_v39, %v5988_v23 }
 0x56a   :  { %7529 = vmatpush1.bf16.msra.mxu1 %v7528_v22  ;;  %v5943_v22 = vld [vmem:[%s10530_s7 + $0x158] sm:$0xff] }
 0x56b   :  { %7530 = vmatprep.subr.bf16.mxu1 %v7917_v55  ;;  %v7576_v40 = vpack.c.bf16 %v5943_v22, %v5942_v58  ;;  %v4702_v22 = vld [vmem:[%s10530_s7] sm:$0xff] }
 0x56e   :  { %7532 = vmatpush1.bf16.msra.mxu1 %v7531_v4  ;;  %v5991_v4 = vld [vmem:[%s10530_s7 + $0x1d8] sm:$0xff] }
 0x56f   :  { %7533 = vmatprep.subr.bf16.mxu1 %v7917_v55 }
 0x571   :  { %4556 = vmatmul.mubr.f32.vlgmr.msra.gmra.mrb[20].mxu1 %v9761_v48  ;;  %v7540_v48 = vpack.c.bf16 %v5917_v18, %v5916_v7  ;;  %v7651_v7 = vpack.c.bf16 %v5993_v61, %v5992_v52  ;;  %v5946_v18 = vld [vmem:[%s10530_s7 + $0x170] sm:$0xff]  ;;  %v4705_v52 = vld [vmem:[%s10530_s7 + $0x18] sm:$0xff] }
 0x572   :  { %5911 = vmatprep.mubr.msk.f32.mxu1 %vm1056_vm5, %v9768_v53  ;;  %7535 = vmatpush1.bf16.msra.mxu1 %v7534_v51  ;;  %v5918_v53 = vld [vmem:[%s10528_s5 + $0x4b0] sm:$0xff]  ;;  %v7648_v51 = vpack.c.bf16 %v5991_v4, %v5990_v30  ;;  %v4703_v30 = vld [vmem:[%s10530_s7 + $0x8] sm:$0xff] }
 0x573   :  { %7536 = vmatprep.subr.bf16.mxu1 %v7917_v55  ;;  %v7543_v15 = vpack.c.bf16 %v5919_v13, %v5918_v53  ;;  %v5994_v13 = vld [vmem:[%s10530_s7 + $0x1f0] sm:$0xff]  ;;  %v5965_v4 = vld [vmem:[%s10530_s7 + $0x88] sm:$0xff] }
 0x574   :  { %v5966_v61 = vld [vmem:[%s10530_s7 + $0x90] sm:$0xff] }
 0x575   :  { %4561 = vmatmul.mubr.f32.gmra.mrb[22].mxu1 %v9782_v11  ;;  %v5920_v11 = vld [vmem:[%s10528_s5 + $0x4c0] sm:$0xff] }
 0x576   :  { %7538 = vmatpush1.bf16.msra.mxu1 %v7537_v3  ;;  %5930 = vmatprep.mubr.msk.f32.mxu1 %vm1056_vm5, %v9796_v59  ;;  %v5921_v59 = vld [vmem:[%s10528_s5 + $0x4c8] sm:$0xff]  ;;  %v7579_v3 = vpack.c.bf16 %v5945_v46, %v5944_v45  ;;  %v7585_v45 = vpack.c.bf16 %v4703_v30, %v4702_v22  ;;  %v5952_v22 = vld [vmem:[%s10530_s7 + $0x220] sm:$0xff] }
 0x577   :  { %7539 = vmatprep.subr.bf16.mxu1 %v7917_v55  ;;  %v7546_v62 = vpack.c.bf16 %v5921_v59, %v5920_v11  ;;  %v5953_v30 = vld [vmem:[%s10530_s7 + $0x228] sm:$0xff] }
 0x57a   :  { %7541 = vmatpush1.bf16.msra.mxu1 %v7540_v48  ;;  %v5947_v48 = vld [vmem:[%s10530_s7 + $0x178] sm:$0xff] }
 0x57b   :  { %7542 = vmatprep.subr.bf16.mxu1 %v7917_v55  ;;  %v7582_v12 = vpack.c.bf16 %v5947_v48, %v5946_v18 }
 0x57e   :  { %7544 = vmatpush1.bf16.msra.mxu1 %v7543_v15  ;;  %v5995_v15 = vld [vmem:[%s10530_s7 + $0x1f8] sm:$0xff] }
 0x57f   :  { %7545 = vmatprep.subr.bf16.mxu1 %v7917_v55  ;;  %v7654_v47 = vpack.c.bf16 %v5995_v15, %v5994_v13  ;;  %v4707_v13 = vld [vmem:[%s10530_s7 + $0x28] sm:$0xff]  ;;  %v5968_v15 = vld [vmem:[%s10530_s7 + $0xa0] sm:$0xff] }
 0x582   :  { %7547 = vmatpush1.bf16.msra.mxu1 %v7546_v62 }
 0x583   :  { %7548 = vmatprep.subr.bf16.mxu1 %v7917_v55 }
 0x586   :  { %7550 = vmatpush1.bf16.msra.mxu1 %v7549_v54 }
 0x587   :  { %7551 = vmatprep.subr.bf16.mxu1 %v7917_v55 }
 0x58a   :  { %7553 = vmatpush1.bf16.msra.mxu1 %v7552_v31 }
 0x58b   :  { %7554 = vmatprep.subr.bf16.mxu1 %v7917_v55 }
 0x58e   :  { %7556 = vmatpush1.bf16.msra.mxu1 %v7555_v10 }
 0x58f   :  { %7557 = vmatprep.subr.bf16.mxu1 %v7917_v55 }
 0x592   :  { %7559 = vmatpush1.bf16.msra.mxu1 %v7558_v50 }
 0x593   :  { %7632 = vmatprep.subr.bf16.mxu1 %v7917_v55 }
 0x595   :  { %4649 = vmatmul.mubr.f32.vlgmr.msra.gmra.mrb[20].mxu1 %v9899_v60  ;;  %v5984_v60 = vld [vmem:[%s10530_s7 + $0x1a0] sm:$0xff] }
 0x596   :  { %5931 = vmatprep.mubr.msk.f32.mxu1 %vm1056_vm5, %v9770_v57  ;;  %7634 = vmatpush3.bf16.msra.mxu1 %v7633_v38  ;;  %v5937_v57 = vld [vmem:[%s10530_s7 + $0x128] sm:$0xff] }
 0x597   :  { %7635 = vmatprep.subr.bf16.mxu1 %v7917_v55  ;;  %v7567_v14 = vpack.c.bf16 %v5937_v57, %v5936_v16 }
 0x599   :  { %4654 = vmatmul.mubr.f32.gmra.mrb[22].mxu1 %v9888_v5  ;;  %v5985_v5 = vld [vmem:[%s10530_s7 + $0x1a8] sm:$0xff]  ;;  %7568 = vmatpush3.bf16.msra.mxu0 %v7567_v14 }
 0x59a   :  { %7637 = vmatpush3.bf16.msra.mxu1 %v7636_v42  ;;  %6579 = vmatprep.mubr.msk.f32.mxu1 %vm7918_vm9, %v7915_v0  ;;  %v7639_v44 = vpack.c.bf16 %v5985_v5, %v5984_v60 }
 0x59b   :  { %7638 = vmatprep.subr.bf16.mxu1 %v7917_v55  ;;  %7569 = vmatprep.subr.bf16.mxu0 %v7917_v55 }
 0x59d   :  { %7571 = vmatpush3.bf16.msra.mxu0 %v7570_v8 }
 0x59e   :  { %7640 = vmatpush3.bf16.msra.mxu1 %v7639_v44  ;;  %7572 = vmatprep.subr.bf16.mxu0 %v7917_v55 }
 0x59f   :  { %7641 = vmatprep.subr.bf16.mxu1 %v7917_v55 }
 0x5a1   :  { %7574 = vmatpush3.bf16.msra.mxu0 %v7573_v1 }
 0x5a2   :  { %7643 = vmatpush3.bf16.msra.mxu1 %v7642_v43  ;;  %7575 = vmatprep.subr.bf16.mxu0 %v7917_v55 }
 0x5a3   :  { %7644 = vmatprep.subr.bf16.mxu1 %v7917_v55 }
 0x5a5   :  { %7577 = vmatpush3.bf16.msra.mxu0 %v7576_v40  ;;  %v5964_v40 = vld [vmem:[%s10530_s7 + $0x80] sm:$0xff] }
 0x5a6   :  { %7646 = vmatpush3.bf16.msra.mxu1 %v7645_v6  ;;  %7578 = vmatprep.subr.bf16.mxu0 %v7917_v55  ;;  %v7657_v46 = vpack.c.bf16 %v5965_v4, %v5964_v40  ;;  %v6000_v40 = vld [vmem:[%s10530_s7 + $0x2a0] sm:$0xff]  ;;  %v6001_v4 = vld [vmem:[%s10530_s7 + $0x2a8] sm:$0xff] }
 0x5a7   :  { %7647 = vmatprep.subr.bf16.mxu1 %v7917_v55 }
 0x5a9   :  { %7580 = vmatpush3.bf16.msra.mxu0 %v7579_v3  ;;  %v5967_v3 = vld [vmem:[%s10530_s7 + $0x98] sm:$0xff] }
 0x5aa   :  { %7649 = vmatpush3.bf16.msra.mxu1 %v7648_v51  ;;  %7581 = vmatprep.subr.bf16.mxu0 %v7917_v55  ;;  %v4704_v51 = vld [vmem:[%s10530_s7 + $0x10] sm:$0xff]  ;;  %v7660_v48 = vpack.c.bf16 %v5967_v3, %v5966_v61  ;;  %v6003_v3 = vld [vmem:[%s10530_s7 + $0x2b8] sm:$0xff] }
 0x5ab   :  { %7650 = vmatprep.subr.bf16.mxu1 %v7917_v55  ;;  %v7588_v18 = vpack.c.bf16 %v4705_v52, %v4704_v51  ;;  %v5954_v51 = vld [vmem:[%s10530_s7 + $0x230] sm:$0xff]  ;;  %v5955_v52 = vld [vmem:[%s10530_s7 + $0x238] sm:$0xff] }
 0x5ac   :  { %v6002_v61 = vld [vmem:[%s10530_s7 + $0x2b0] sm:$0xff] }
 0x5ad   :  { %7583 = vmatpush3.bf16.msra.mxu0 %v7582_v12  ;;  %v4709_v12 = vld [vmem:[%s10530_s7 + $0x38] sm:$0xff] }
 0x5ae   :  { %7652 = vmatpush3.bf16.msra.mxu1 %v7651_v7  ;;  %7584 = vmatprep.subr.bf16.mxu0 %v7917_v55 }
 0x5af   :  { %7653 = vmatprep.subr.bf16.mxu1 %v7917_v55 }
 0x5b2   :  { %7655 = vmatpush3.bf16.msra.mxu1 %v7654_v47  ;;  %v5970_v47 = vld [vmem:[%s10530_s7 + $0xb0] sm:$0xff] }
 0x5b3   :  { %7656 = vmatprep.subr.bf16.mxu1 %v7917_v55 }
 0x5fb   :  { %v4086_v53 = vpop.f32.mrb[16].mxu1 }
 0x5fc   :  { %v4367_v11 = vpop.f32.mrb[38].mxu0  ;;  %v4088_v59 = vpop.f32.mrb[17].mxu1 }
 0x5fd   :  { %v4378_v62 = vmax.f32 %v4086_v53, %v4367_v11  ;;  %v4369_v17 = vpop.f32.mrb[39].mxu0  ;;  %v4706_v53 = vld [vmem:[%s10530_s7 + $0x20] sm:$0xff]  ;;  %v5969_v11 = vld [vmem:[%s10530_s7 + $0xa8] sm:$0xff] }
 0x5fe   :  { %v7591_v59 = vpack.c.bf16 %v4707_v13, %v4706_v53  ;;  %v4708_v17 = vld [vmem:[%s10530_s7 + $0x30] sm:$0xff]  ;;  %v5957_v53 = vld [vmem:[%s10530_s7 + $0x248] sm:$0xff]  ;;  %v6004_v13 = vld [vmem:[%s10530_s7 + $0x2c0] sm:$0xff] }
 0x5ff   :  { %v4091_v19 = vpop.f32.mrb[18].mxu1 }
 0x600   :  { %v4372_v54 = vpop.f32.mrb[40].mxu0  ;;  %v4093_v20 = vpop.f32.mrb[19].mxu1 }
 0x601   :  { %v4379_v21 = vmax.f32 %v4091_v19, %v4372_v54  ;;  %v4374_v25 = vpop.f32.mrb[41].mxu0  ;;  %v5971_v19 = vld [vmem:[%s10530_s7 + $0xb8] sm:$0xff]  ;;  %v7594_v54 = vpack.c.bf16 %v4709_v12, %v4708_v17  ;;  %v6006_v12 = vld [vmem:[%s10530_s7 + $0x2d0] sm:$0xff] }
 0x602   :  { %v7666_v20 = vpack.c.bf16 %v5971_v19, %v5970_v47  ;;  %v4711_v25 = vld [vmem:[%s10530_s7 + $0x48] sm:$0xff]  ;;  %v5959_v17 = vld [vmem:[%s10530_s7 + $0x258] sm:$0xff] }
 0x603   :  { %v6007_v47 = vld [vmem:[%s10530_s7 + $0x2d8] sm:$0xff] }
 0x668   :  { %v4650_v26 = vpop.f32.mrb[20].mxu1 }
 0x669   :  { %v4661_v28 = vmax.f32 %v4378_v62, %v4650_v26  ;;  %v4652_v29 = vpop.f32.mrb[21].mxu1  ;;  %v7663_v62 = vpack.c.bf16 %v5969_v11, %v5968_v15  ;;  %v5972_v26 = vld [vmem:[%s10530_s7 + $0xc0] sm:$0xff]  ;;  %v6005_v15 = vld [vmem:[%s10530_s7 + $0x2c8] sm:$0xff] }
 0x66b   :  { %4663 = vst [vmem:[#allocation6] sm:$0xff] %v4661_v28  ;;  %v5973_v28 = vld [vmem:[%s10530_s7 + $0xc8] sm:$0xff] }
 0x66c   :  { %v4655_v31 = vpop.f32.mrb[22].mxu1 }
 0x66d   :  { %v4662_v32 = vmax.f32 %v4379_v21, %v4655_v31  ;;  %v4657_v34 = vpop.f32.mrb[23].mxu1  ;;  %v4710_v21 = vld [vmem:[%s10530_s7 + $0x40] sm:$0xff]  ;;  %v7669_v31 = vpack.c.bf16 %v5973_v28, %v5972_v26  ;;  %v6009_v26 = vld [vmem:[%s10530_s7 + $0x2e8] sm:$0xff] }
 0x66e   :  { %v7597_v29 = vpack.c.bf16 %v4711_v25, %v4710_v21  ;;  %v4713_v34 = vld [vmem:[%s10530_s7 + $0x58] sm:$0xff]  ;;  %v5961_v21 = vld [vmem:[%s10530_s7 + $0x268] sm:$0xff]  ;;  %v6008_v25 = vld [vmem:[%s10530_s7 + $0x2e0] sm:$0xff] }
 0x66f   :  { %4664 = vst [vmem:[#allocation6 + $0x8] sm:$0x1] %v4662_v32  ;;  %v4712_v32 = vld [vmem:[%s10530_s7 + $0x50] sm:$0xff] }
 0x672   :  { %v4675_v10 = vld [vmem:[#allocation6 + $0x2] sm:$0x1]  ;;  %v4676_v35 = vld [vmem:[#allocation6 + $0x3] sm:$0x1]  ;;  %v4683_v37 = vld [vmem:[#allocation6 + $0x4] sm:$0x1] }
 0x673   :  { %v4677_v50 = vmax.f32 %v4675_v10, %v4676_v35  ;;  %v4684_v9 = vld [vmem:[#allocation6 + $0x5] sm:$0x1]  ;;  %v4678_v38 = vld [vmem:[#allocation6 + $0x4] sm:$0x1]  ;;  %v4666_v63 = vld [vmem:[#allocation6] sm:$0x1] }
 0x674   :  { %v4685_v41 = vmax.f32 %v4683_v37, %v4684_v9  ;;  %v4667_v42 = vld [vmem:[#allocation6 + $0x1] sm:$0x1]  ;;  %v4686_v57 = vld [vmem:[#allocation6 + $0x6] sm:$0x1]  ;;  %v4692_v5 = vld [vmem:[#allocation6 + $0x7] sm:$0x1] }
 0x675   :  { %v4679_v16 = vmax.f32 %v4677_v50, %v4678_v38  ;;  %v4668_v60 = vmax.f32 %v4666_v63, %v4667_v42  ;;  %v4691_v14 = vld [vmem:[#allocation6 + $0x6] sm:$0x1]  ;;  %v4669_v24 = vld [vmem:[#allocation6 + $0x2] sm:$0x1]  ;;  %v5974_v10 = vld [vmem:[%s10530_s7 + $0xd0] sm:$0xff] }
 0x676   :  { %v4694_v44 = vld [vmem:[#allocation6 + $0x8] sm:$0x1]  ;;  %v4687_v56 = vmax.f32 %v4685_v41, %v4686_v57  ;;  %v4693_v27 = vmax.f32 %v4691_v14, %v4692_v5  ;;  %v5975_v35 = vld [vmem:[%s10530_s7 + $0xd8] sm:$0xff]  ;;  %v4715_v9 = vld [vmem:[%s10530_s7 + $0x68] sm:$0xff] }
 0x677   :  { %v4680_v8 = vadd.f32 %v4679_v16, %v4665_v36  ;;  %v4670_v49 = vmax.f32 %v4668_v60, %v4669_v24  ;;  %v7672_v50 = vpack.c.bf16 %v5975_v35, %v5974_v10  ;;  %v4714_v37 = vld [vmem:[%s10530_s7 + $0x60] sm:$0xff]  ;;  %v5977_v41 = vld [vmem:[%s10530_s7 + $0xe8] sm:$0xff]  ;;  %v4716_v16 = vld [vmem:[%s10530_s7 + $0x70] sm:$0xff] }
 0x678   :  { %v4688_v43 = vadd.f32 %v4687_v56, %v4665_v36  ;;  %v4695_v2 = vmax.f32 %v4693_v27, %v4694_v44  ;;  %v5976_v38 = vld [vmem:[%s10530_s7 + $0xe0] sm:$0xff]  ;;  %v7603_v63 = vpack.c.bf16 %v4715_v9, %v4714_v37  ;;  %v4717_v57 = vld [vmem:[%s10530_s7 + $0x78] sm:$0xff]  ;;  %v5978_v60 = vld [vmem:[%s10530_s7 + $0xf0] sm:$0xff] }
 0x679   :  { %v4681_v33 = vmax.f32 %v4680_v8, 0.0  ;;  %v4671_v23 = vadd.f32 %v4670_v49, %v4665_v36  ;;  %v7675_v42 = vpack.c.bf16 %v5977_v41, %v5976_v38  ;;  %v5979_v14 = vld [vmem:[%s10530_s7 + $0xf8] sm:$0xff]  ;;  %v7606_v5 = vpack.c.bf16 %v4717_v57, %v4716_v16  ;;  %v5948_v56 = vld [vmem:[%s10530_s7 + $0x200] sm:$0xff]  ;;  %v5949_v24 = vld [vmem:[%s10530_s7 + $0x208] sm:$0xff] }
 0x67a   :  { %v4689_v1 = vmax.f32 %v4688_v43, 0.0  ;;  %v4696_v39 = vadd.f32 %v4695_v2, %v4665_v36  ;;  %v7600_v36 = vpack.c.bf16 %v4713_v34, %v4712_v32  ;;  %v7678_v44 = vpack.c.bf16 %v5979_v14, %v5978_v60  ;;  %v5996_v27 = vld [vmem:[%s10530_s7 + $0x280] sm:$0xff]  ;;  %v5997_v8 = vld [vmem:[%s10530_s7 + $0x288] sm:$0xff]  ;;  %v5950_v2 = vld [vmem:[%s10530_s7 + $0x210] sm:$0xff] }
 0x67b   :  { %4682 = vst [vmem:[#allocation3 + $0x5] sm:$0x1] %v4681_v33  ;;  %v4672_v6 = vmax.f32 %v4671_v23, 0.0  ;;  %v7609_v49 = vpack.c.bf16 %v5949_v24, %v5948_v56  ;;  %v7681_v43 = vpack.c.bf16 %v5997_v8, %v5996_v27  ;;  %v5951_v33 = vld [vmem:[%s10530_s7 + $0x218] sm:$0xff]  ;;  %v5998_v23 = vld [vmem:[%s10530_s7 + $0x290] sm:$0xff]  ;;  %v5230_v37 = vld [vmem:[%s10532_s9] sm:$0xff] }
 0x67c   :  { %4690 = vst [vmem:[#allocation3 + $0x6] sm:$0x1] %v4689_v1  ;;  %v4697_v58 = vmax.f32 %v4696_v39, 0.0  ;;  %v5999_v1 = vld [vmem:[%s10530_s7 + $0x298] sm:$0xff]  ;;  %v6010_v34 = vld [vmem:[%s10530_s7 + $0x2f0] sm:$0xff]  ;;  %v5231_v9 = vld [vmem:[%s10532_s9 + $0x8] sm:$0xff] }
 0x67d   :  { %4674 = vst [vmem:[#allocation3 + $0x4] sm:$0x1] %v4672_v6  ;;  %v7612_v6 = vpack.c.bf16 %v5951_v33, %v5950_v2  ;;  %v5963_v32 = vld [vmem:[%s10530_s7 + $0x278] sm:$0xff]  ;;  %v5232_v38 = vld [vmem:[%s10532_s9 + $0x10] sm:$0xff]  ;;  %v7705_v41 = vpack.c.bf16 %v5231_v9, %v5230_v37  ;;  %v5235_v16 = vld [vmem:[%s10532_s9 + $0x28] sm:$0xff] }
 0x67e   :  { %4698 = vst [vmem:[#allocation3 + $0x7] sm:$0x1] %v4697_v58  ;;  %v7684_v58 = vpack.c.bf16 %v5999_v1, %v5998_v23  ;;  %v6011_v10 = vld [vmem:[%s10530_s7 + $0x2f8] sm:$0xff]  ;;  %v5236_v60 = vld [vmem:[%s10532_s9 + $0x30] sm:$0xff] }
 0x67f   :  { %v5237_v14 = vld [vmem:[%s10532_s9 + $0x38] sm:$0xff] }
 0x683   :  { %v4700_v7 = vld [vmem:[#allocation3 + $0x5] sm:$0x3] }
 0x684   :  { %6475 = vmatmul.mubr.f32.vlgmr.msra.gmra.mrb[42].mxu0 %v4700_v7  ;;  %6580 = vmatmul.mubr.f32.vlgmr.msra.gmra.mrb[24].mxu1 %v4700_v7  ;;  %v4699_v39 = vld [vmem:[#allocation3 + $0x4] sm:$0x3]  ;;  %v7618_v7 = vpack.c.bf16 %v5955_v52, %v5954_v51 }
 0x685   :  { %7586 = vmatpush3.bf16.msra.mxu0 %v7585_v45  ;;  %7658 = vmatpush3.bf16.msra.mxu1 %v7657_v46  ;;  %v7615_v45 = vpack.c.bf16 %v5953_v30, %v5952_v22  ;;  %v7687_v46 = vpack.c.bf16 %v6001_v4, %v6000_v40  ;;  %v6012_v22 = vld [vmem:[%s10533_s10] ss:$0 sm:$0xff] }
 0x686   :  { %7587 = vmatprep.subr.bf16.mxu0 %v7917_v55  ;;  %7659 = vmatprep.subr.bf16.mxu1 %v7917_v55 }
 0x687   :  { %6509 = vmatprep.mubr.msk.f32.mxu0 %vm7918_vm9, %v7915_v0  ;;  %6614 = vmatprep.mubr.msk.f32.mxu1 %vm7918_vm9, %v7915_v0 }
 0x689   :  { %7589 = vmatpush3.bf16.msra.mxu0 %v7588_v18  ;;  %7661 = vmatpush3.bf16.msra.mxu1 %v7660_v48  ;;  %v7690_v18 = vpack.c.bf16 %v6003_v3, %v6002_v61  ;;  %v5956_v48 = vld [vmem:[%s10530_s7 + $0x240] sm:$0xff] }
 0x68a   :  { %7590 = vmatprep.subr.bf16.mxu0 %v7917_v55  ;;  %7662 = vmatprep.subr.bf16.mxu1 %v7917_v55  ;;  %v7621_v11 = vpack.c.bf16 %v5957_v53, %v5956_v48 }
 0x68d   :  { %7592 = vmatpush3.bf16.msra.mxu0 %v7591_v59  ;;  %7664 = vmatpush3.bf16.msra.mxu1 %v7663_v62  ;;  %v7693_v59 = vpack.c.bf16 %v6005_v15, %v6004_v13  ;;  %v5958_v62 = vld [vmem:[%s10530_s7 + $0x250] sm:$0xff] }
 0x68e   :  { %7593 = vmatprep.subr.bf16.mxu0 %v7917_v55  ;;  %7665 = vmatprep.subr.bf16.mxu1 %v7917_v55  ;;  %v7624_v19 = vpack.c.bf16 %v5959_v17, %v5958_v62 }
 0x691   :  { %7595 = vmatpush3.bf16.msra.mxu0 %v7594_v54  ;;  %7667 = vmatpush3.bf16.msra.mxu1 %v7666_v20  ;;  %v7696_v54 = vpack.c.bf16 %v6007_v47, %v6006_v12  ;;  %v5960_v20 = vld [vmem:[%s10530_s7 + $0x260] sm:$0xff] }
 0x692   :  { %7596 = vmatprep.subr.bf16.mxu0 %v7917_v55  ;;  %7668 = vmatprep.subr.bf16.mxu1 %v7917_v55  ;;  %v7627_v28 = vpack.c.bf16 %v5961_v21, %v5960_v20 }
 0x695   :  { %7598 = vmatpush3.bf16.msra.mxu0 %v7597_v29  ;;  %7670 = vmatpush3.bf16.msra.mxu1 %v7669_v31  ;;  %v7699_v29 = vpack.c.bf16 %v6009_v26, %v6008_v25  ;;  %v5962_v31 = vld [vmem:[%s10530_s7 + $0x270] sm:$0xff]  ;;  %s5410_s7 = sshll.u32 %s7919_s19, 4  ;;  %s5411_s7 = int_to_ptr.vmem [resolvable:$true] %s5410_s7 }
 0x696   :  { %7599 = vmatprep.subr.bf16.mxu0 %v7917_v55  ;;  %7671 = vmatprep.subr.bf16.mxu1 %v7917_v55  ;;  %v7630_v35 = vpack.c.bf16 %v5963_v32, %v5962_v31  ;;  %p7891_p9 = scmp.lt.s32.totalorder %s5411_s7, %s5411_s7 }
 0x699   :  { %7601 = vmatpush3.bf16.msra.mxu0 %v7600_v36  ;;  %7673 = vmatpush3.bf16.msra.mxu1 %v7672_v50  ;;  %v7702_v36 = vpack.c.bf16 %v6011_v10, %v6010_v34  ;;  %v4701_v50 = vld [vmem:[#allocation3 + $0x6] sm:$0x3] }
 0x69a   :  { %7602 = vmatprep.subr.bf16.mxu0 %v7917_v55  ;;  %7674 = vmatprep.subr.bf16.mxu1 %v7917_v55 }
 0x69d   :  { %7604 = vmatpush3.bf16.msra.mxu0 %v7603_v63  ;;  %7676 = vmatpush3.bf16.msra.mxu1 %v7675_v42  ;;  %v5233_v63 = vld [vmem:[%s10532_s9 + $0x18] sm:$0xff] }
 0x69e   :  { %7605 = vmatprep.subr.bf16.mxu0 %v7917_v55  ;;  %7677 = vmatprep.subr.bf16.mxu1 %v7917_v55  ;;  %v7708_v42 = vpack.c.bf16 %v5233_v63, %v5232_v38 }
 0x6a1   :  { %7607 = vmatpush3.bf16.msra.mxu0 %v7606_v5  ;;  %7679 = vmatpush3.bf16.msra.mxu1 %v7678_v44  ;;  %v7714_v5 = vpack.c.bf16 %v5237_v14, %v5236_v60 }
 0x6a2   :  { %7608 = vmatprep.subr.bf16.mxu0 %v7917_v55  ;;  %7680 = vmatprep.subr.bf16.mxu1 %v7917_v55 }
 0x6a4   :  { %6510 = vmatmul.mubr.f32.vlgmr.msra.gmra.mrb[42].mxu0 %v4699_v39  ;;  %6615 = vmatmul.mubr.f32.vlgmr.msra.gmra.mrb[24].mxu1 %v4699_v39  ;;  %v5320_v39 = vld [vmem:[%s10534_s11] sm:$0xff] }
 0x6a5   :  { %7610 = vmatpush3.bf16.msra.mxu0 %v7609_v49  ;;  %7682 = vmatpush3.bf16.msra.mxu1 %v7681_v43  ;;  %v5222_v49 = vld [vmem:[%s10531_s8] sm:$0x1] }
 0x6a6   :  { %7611 = vmatprep.subr.bf16.mxu0 %v7917_v55  ;;  %7683 = vmatprep.subr.bf16.mxu1 %v7917_v55 }
 0x6a7   :  { %6544 = vmatprep.mubr.msk.f32.mxu0 %vm7918_vm9, %v7915_v0  ;;  %6649 = vmatprep.mubr.msk.f32.mxu1 %vm7918_vm9, %v7915_v0 }
 0x6a9   :  { %7613 = vmatpush3.bf16.msra.mxu0 %v7612_v6  ;;  %7685 = vmatpush3.bf16.msra.mxu1 %v7684_v58  ;;  %v5321_v6 = vld [vmem:[%s10534_s11 + $0x8] sm:$0xff]  ;;  %s7886_s11 = scalar_lea.vmem %s5411_s7, 32 }
 0x6aa   :  { %7614 = vmatprep.subr.bf16.mxu0 %v7917_v55  ;;  %7686 = vmatprep.subr.bf16.mxu1 %v7917_v55  ;;  %v7717_v58 = vpack.c.bf16 %v5321_v6, %v5320_v39  ;;  %p7887_p8 = scmp.ne.s32.totalorder %s5411_s7, %s7886_s11  ;;  %p7892_p10 = scmp.lt.s32.totalorder %s7886_s11, %s7886_s11 }
 0x6ac   :  { %p7893_p11 = por %p7892_p10, %p7891_p9 }
 0x6ad   :  { %7616 = vmatpush3.bf16.msra.mxu0 %v7615_v45  ;;  %7688 = vmatpush3.bf16.msra.mxu1 %v7687_v46  ;;  %v6014_v46 = vld [vmem:[%s10535_s12] ss:$0 sm:$0xff] }
 0x6ae   :  { %7617 = vmatprep.subr.bf16.mxu0 %v7917_v55  ;;  %7689 = vmatprep.subr.bf16.mxu1 %v7917_v55  ;;  %p7894_p12 = pnand %p7893_p11, %p7887_p8 }
 0x6b1   :  { %7619 = vmatpush3.bf16.msra.mxu0 %v7618_v7  ;;  %7691 = vmatpush3.bf16.msra.mxu1 %v7690_v18 }
 0x6b2   :  { %7620 = vmatprep.subr.bf16.mxu0 %v7917_v55  ;;  %7692 = vmatprep.subr.bf16.mxu1 %v7917_v55 }
 0x6b5   :  { %7622 = vmatpush3.bf16.msra.mxu0 %v7621_v11  ;;  %7694 = vmatpush3.bf16.msra.mxu1 %v7693_v59 }
 0x6b6   :  { %7623 = vmatprep.subr.bf16.mxu0 %v7917_v55  ;;  %7695 = vmatprep.subr.bf16.mxu1 %v7917_v55 }
 0x6b9   :  { %7625 = vmatpush3.bf16.msra.mxu0 %v7624_v19  ;;  %7697 = vmatpush3.bf16.msra.mxu1 %v7696_v54 }
 0x6ba   :  { %7626 = vmatprep.subr.bf16.mxu0 %v7917_v55  ;;  %7698 = vmatprep.subr.bf16.mxu1 %v7917_v55 }
 0x6bd   :  { %7628 = vmatpush3.bf16.msra.mxu0 %v7627_v28  ;;  %7700 = vmatpush3.bf16.msra.mxu1 %v7699_v29 }
 0x6be   :  { %7629 = vmatprep.subr.bf16.mxu0 %v7917_v55  ;;  %7701 = vmatprep.subr.bf16.mxu1 %v7917_v55 }
 0x6c1   :  { %7631 = vmatpush3.bf16.msra.mxu0 %v7630_v35  ;;  %7703 = vmatpush3.bf16.msra.mxu1 %v7702_v36 }
 0x6c2   :  { %7704 = vmatprep.subr.bf16.mxu0 %v7917_v55  ;;  %7716 = vmatprep.subr.bf16.mxu1 %v7917_v55 }
 0x6c4   :  { %6545 = vmatmul.mubr.f32.vlgmr.msra.gmra.mrb[42].mxu0 %v4701_v50  ;;  %6650 = vmatmul.mubr.f32.vlgmr.msra.gmra.mrb[24].mxu1 %v4701_v50 }
 0x6c5   :  { %6668 = vmatprep.mubr.msk.f32.mxu0 %vm7918_vm9, %v7915_v0  ;;  %6675 = vmatprep.mubr.msk.f32.mxu1 %vm7918_vm9, %v7915_v0  ;;  %v5234_v0 = vld [vmem:[%s10532_s9 + $0x20] sm:$0xff] }
 0x6c6   :  { %7706 = vmatpush3.bf16.msra.mxu0 %v7705_v41  ;;  %v7711_v57 = vpack.c.bf16 %v5235_v16, %v5234_v0  ;;  %7718 = vmatpush3.bf16.msra.mxu1 %v7717_v58 }
 0x6c7   :  { %7707 = vmatprep.subr.bf16.mxu0 %v7917_v55 }
 0x6ca   :  { %7709 = vmatpush3.bf16.msra.mxu0 %v7708_v42 }
 0x6cb   :  { %7710 = vmatprep.subr.bf16.mxu0 %v7917_v55 }
 0x6ce   :  { %7712 = vmatpush3.bf16.msra.mxu0 %v7711_v57 }
 0x6cf   :  { %7713 = vmatprep.subr.bf16.mxu0 %v7917_v55 }
 0x6d2   :  { %7715 = vmatpush3.bf16.msra.mxu0 %v7714_v5 }
 0x797   :  { %v4956_v44 = vpop.f32.mrb[42].mxu0  ;;  %v5215_v56 = vpop.f32.mrb[24].mxu1 }
 0x798   :  { %v5220_v24 = vmax.f32 %v4956_v44, %v5215_v56  ;;  %v6546_v27 = vpop.f32.mrb[43].mxu0  ;;  %v6651_v8 = vpop.f32.mrb[25].mxu1 }
 0x79a   :  { %5221 = vst.msk [vmem:[#allocation7] sm:$0x3] %vm2659_vm10, %v5220_v24 }
 0x7a1   :  { %v5223_v43 = vld [vmem:[#allocation7] sm:$0x1]  ;;  %v5224_v2 = vld [vmem:[#allocation7 + $0x1] sm:$0x1] }
 0x7a2   :  { %v5225_v33 = vmax.f32 %v5223_v43, %v5224_v2 }
 0x7a4   :  { %v5226_v23 = vadd.f32 %v5225_v33, %v5222_v49 }
 0x7a6   :  { %v5227_v1 = vmax.f32 %v5226_v23, 0.0 }
 0x7a8   :  { %5228 = vst.msk [vmem:[#allocation4 + $0x1] sm:$0x1] %vm2667_vm11, %v5227_v1 }
 0x7af   :  { %v5229_v55 = vld [vmem:[#allocation4] sm:$0x3] }
 0x7b0   :  { %6669 = vmatmul.mubr.msk.f32.vlgmr.msra.gmra.mrb[44].mxu0 %vm5245_vm12, %v5229_v55 }
 0x883   :  { %v5315_v30 = vpop.f32.mrb[44].mxu0 }
 0x884   :  { %v5316_v40 = vadd.f32 %v6012_v22, %v5315_v30  ;;  %v6670_v4 = vpop.f32.mrb[45].mxu0 }
 0x886   :  { %v5319_v45 = vmax.f32 %v5316_v40, 0.0 }
 0x888   :  { %6676 = vmatmul.mubr.msk.f32.vlgmr.msra.gmra.mrb[26].mxu1 %vm1056_vm5, %v5319_v45 }
 0x95b   :  { %v5398_v51 = vpop.f32.mrb[26].mxu1 }
 0x95c   :  { %v5399_v52 = vadd.f32 %v6014_v46, %v5398_v51  ;;  %v6677_v61 = vpop.f32.mrb[27].mxu1 }
 0x95e   :  { %5403 = vst.msk [vmem:[#allocation11] sm:$0x3] %vm5402_vm13, %v5399_v52 }
 0x95f   :  { %7897 = shalt.err (!%p7894_p12)
}
 0x960   :  { %s7898_s21 = scalar_lea.hbm %s10536_s13, 32 }
 0x961   :  { %p7899_p13 = scmp.ne.s32.totalorder %s10536_s13, %s7898_s21  ;;  %p7902_p0 = scmp.lt.u32.totalorder %s7898_s21, %s10536_s13 }
 0x963   :  { %p7904_p1 = pnand %p7902_p0, %p7899_p13 }
 0x965   :  { %7907 = shalt.err (!%p7904_p1)
}
 0x966   :  { %5413 = dma.vmem_to_hbm [thread:$0]  %s5411_s7, 32, %s10536_s13, [#allocation10]  }
 0x967   :  { %7910 = dma.done.wait [#allocation10], 32  }
 0x968   :  { %7911 = vsyncadd [#allocation10], 4294967264 }
 0x969   :  { %5417 = vsyncpa [#allocation9], 1 }
 0x96a   :  { %5418 = vsyncpa [#allocation10], 1 }

</bundles_post_ra>
